<compile_context>
chip_gen: v6e
topology: v6e:2x2x1
jax: 0.10.0
libtpu: 0.0.40
codegen_flags: <defaults>
</compile_context>

<pallas_src>
import math
import functools

import jax
import jax.numpy as jnp
from jax.experimental import pallas as pl
from jax.experimental.pallas import tpu as pltpu


# ----------------------------- Pallas kernel -------------------------------

def _layer_norm(x, gamma, beta, eps=1e-5):
    mu = jnp.mean(x, axis=-1, keepdims=True)
    var = jnp.mean((x - mu) ** 2, axis=-1, keepdims=True)
    return (x - mu) * jax.lax.rsqrt(var + eps) * gamma + beta


def fused_transformer_kernel(x_ref,
                             wqkv_ref, bqkv_ref, wo_ref, bo_ref,
                             w1_ref, b1_ref, w2_ref, b2_ref,
                             g1_ref, beta1_ref, g2_ref, beta2_ref,
                             wfc_ref, bfc_ref,
                             out_ref, *, nhead, num_layers):
    """All encoder layers (post-norm, ReLU FFN, dropout=id) + mean-pool + FC."""
    x = x_ref[...]                                   # (N, L, E) = (S, B, E) f32
    N, L, E = x.shape
    hd = E // nhead
    scale = 1.0 / math.sqrt(hd)

    for layer in range(num_layers):                  # small static fused loop
        wqkv = wqkv_ref[layer]                       # (E, 3E)   lane-dense K,N
        bqkv = bqkv_ref[layer]                       # (1, 3E)
        wo = wo_ref[layer]                           # (E, E)
        bo = bo_ref[layer]                           # (1, E)
        w1 = w1_ref[layer]                           # (E, H)
        b1 = b1_ref[layer]                           # (1, H)
        w2 = w2_ref[layer]                           # (H, E)
        b2 = b2_ref[layer]                           # (1, E)
        g1 = g1_ref[layer]
        be1 = beta1_ref[layer]
        g2 = g2_ref[layer]
        be2 = beta2_ref[layer]

        # ---- self-attention: one QKV projection, heads batched together ----
        qkv = jnp.einsum('nle,ef->nlf', x, wqkv,
                         preferred_element_type=jnp.float32) + bqkv  # (N,L,3E)

        # head-major batching along the leading axis -> (nhead*N, L, hd)
        qb = jnp.concatenate(
            [qkv[:, :, h * hd:(h + 1) * hd] for h in range(nhead)], axis=0)
        kb = jnp.concatenate(
            [qkv[:, :, E + h * hd:E + (h + 1) * hd] for h in range(nhead)],
            axis=0)
        vb = jnp.concatenate(
            [qkv[:, :, 2 * E + h * hd:2 * E + (h + 1) * hd]
             for h in range(nhead)], axis=0)

        s = jnp.einsum('bld,bmd->blm', qb, kb,
                       preferred_element_type=jnp.float32) * scale  # (hN,L,L)
        s = s - jnp.max(s, axis=-1, keepdims=True)
        p = jnp.exp(s)
        p = p * pl.reciprocal(jnp.sum(p, axis=-1, keepdims=True), approx=True)
        ctx = jnp.einsum('blm,bmd->bld', p, vb,
                         preferred_element_type=jnp.float32)        # (hN,L,hd)

        attn = jnp.concatenate(
            [ctx[h * N:(h + 1) * N] for h in range(nhead)], axis=-1)  # (N,L,E)
        attn = jnp.einsum('nle,ef->nlf', attn, wo,
                          preferred_element_type=jnp.float32) + bo

        # ---- residual + post-norm ----
        x1 = _layer_norm(x + attn, g1, be1)

        # ---- feed-forward (ReLU) ----
        h1 = jnp.einsum('nle,eh->nlh', x1, w1,
                        preferred_element_type=jnp.float32) + b1
        h1 = jnp.maximum(h1, 0.0)
        ff = jnp.einsum('nlh,he->nle', h1, w2,
                        preferred_element_type=jnp.float32) + b2

        x = _layer_norm(x1 + ff, g2, be2)

    # ---- mean over N (= torch.mean(x, dim=1)) + final Linear ----
    m = jnp.mean(x, axis=0)                                          # (L, E)
    out_ref[...] = jnp.dot(m, wfc_ref[...],
                           preferred_element_type=jnp.float32) + bfc_ref[...]


# ------------------------------ Wrapper -------------------------------------

def run_fused_forward(x, stacked, wfc, bfc, *, nhead, num_layers):
    L = x.shape[1]
    C = wfc.shape[1]
    args = (x,
            stacked['wqkv'], stacked['bqkv'], stacked['wo'], stacked['bo'],
            stacked['w1'], stacked['b1'], stacked['w2'], stacked['b2'],
            stacked['g1'], stacked['beta1'], stacked['g2'], stacked['beta2'],
            wfc, bfc)
    kernel = functools.partial(fused_transformer_kernel,
                               nhead=nhead, num_layers=num_layers)
    return pl.pallas_call(
        kernel,
        out_shape=jax.ShapeDtypeStruct((L, C), jnp.float32),
        in_specs=[pl.BlockSpec(memory_space=pltpu.MemorySpace.VMEM)
                  for _ in range(len(args))],
        out_specs=pl.BlockSpec(memory_space=pltpu.MemorySpace.VMEM),
        compiler_params=pltpu.CompilerParams(
            vmem_limit_bytes=32 * 1024 * 1024),
    )(*args)


# --------------------------- Parameter creation -----------------------------

def make_positional_encoding(d_model, max_len):
    pos = jnp.arange(max_len, dtype=jnp.float32)[:, None]
    div = jnp.exp(jnp.arange(0, d_model, 2, dtype=jnp.float32)
                  * (-math.log(10000.0) / d_model))
    pe = jnp.zeros((max_len, d_model), dtype=jnp.float32)
    pe = pe.at[:, 0::2].set(jnp.sin(pos * div))
    pe = pe.at[:, 1::2].set(jnp.cos(pos * div))
    return pe                                           # (max_len, d_model)


def init_params(key, vocab_size, d_model, nhead, hiddendim, numlayers,
                num_classes):
    E, H, C, NL = d_model, hiddendim, num_classes, numlayers
    keys = jax.random.split(key, 8)
    scale = 0.05
    # All matmul weights are stored pre-transposed, lane-dense (K, N).
    stacked = {
        'wqkv': jax.random.normal(keys[0], (NL, E, 3 * E), jnp.float32) * scale,
        'bqkv': jnp.zeros((NL, 1, 3 * E), jnp.float32),
        'wo': jax.random.normal(keys[1], (NL, E, E), jnp.float32) * scale,
        'bo': jnp.zeros((NL, 1, E), jnp.float32),
        'w1': jax.random.normal(keys[2], (NL, E, H), jnp.float32) * scale,
        'b1': jax.random.normal(keys[3], (NL, 1, H), jnp.float32) * scale,
        'w2': jax.random.normal(keys[4], (NL, H, E), jnp.float32) * scale,
        'b2': jax.random.normal(keys[5], (NL, 1, E), jnp.float32) * scale,
        'g1': jnp.ones((NL, 1, E), jnp.float32),
        'beta1': jnp.zeros((NL, 1, E), jnp.float32),
        'g2': jnp.ones((NL, 1, E), jnp.float32),
        'beta2': jnp.zeros((NL, 1, E), jnp.float32),
    }
    params = {
        'embedding': jax.random.normal(keys[6], (vocab_size, E),
                                       jnp.float32) * scale,
        'stacked': stacked,
        'wfc': jax.random.normal(keys[7], (E, C), jnp.float32) * scale,
        'bfc': jnp.zeros((1, C), jnp.float32),
    }
    return params


# ------------------------------ Forward pass --------------------------------

def transformer_classifier_forward(tokens, params, pe, nhead, num_layers):
    B, S = tokens.shape
    # Embedding lookup + positional encoding (glue, plain JAX), gathered
    # directly in (S, B, E) order to match batch_first=False semantics without
    # an extra transpose pass over the activations.
    # TODO(synk): dropout (p=0.1) has no eval-mode effect; treated as identity.
    x = params['embedding'][tokens.T]                    # (S, B, E)
    x = (x + pe[:S][:, None, :]).astype(jnp.float32)
    logits = run_fused_forward(x, params['stacked'],
                               params['wfc'], params['bfc'],
                               nhead=nhead, num_layers=num_layers)
    return logits                                        # (B, num_classes)


# ---------------------------------- Main ------------------------------------

if __name__ == "__main__":
    vocab_size, d_model, nhead = 100, 32, 4
    hiddendim, numlayers, num_classes = 64, 2, 2
    max_len = 250
    B, S = 2, 8

    key = jax.random.PRNGKey(0)
    k_tok, k_par = jax.random.split(key)

    tokens = jax.random.randint(k_tok, (B, S), 0, vocab_size, dtype=jnp.int32)
    params = init_params(k_par, vocab_size, d_model, nhead,
                         hiddendim, numlayers, num_classes)
    pe = make_positional_encoding(d_model, max_len)

    logits = transformer_classifier_forward(tokens, params, pe, nhead,
                                            numlayers)
    logits = jax.block_until_ready(logits)
    assert logits.shape == (B, num_classes)
    assert bool(jnp.all(jnp.isfinite(logits)))
    print("KERNEL_OK")
</pallas_src>

<mosaic_0001>
module attributes {stable_mosaic.version = 11 : i64} {
  func.func @fused_transformer_kernel(%arg0: memref<8x2x32xf32, #tpu.memory_space<vmem>>, %arg1: memref<2x32x96xf32, #tpu.memory_space<vmem>>, %arg2: memref<2x1x96xf32, #tpu.memory_space<vmem>>, %arg3: memref<2x32x32xf32, #tpu.memory_space<vmem>>, %arg4: memref<2x1x32xf32, #tpu.memory_space<vmem>>, %arg5: memref<2x32x64xf32, #tpu.memory_space<vmem>>, %arg6: memref<2x1x64xf32, #tpu.memory_space<vmem>>, %arg7: memref<2x64x32xf32, #tpu.memory_space<vmem>>, %arg8: memref<2x1x32xf32, #tpu.memory_space<vmem>>, %arg9: memref<2x1x32xf32, #tpu.memory_space<vmem>>, %arg10: memref<2x1x32xf32, #tpu.memory_space<vmem>>, %arg11: memref<2x1x32xf32, #tpu.memory_space<vmem>>, %arg12: memref<2x1x32xf32, #tpu.memory_space<vmem>>, %arg13: memref<32x2xf32, #tpu.memory_space<vmem>>, %arg14: memref<1x2xf32, #tpu.memory_space<vmem>>, %arg15: memref<2x2xf32, #tpu.memory_space<vmem>>) attributes {dimension_semantics = [], scalar_prefetch = 0 : i64, scratch_operands = 0 : i64, tpu.core_type = #tpu.core_type<tc>} {
    %c0 = arith.constant 0 : index
    %c0_0 = arith.constant 0 : index
    %c0_1 = arith.constant 0 : index
    %0 = vector.load %arg0[%c0, %c0_0, %c0_1] : memref<8x2x32xf32, #tpu.memory_space<vmem>>, vector<8x2x32xf32>
    %c0_2 = arith.constant 0 : index
    %c0_3 = arith.constant 0 : index
    %c0_4 = arith.constant 0 : index
    %1 = vector.load %arg1[%c0_2, %c0_3, %c0_4] : memref<2x32x96xf32, #tpu.memory_space<vmem>>, vector<1x32x96xf32>
    %2 = vector.shape_cast %1 : vector<1x32x96xf32> to vector<32x96xf32>
    %c0_5 = arith.constant 0 : index
    %c0_6 = arith.constant 0 : index
    %c0_7 = arith.constant 0 : index
    %3 = vector.load %arg2[%c0_5, %c0_6, %c0_7] : memref<2x1x96xf32, #tpu.memory_space<vmem>>, vector<1x1x96xf32>
    %4 = vector.shape_cast %3 : vector<1x1x96xf32> to vector<1x96xf32>
    %c0_8 = arith.constant 0 : index
    %c0_9 = arith.constant 0 : index
    %c0_10 = arith.constant 0 : index
    %5 = vector.load %arg3[%c0_8, %c0_9, %c0_10] : memref<2x32x32xf32, #tpu.memory_space<vmem>>, vector<1x32x32xf32>
    %6 = vector.shape_cast %5 : vector<1x32x32xf32> to vector<32x32xf32>
    %c0_11 = arith.constant 0 : index
    %c0_12 = arith.constant 0 : index
    %c0_13 = arith.constant 0 : index
    %7 = vector.load %arg4[%c0_11, %c0_12, %c0_13] : memref<2x1x32xf32, #tpu.memory_space<vmem>>, vector<1x1x32xf32>
    %8 = vector.shape_cast %7 : vector<1x1x32xf32> to vector<1x32xf32>
    %c0_14 = arith.constant 0 : index
    %c0_15 = arith.constant 0 : index
    %c0_16 = arith.constant 0 : index
    %9 = vector.load %arg5[%c0_14, %c0_15, %c0_16] : memref<2x32x64xf32, #tpu.memory_space<vmem>>, vector<1x32x64xf32>
    %10 = vector.shape_cast %9 : vector<1x32x64xf32> to vector<32x64xf32>
    %c0_17 = arith.constant 0 : index
    %c0_18 = arith.constant 0 : index
    %c0_19 = arith.constant 0 : index
    %11 = vector.load %arg6[%c0_17, %c0_18, %c0_19] : memref<2x1x64xf32, #tpu.memory_space<vmem>>, vector<1x1x64xf32>
    %12 = vector.shape_cast %11 : vector<1x1x64xf32> to vector<1x64xf32>
    %c0_20 = arith.constant 0 : index
    %c0_21 = arith.constant 0 : index
    %c0_22 = arith.constant 0 : index
    %13 = vector.load %arg7[%c0_20, %c0_21, %c0_22] : memref<2x64x32xf32, #tpu.memory_space<vmem>>, vector<1x64x32xf32>
    %14 = vector.shape_cast %13 : vector<1x64x32xf32> to vector<64x32xf32>
    %c0_23 = arith.constant 0 : index
    %c0_24 = arith.constant 0 : index
    %c0_25 = arith.constant 0 : index
    %15 = vector.load %arg8[%c0_23, %c0_24, %c0_25] : memref<2x1x32xf32, #tpu.memory_space<vmem>>, vector<1x1x32xf32>
    %16 = vector.shape_cast %15 : vector<1x1x32xf32> to vector<1x32xf32>
    %c0_26 = arith.constant 0 : index
    %c0_27 = arith.constant 0 : index
    %c0_28 = arith.constant 0 : index
    %17 = vector.load %arg9[%c0_26, %c0_27, %c0_28] : memref<2x1x32xf32, #tpu.memory_space<vmem>>, vector<1x1x32xf32>
    %18 = vector.shape_cast %17 : vector<1x1x32xf32> to vector<1x32xf32>
    %c0_29 = arith.constant 0 : index
    %c0_30 = arith.constant 0 : index
    %c0_31 = arith.constant 0 : index
    %19 = vector.load %arg10[%c0_29, %c0_30, %c0_31] : memref<2x1x32xf32, #tpu.memory_space<vmem>>, vector<1x1x32xf32>
    %20 = vector.shape_cast %19 : vector<1x1x32xf32> to vector<1x32xf32>
    %c0_32 = arith.constant 0 : index
    %c0_33 = arith.constant 0 : index
    %c0_34 = arith.constant 0 : index
    %21 = vector.load %arg11[%c0_32, %c0_33, %c0_34] : memref<2x1x32xf32, #tpu.memory_space<vmem>>, vector<1x1x32xf32>
    %22 = vector.shape_cast %21 : vector<1x1x32xf32> to vector<1x32xf32>
    %c0_35 = arith.constant 0 : index
    %c0_36 = arith.constant 0 : index
    %c0_37 = arith.constant 0 : index
    %23 = vector.load %arg12[%c0_35, %c0_36, %c0_37] : memref<2x1x32xf32, #tpu.memory_space<vmem>>, vector<1x1x32xf32>
    %24 = vector.shape_cast %23 : vector<1x1x32xf32> to vector<1x32xf32>
    "tpu.trace_start"() <{level = 10 : i32, message = "nle,ef->nlf"}> : () -> ()
    %cst = arith.constant dense<0.000000e+00> : vector<8x2x96xf32>
    %25 = tpu.matmul %0, %2, %cst {dimension_numbers = #tpu.dot_dimension_numbers<[2], [0], [0, 1], [1], [0, 0, 0, 1, 1, 1], [], []>} : vector<8x2x32xf32>, vector<32x96xf32>, vector<8x2x96xf32> -> vector<8x2x96xf32>
    "tpu.trace_stop"() : () -> ()
    %26 = vector.shape_cast %4 : vector<1x96xf32> to vector<1x1x96xf32>
    %27 = vector.broadcast %26 : vector<1x1x96xf32> to vector<8x2x96xf32>
    %28 = arith.addf %25, %27 : vector<8x2x96xf32>
    %29 = vector.extract_strided_slice %28 {offsets = [0, 0, 0], sizes = [8, 2, 8], strides = [1, 1, 1]} : vector<8x2x96xf32> to vector<8x2x8xf32>
    %30 = vector.extract_strided_slice %28 {offsets = [0, 0, 8], sizes = [8, 2, 8], strides = [1, 1, 1]} : vector<8x2x96xf32> to vector<8x2x8xf32>
    %31 = vector.extract_strided_slice %28 {offsets = [0, 0, 16], sizes = [8, 2, 8], strides = [1, 1, 1]} : vector<8x2x96xf32> to vector<8x2x8xf32>
    %32 = vector.extract_strided_slice %28 {offsets = [0, 0, 24], sizes = [8, 2, 8], strides = [1, 1, 1]} : vector<8x2x96xf32> to vector<8x2x8xf32>
    %33 = tpu.concatenate %29, %30, %31, %32 in 0 : vector<8x2x8xf32>, vector<8x2x8xf32>, vector<8x2x8xf32>, vector<8x2x8xf32> -> vector<32x2x8xf32>
    %34 = vector.extract_strided_slice %28 {offsets = [0, 0, 32], sizes = [8, 2, 8], strides = [1, 1, 1]} : vector<8x2x96xf32> to vector<8x2x8xf32>
    %35 = vector.extract_strided_slice %28 {offsets = [0, 0, 40], sizes = [8, 2, 8], strides = [1, 1, 1]} : vector<8x2x96xf32> to vector<8x2x8xf32>
    %36 = vector.extract_strided_slice %28 {offsets = [0, 0, 48], sizes = [8, 2, 8], strides = [1, 1, 1]} : vector<8x2x96xf32> to vector<8x2x8xf32>
    %37 = vector.extract_strided_slice %28 {offsets = [0, 0, 56], sizes = [8, 2, 8], strides = [1, 1, 1]} : vector<8x2x96xf32> to vector<8x2x8xf32>
    %38 = tpu.concatenate %34, %35, %36, %37 in 0 : vector<8x2x8xf32>, vector<8x2x8xf32>, vector<8x2x8xf32>, vector<8x2x8xf32> -> vector<32x2x8xf32>
    %39 = vector.extract_strided_slice %28 {offsets = [0, 0, 64], sizes = [8, 2, 8], strides = [1, 1, 1]} : vector<8x2x96xf32> to vector<8x2x8xf32>
    %40 = vector.extract_strided_slice %28 {offsets = [0, 0, 72], sizes = [8, 2, 8], strides = [1, 1, 1]} : vector<8x2x96xf32> to vector<8x2x8xf32>
    %41 = vector.extract_strided_slice %28 {offsets = [0, 0, 80], sizes = [8, 2, 8], strides = [1, 1, 1]} : vector<8x2x96xf32> to vector<8x2x8xf32>
    %42 = vector.extract_strided_slice %28 {offsets = [0, 0, 88], sizes = [8, 2, 8], strides = [1, 1, 1]} : vector<8x2x96xf32> to vector<8x2x8xf32>
    %43 = tpu.concatenate %39, %40, %41, %42 in 0 : vector<8x2x8xf32>, vector<8x2x8xf32>, vector<8x2x8xf32>, vector<8x2x8xf32> -> vector<32x2x8xf32>
    "tpu.trace_start"() <{level = 10 : i32, message = "bld,bmd->blm"}> : () -> ()
    %cst_38 = arith.constant dense<0.000000e+00> : vector<32x2x2xf32>
    %44 = tpu.matmul %33, %38, %cst_38 {dimension_numbers = #tpu.dot_dimension_numbers<[2], [2], [1], [1], [0, 0, 0, 1, 1, 1], [0], [0]>} : vector<32x2x8xf32>, vector<32x2x8xf32>, vector<32x2x2xf32> -> vector<32x2x2xf32>
    "tpu.trace_stop"() : () -> ()
    %cst_39 = arith.constant 0.353553385 : f32
    %45 = vector.broadcast %cst_39 : f32 to vector<32x2x2xf32>
    %46 = arith.mulf %44, %45 : vector<32x2x2xf32>
    %cst_40 = arith.constant dense<0xFF800000> : vector<32x2xf32>
    %47 = vector.multi_reduction <maximumf>, %46, %cst_40 [2] : vector<32x2x2xf32> to vector<32x2xf32>
    %48 = vector.shape_cast %47 : vector<32x2xf32> to vector<32x2x1xf32>
    %49 = vector.broadcast %48 : vector<32x2x1xf32> to vector<32x2x2xf32>
    %50 = arith.subf %46, %49 : vector<32x2x2xf32>
    %51 = math.exp %50 : vector<32x2x2xf32>
    %cst_41 = arith.constant dense<0.000000e+00> : vector<32x2xf32>
    %52 = vector.multi_reduction <add>, %51, %cst_41 [2] : vector<32x2x2xf32> to vector<32x2xf32>
    %53 = vector.shape_cast %52 : vector<32x2xf32> to vector<32x2x1xf32>
    %54 = tpu.reciprocal %53 {approx = true} : vector<32x2x1xf32> -> vector<32x2x1xf32>
    %55 = vector.broadcast %54 : vector<32x2x1xf32> to vector<32x2x2xf32>
    %56 = arith.mulf %51, %55 : vector<32x2x2xf32>
    "tpu.trace_start"() <{level = 10 : i32, message = "blm,bmd->bld"}> : () -> ()
    %cst_42 = arith.constant dense<0.000000e+00> : vector<32x2x8xf32>
    %57 = tpu.matmul %56, %43, %cst_42 {dimension_numbers = #tpu.dot_dimension_numbers<[2], [1], [1], [2], [0, 0, 0, 1, 1, 2], [0], [0]>} : vector<32x2x2xf32>, vector<32x2x8xf32>, vector<32x2x8xf32> -> vector<32x2x8xf32>
    "tpu.trace_stop"() : () -> ()
    %58 = vector.extract_strided_slice %57 {offsets = [0, 0, 0], sizes = [8, 2, 8], strides = [1, 1, 1]} : vector<32x2x8xf32> to vector<8x2x8xf32>
    %59 = vector.extract_strided_slice %57 {offsets = [8, 0, 0], sizes = [8, 2, 8], strides = [1, 1, 1]} : vector<32x2x8xf32> to vector<8x2x8xf32>
    %60 = vector.extract_strided_slice %57 {offsets = [16, 0, 0], sizes = [8, 2, 8], strides = [1, 1, 1]} : vector<32x2x8xf32> to vector<8x2x8xf32>
    %61 = vector.extract_strided_slice %57 {offsets = [24, 0, 0], sizes = [8, 2, 8], strides = [1, 1, 1]} : vector<32x2x8xf32> to vector<8x2x8xf32>
    %62 = tpu.concatenate %58, %59, %60, %61 in 2 : vector<8x2x8xf32>, vector<8x2x8xf32>, vector<8x2x8xf32>, vector<8x2x8xf32> -> vector<8x2x32xf32>
    "tpu.trace_start"() <{level = 10 : i32, message = "nle,ef->nlf"}> : () -> ()
    %cst_43 = arith.constant dense<0.000000e+00> : vector<8x2x32xf32>
    %63 = tpu.matmul %62, %6, %cst_43 {dimension_numbers = #tpu.dot_dimension_numbers<[2], [0], [0, 1], [1], [0, 0, 0, 1, 1, 1], [], []>} : vector<8x2x32xf32>, vector<32x32xf32>, vector<8x2x32xf32> -> vector<8x2x32xf32>
    "tpu.trace_stop"() : () -> ()
    %64 = vector.shape_cast %8 : vector<1x32xf32> to vector<1x1x32xf32>
    %65 = vector.broadcast %64 : vector<1x1x32xf32> to vector<8x2x32xf32>
    %66 = arith.addf %63, %65 : vector<8x2x32xf32>
    %67 = arith.addf %0, %66 : vector<8x2x32xf32>
    %cst_44 = arith.constant dense<0.000000e+00> : vector<8x2xf32>
    %68 = vector.multi_reduction <add>, %67, %cst_44 [2] : vector<8x2x32xf32> to vector<8x2xf32>
    %69 = vector.shape_cast %68 : vector<8x2xf32> to vector<8x2x1xf32>
    %cst_45 = arith.constant 3.200000e+01 : f32
    %70 = vector.broadcast %cst_45 : f32 to vector<8x2x1xf32>
    %71 = arith.divf %69, %70 : vector<8x2x1xf32>
    %72 = vector.broadcast %71 : vector<8x2x1xf32> to vector<8x2x32xf32>
    %73 = arith.subf %67, %72 : vector<8x2x32xf32>
    %74 = arith.mulf %73, %73 : vector<8x2x32xf32>
    %cst_46 = arith.constant dense<0.000000e+00> : vector<8x2xf32>
    %75 = vector.multi_reduction <add>, %74, %cst_46 [2] : vector<8x2x32xf32> to vector<8x2xf32>
    %76 = vector.shape_cast %75 : vector<8x2xf32> to vector<8x2x1xf32>
    %cst_47 = arith.constant 3.200000e+01 : f32
    %77 = vector.broadcast %cst_47 : f32 to vector<8x2x1xf32>
    %78 = arith.divf %76, %77 : vector<8x2x1xf32>
    %79 = vector.broadcast %71 : vector<8x2x1xf32> to vector<8x2x32xf32>
    %80 = arith.subf %67, %79 : vector<8x2x32xf32>
    %cst_48 = arith.constant 9.99999974E-6 : f32
    %81 = vector.broadcast %cst_48 : f32 to vector<8x2x1xf32>
    %82 = arith.addf %78, %81 : vector<8x2x1xf32>
    %83 = math.rsqrt %82 : vector<8x2x1xf32>
    %84 = vector.broadcast %83 : vector<8x2x1xf32> to vector<8x2x32xf32>
    %85 = arith.mulf %80, %84 : vector<8x2x32xf32>
    %86 = vector.shape_cast %18 : vector<1x32xf32> to vector<1x1x32xf32>
    %87 = vector.broadcast %86 : vector<1x1x32xf32> to vector<8x2x32xf32>
    %88 = arith.mulf %85, %87 : vector<8x2x32xf32>
    %89 = vector.shape_cast %20 : vector<1x32xf32> to vector<1x1x32xf32>
    %90 = vector.broadcast %89 : vector<1x1x32xf32> to vector<8x2x32xf32>
    %91 = arith.addf %88, %90 : vector<8x2x32xf32>
    "tpu.trace_start"() <{level = 10 : i32, message = "nle,eh->nlh"}> : () -> ()
    %cst_49 = arith.constant dense<0.000000e+00> : vector<8x2x64xf32>
    %92 = tpu.matmul %91, %10, %cst_49 {dimension_numbers = #tpu.dot_dimension_numbers<[2], [0], [0, 1], [1], [0, 0, 0, 1, 1, 1], [], []>} : vector<8x2x32xf32>, vector<32x64xf32>, vector<8x2x64xf32> -> vector<8x2x64xf32>
    "tpu.trace_stop"() : () -> ()
    %93 = vector.shape_cast %12 : vector<1x64xf32> to vector<1x1x64xf32>
    %94 = vector.broadcast %93 : vector<1x1x64xf32> to vector<8x2x64xf32>
    %95 = arith.addf %92, %94 : vector<8x2x64xf32>
    %cst_50 = arith.constant 0.000000e+00 : f32
    %96 = vector.broadcast %cst_50 : f32 to vector<8x2x64xf32>
    %97 = arith.maximumf %95, %96 : vector<8x2x64xf32>
    "tpu.trace_start"() <{level = 10 : i32, message = "nlh,he->nle"}> : () -> ()
    %cst_51 = arith.constant dense<0.000000e+00> : vector<8x2x32xf32>
    %98 = tpu.matmul %97, %14, %cst_51 {dimension_numbers = #tpu.dot_dimension_numbers<[2], [0], [0, 1], [1], [0, 0, 0, 1, 1, 1], [], []>} : vector<8x2x64xf32>, vector<64x32xf32>, vector<8x2x32xf32> -> vector<8x2x32xf32>
    "tpu.trace_stop"() : () -> ()
    %99 = vector.shape_cast %16 : vector<1x32xf32> to vector<1x1x32xf32>
    %100 = vector.broadcast %99 : vector<1x1x32xf32> to vector<8x2x32xf32>
    %101 = arith.addf %98, %100 : vector<8x2x32xf32>
    %102 = arith.addf %91, %101 : vector<8x2x32xf32>
    %cst_52 = arith.constant dense<0.000000e+00> : vector<8x2xf32>
    %103 = vector.multi_reduction <add>, %102, %cst_52 [2] : vector<8x2x32xf32> to vector<8x2xf32>
    %104 = vector.shape_cast %103 : vector<8x2xf32> to vector<8x2x1xf32>
    %cst_53 = arith.constant 3.200000e+01 : f32
    %105 = vector.broadcast %cst_53 : f32 to vector<8x2x1xf32>
    %106 = arith.divf %104, %105 : vector<8x2x1xf32>
    %107 = vector.broadcast %106 : vector<8x2x1xf32> to vector<8x2x32xf32>
    %108 = arith.subf %102, %107 : vector<8x2x32xf32>
    %109 = arith.mulf %108, %108 : vector<8x2x32xf32>
    %cst_54 = arith.constant dense<0.000000e+00> : vector<8x2xf32>
    %110 = vector.multi_reduction <add>, %109, %cst_54 [2] : vector<8x2x32xf32> to vector<8x2xf32>
    %111 = vector.shape_cast %110 : vector<8x2xf32> to vector<8x2x1xf32>
    %cst_55 = arith.constant 3.200000e+01 : f32
    %112 = vector.broadcast %cst_55 : f32 to vector<8x2x1xf32>
    %113 = arith.divf %111, %112 : vector<8x2x1xf32>
    %114 = vector.broadcast %106 : vector<8x2x1xf32> to vector<8x2x32xf32>
    %115 = arith.subf %102, %114 : vector<8x2x32xf32>
    %cst_56 = arith.constant 9.99999974E-6 : f32
    %116 = vector.broadcast %cst_56 : f32 to vector<8x2x1xf32>
    %117 = arith.addf %113, %116 : vector<8x2x1xf32>
    %118 = math.rsqrt %117 : vector<8x2x1xf32>
    %119 = vector.broadcast %118 : vector<8x2x1xf32> to vector<8x2x32xf32>
    %120 = arith.mulf %115, %119 : vector<8x2x32xf32>
    %121 = vector.shape_cast %22 : vector<1x32xf32> to vector<1x1x32xf32>
    %122 = vector.broadcast %121 : vector<1x1x32xf32> to vector<8x2x32xf32>
    %123 = arith.mulf %120, %122 : vector<8x2x32xf32>
    %124 = vector.shape_cast %24 : vector<1x32xf32> to vector<1x1x32xf32>
    %125 = vector.broadcast %124 : vector<1x1x32xf32> to vector<8x2x32xf32>
    %126 = arith.addf %123, %125 : vector<8x2x32xf32>
    %c1 = arith.constant 1 : index
    %c0_57 = arith.constant 0 : index
    %c0_58 = arith.constant 0 : index
    %127 = vector.load %arg1[%c1, %c0_57, %c0_58] : memref<2x32x96xf32, #tpu.memory_space<vmem>>, vector<1x32x96xf32>
    %128 = vector.shape_cast %127 : vector<1x32x96xf32> to vector<32x96xf32>
    %c1_59 = arith.constant 1 : index
    %c0_60 = arith.constant 0 : index
    %c0_61 = arith.constant 0 : index
    %129 = vector.load %arg2[%c1_59, %c0_60, %c0_61] : memref<2x1x96xf32, #tpu.memory_space<vmem>>, vector<1x1x96xf32>
    %130 = vector.shape_cast %129 : vector<1x1x96xf32> to vector<1x96xf32>
    %c1_62 = arith.constant 1 : index
    %c0_63 = arith.constant 0 : index
    %c0_64 = arith.constant 0 : index
    %131 = vector.load %arg3[%c1_62, %c0_63, %c0_64] : memref<2x32x32xf32, #tpu.memory_space<vmem>>, vector<1x32x32xf32>
    %132 = vector.shape_cast %131 : vector<1x32x32xf32> to vector<32x32xf32>
    %c1_65 = arith.constant 1 : index
    %c0_66 = arith.constant 0 : index
    %c0_67 = arith.constant 0 : index
    %133 = vector.load %arg4[%c1_65, %c0_66, %c0_67] : memref<2x1x32xf32, #tpu.memory_space<vmem>>, vector<1x1x32xf32>
    %134 = vector.shape_cast %133 : vector<1x1x32xf32> to vector<1x32xf32>
    %c1_68 = arith.constant 1 : index
    %c0_69 = arith.constant 0 : index
    %c0_70 = arith.constant 0 : index
    %135 = vector.load %arg5[%c1_68, %c0_69, %c0_70] : memref<2x32x64xf32, #tpu.memory_space<vmem>>, vector<1x32x64xf32>
    %136 = vector.shape_cast %135 : vector<1x32x64xf32> to vector<32x64xf32>
    %c1_71 = arith.constant 1 : index
    %c0_72 = arith.constant 0 : index
    %c0_73 = arith.constant 0 : index
    %137 = vector.load %arg6[%c1_71, %c0_72, %c0_73] : memref<2x1x64xf32, #tpu.memory_space<vmem>>, vector<1x1x64xf32>
    %138 = vector.shape_cast %137 : vector<1x1x64xf32> to vector<1x64xf32>
    %c1_74 = arith.constant 1 : index
    %c0_75 = arith.constant 0 : index
    %c0_76 = arith.constant 0 : index
    %139 = vector.load %arg7[%c1_74, %c0_75, %c0_76] : memref<2x64x32xf32, #tpu.memory_space<vmem>>, vector<1x64x32xf32>
    %140 = vector.shape_cast %139 : vector<1x64x32xf32> to vector<64x32xf32>
    %c1_77 = arith.constant 1 : index
    %c0_78 = arith.constant 0 : index
    %c0_79 = arith.constant 0 : index
    %141 = vector.load %arg8[%c1_77, %c0_78, %c0_79] : memref<2x1x32xf32, #tpu.memory_space<vmem>>, vector<1x1x32xf32>
    %142 = vector.shape_cast %141 : vector<1x1x32xf32> to vector<1x32xf32>
    %c1_80 = arith.constant 1 : index
    %c0_81 = arith.constant 0 : index
    %c0_82 = arith.constant 0 : index
    %143 = vector.load %arg9[%c1_80, %c0_81, %c0_82] : memref<2x1x32xf32, #tpu.memory_space<vmem>>, vector<1x1x32xf32>
    %144 = vector.shape_cast %143 : vector<1x1x32xf32> to vector<1x32xf32>
    %c1_83 = arith.constant 1 : index
    %c0_84 = arith.constant 0 : index
    %c0_85 = arith.constant 0 : index
    %145 = vector.load %arg10[%c1_83, %c0_84, %c0_85] : memref<2x1x32xf32, #tpu.memory_space<vmem>>, vector<1x1x32xf32>
    %146 = vector.shape_cast %145 : vector<1x1x32xf32> to vector<1x32xf32>
    %c1_86 = arith.constant 1 : index
    %c0_87 = arith.constant 0 : index
    %c0_88 = arith.constant 0 : index
    %147 = vector.load %arg11[%c1_86, %c0_87, %c0_88] : memref<2x1x32xf32, #tpu.memory_space<vmem>>, vector<1x1x32xf32>
    %148 = vector.shape_cast %147 : vector<1x1x32xf32> to vector<1x32xf32>
    %c1_89 = arith.constant 1 : index
    %c0_90 = arith.constant 0 : index
    %c0_91 = arith.constant 0 : index
    %149 = vector.load %arg12[%c1_89, %c0_90, %c0_91] : memref<2x1x32xf32, #tpu.memory_space<vmem>>, vector<1x1x32xf32>
    %150 = vector.shape_cast %149 : vector<1x1x32xf32> to vector<1x32xf32>
    "tpu.trace_start"() <{level = 10 : i32, message = "nle,ef->nlf"}> : () -> ()
    %cst_92 = arith.constant dense<0.000000e+00> : vector<8x2x96xf32>
    %151 = tpu.matmul %126, %128, %cst_92 {dimension_numbers = #tpu.dot_dimension_numbers<[2], [0], [0, 1], [1], [0, 0, 0, 1, 1, 1], [], []>} : vector<8x2x32xf32>, vector<32x96xf32>, vector<8x2x96xf32> -> vector<8x2x96xf32>
    "tpu.trace_stop"() : () -> ()
    %152 = vector.shape_cast %130 : vector<1x96xf32> to vector<1x1x96xf32>
    %153 = vector.broadcast %152 : vector<1x1x96xf32> to vector<8x2x96xf32>
    %154 = arith.addf %151, %153 : vector<8x2x96xf32>
    %155 = vector.extract_strided_slice %154 {offsets = [0, 0, 0], sizes = [8, 2, 8], strides = [1, 1, 1]} : vector<8x2x96xf32> to vector<8x2x8xf32>
    %156 = vector.extract_strided_slice %154 {offsets = [0, 0, 8], sizes = [8, 2, 8], strides = [1, 1, 1]} : vector<8x2x96xf32> to vector<8x2x8xf32>
    %157 = vector.extract_strided_slice %154 {offsets = [0, 0, 16], sizes = [8, 2, 8], strides = [1, 1, 1]} : vector<8x2x96xf32> to vector<8x2x8xf32>
    %158 = vector.extract_strided_slice %154 {offsets = [0, 0, 24], sizes = [8, 2, 8], strides = [1, 1, 1]} : vector<8x2x96xf32> to vector<8x2x8xf32>
    %159 = tpu.concatenate %155, %156, %157, %158 in 0 : vector<8x2x8xf32>, vector<8x2x8xf32>, vector<8x2x8xf32>, vector<8x2x8xf32> -> vector<32x2x8xf32>
    %160 = vector.extract_strided_slice %154 {offsets = [0, 0, 32], sizes = [8, 2, 8], strides = [1, 1, 1]} : vector<8x2x96xf32> to vector<8x2x8xf32>
    %161 = vector.extract_strided_slice %154 {offsets = [0, 0, 40], sizes = [8, 2, 8], strides = [1, 1, 1]} : vector<8x2x96xf32> to vector<8x2x8xf32>
    %162 = vector.extract_strided_slice %154 {offsets = [0, 0, 48], sizes = [8, 2, 8], strides = [1, 1, 1]} : vector<8x2x96xf32> to vector<8x2x8xf32>
    %163 = vector.extract_strided_slice %154 {offsets = [0, 0, 56], sizes = [8, 2, 8], strides = [1, 1, 1]} : vector<8x2x96xf32> to vector<8x2x8xf32>
    %164 = tpu.concatenate %160, %161, %162, %163 in 0 : vector<8x2x8xf32>, vector<8x2x8xf32>, vector<8x2x8xf32>, vector<8x2x8xf32> -> vector<32x2x8xf32>
    %165 = vector.extract_strided_slice %154 {offsets = [0, 0, 64], sizes = [8, 2, 8], strides = [1, 1, 1]} : vector<8x2x96xf32> to vector<8x2x8xf32>
    %166 = vector.extract_strided_slice %154 {offsets = [0, 0, 72], sizes = [8, 2, 8], strides = [1, 1, 1]} : vector<8x2x96xf32> to vector<8x2x8xf32>
    %167 = vector.extract_strided_slice %154 {offsets = [0, 0, 80], sizes = [8, 2, 8], strides = [1, 1, 1]} : vector<8x2x96xf32> to vector<8x2x8xf32>
    %168 = vector.extract_strided_slice %154 {offsets = [0, 0, 88], sizes = [8, 2, 8], strides = [1, 1, 1]} : vector<8x2x96xf32> to vector<8x2x8xf32>
    %169 = tpu.concatenate %165, %166, %167, %168 in 0 : vector<8x2x8xf32>, vector<8x2x8xf32>, vector<8x2x8xf32>, vector<8x2x8xf32> -> vector<32x2x8xf32>
    "tpu.trace_start"() <{level = 10 : i32, message = "bld,bmd->blm"}> : () -> ()
    %cst_93 = arith.constant dense<0.000000e+00> : vector<32x2x2xf32>
    %170 = tpu.matmul %159, %164, %cst_93 {dimension_numbers = #tpu.dot_dimension_numbers<[2], [2], [1], [1], [0, 0, 0, 1, 1, 1], [0], [0]>} : vector<32x2x8xf32>, vector<32x2x8xf32>, vector<32x2x2xf32> -> vector<32x2x2xf32>
    "tpu.trace_stop"() : () -> ()
    %cst_94 = arith.constant 0.353553385 : f32
    %171 = vector.broadcast %cst_94 : f32 to vector<32x2x2xf32>
    %172 = arith.mulf %170, %171 : vector<32x2x2xf32>
    %cst_95 = arith.constant dense<0xFF800000> : vector<32x2xf32>
    %173 = vector.multi_reduction <maximumf>, %172, %cst_95 [2] : vector<32x2x2xf32> to vector<32x2xf32>
    %174 = vector.shape_cast %173 : vector<32x2xf32> to vector<32x2x1xf32>
    %175 = vector.broadcast %174 : vector<32x2x1xf32> to vector<32x2x2xf32>
    %176 = arith.subf %172, %175 : vector<32x2x2xf32>
    %177 = math.exp %176 : vector<32x2x2xf32>
    %cst_96 = arith.constant dense<0.000000e+00> : vector<32x2xf32>
    %178 = vector.multi_reduction <add>, %177, %cst_96 [2] : vector<32x2x2xf32> to vector<32x2xf32>
    %179 = vector.shape_cast %178 : vector<32x2xf32> to vector<32x2x1xf32>
    %180 = tpu.reciprocal %179 {approx = true} : vector<32x2x1xf32> -> vector<32x2x1xf32>
    %181 = vector.broadcast %180 : vector<32x2x1xf32> to vector<32x2x2xf32>
    %182 = arith.mulf %177, %181 : vector<32x2x2xf32>
    "tpu.trace_start"() <{level = 10 : i32, message = "blm,bmd->bld"}> : () -> ()
    %cst_97 = arith.constant dense<0.000000e+00> : vector<32x2x8xf32>
    %183 = tpu.matmul %182, %169, %cst_97 {dimension_numbers = #tpu.dot_dimension_numbers<[2], [1], [1], [2], [0, 0, 0, 1, 1, 2], [0], [0]>} : vector<32x2x2xf32>, vector<32x2x8xf32>, vector<32x2x8xf32> -> vector<32x2x8xf32>
    "tpu.trace_stop"() : () -> ()
    %184 = vector.extract_strided_slice %183 {offsets = [0, 0, 0], sizes = [8, 2, 8], strides = [1, 1, 1]} : vector<32x2x8xf32> to vector<8x2x8xf32>
    %185 = vector.extract_strided_slice %183 {offsets = [8, 0, 0], sizes = [8, 2, 8], strides = [1, 1, 1]} : vector<32x2x8xf32> to vector<8x2x8xf32>
    %186 = vector.extract_strided_slice %183 {offsets = [16, 0, 0], sizes = [8, 2, 8], strides = [1, 1, 1]} : vector<32x2x8xf32> to vector<8x2x8xf32>
    %187 = vector.extract_strided_slice %183 {offsets = [24, 0, 0], sizes = [8, 2, 8], strides = [1, 1, 1]} : vector<32x2x8xf32> to vector<8x2x8xf32>
    %188 = tpu.concatenate %184, %185, %186, %187 in 2 : vector<8x2x8xf32>, vector<8x2x8xf32>, vector<8x2x8xf32>, vector<8x2x8xf32> -> vector<8x2x32xf32>
    "tpu.trace_start"() <{level = 10 : i32, message = "nle,ef->nlf"}> : () -> ()
    %cst_98 = arith.constant dense<0.000000e+00> : vector<8x2x32xf32>
    %189 = tpu.matmul %188, %132, %cst_98 {dimension_numbers = #tpu.dot_dimension_numbers<[2], [0], [0, 1], [1], [0, 0, 0, 1, 1, 1], [], []>} : vector<8x2x32xf32>, vector<32x32xf32>, vector<8x2x32xf32> -> vector<8x2x32xf32>
    "tpu.trace_stop"() : () -> ()
    %190 = vector.shape_cast %134 : vector<1x32xf32> to vector<1x1x32xf32>
    %191 = vector.broadcast %190 : vector<1x1x32xf32> to vector<8x2x32xf32>
    %192 = arith.addf %189, %191 : vector<8x2x32xf32>
    %193 = arith.addf %126, %192 : vector<8x2x32xf32>
    %cst_99 = arith.constant dense<0.000000e+00> : vector<8x2xf32>
    %194 = vector.multi_reduction <add>, %193, %cst_99 [2] : vector<8x2x32xf32> to vector<8x2xf32>
    %195 = vector.shape_cast %194 : vector<8x2xf32> to vector<8x2x1xf32>
    %cst_100 = arith.constant 3.200000e+01 : f32
    %196 = vector.broadcast %cst_100 : f32 to vector<8x2x1xf32>
    %197 = arith.divf %195, %196 : vector<8x2x1xf32>
    %198 = vector.broadcast %197 : vector<8x2x1xf32> to vector<8x2x32xf32>
    %199 = arith.subf %193, %198 : vector<8x2x32xf32>
    %200 = arith.mulf %199, %199 : vector<8x2x32xf32>
    %cst_101 = arith.constant dense<0.000000e+00> : vector<8x2xf32>
    %201 = vector.multi_reduction <add>, %200, %cst_101 [2] : vector<8x2x32xf32> to vector<8x2xf32>
    %202 = vector.shape_cast %201 : vector<8x2xf32> to vector<8x2x1xf32>
    %cst_102 = arith.constant 3.200000e+01 : f32
    %203 = vector.broadcast %cst_102 : f32 to vector<8x2x1xf32>
    %204 = arith.divf %202, %203 : vector<8x2x1xf32>
    %205 = vector.broadcast %197 : vector<8x2x1xf32> to vector<8x2x32xf32>
    %206 = arith.subf %193, %205 : vector<8x2x32xf32>
    %cst_103 = arith.constant 9.99999974E-6 : f32
    %207 = vector.broadcast %cst_103 : f32 to vector<8x2x1xf32>
    %208 = arith.addf %204, %207 : vector<8x2x1xf32>
    %209 = math.rsqrt %208 : vector<8x2x1xf32>
    %210 = vector.broadcast %209 : vector<8x2x1xf32> to vector<8x2x32xf32>
    %211 = arith.mulf %206, %210 : vector<8x2x32xf32>
    %212 = vector.shape_cast %144 : vector<1x32xf32> to vector<1x1x32xf32>
    %213 = vector.broadcast %212 : vector<1x1x32xf32> to vector<8x2x32xf32>
    %214 = arith.mulf %211, %213 : vector<8x2x32xf32>
    %215 = vector.shape_cast %146 : vector<1x32xf32> to vector<1x1x32xf32>
    %216 = vector.broadcast %215 : vector<1x1x32xf32> to vector<8x2x32xf32>
    %217 = arith.addf %214, %216 : vector<8x2x32xf32>
    "tpu.trace_start"() <{level = 10 : i32, message = "nle,eh->nlh"}> : () -> ()
    %cst_104 = arith.constant dense<0.000000e+00> : vector<8x2x64xf32>
    %218 = tpu.matmul %217, %136, %cst_104 {dimension_numbers = #tpu.dot_dimension_numbers<[2], [0], [0, 1], [1], [0, 0, 0, 1, 1, 1], [], []>} : vector<8x2x32xf32>, vector<32x64xf32>, vector<8x2x64xf32> -> vector<8x2x64xf32>
    "tpu.trace_stop"() : () -> ()
    %219 = vector.shape_cast %138 : vector<1x64xf32> to vector<1x1x64xf32>
    %220 = vector.broadcast %219 : vector<1x1x64xf32> to vector<8x2x64xf32>
    %221 = arith.addf %218, %220 : vector<8x2x64xf32>
    %cst_105 = arith.constant 0.000000e+00 : f32
    %222 = vector.broadcast %cst_105 : f32 to vector<8x2x64xf32>
    %223 = arith.maximumf %221, %222 : vector<8x2x64xf32>
    "tpu.trace_start"() <{level = 10 : i32, message = "nlh,he->nle"}> : () -> ()
    %cst_106 = arith.constant dense<0.000000e+00> : vector<8x2x32xf32>
    %224 = tpu.matmul %223, %140, %cst_106 {dimension_numbers = #tpu.dot_dimension_numbers<[2], [0], [0, 1], [1], [0, 0, 0, 1, 1, 1], [], []>} : vector<8x2x64xf32>, vector<64x32xf32>, vector<8x2x32xf32> -> vector<8x2x32xf32>
    "tpu.trace_stop"() : () -> ()
    %225 = vector.shape_cast %142 : vector<1x32xf32> to vector<1x1x32xf32>
    %226 = vector.broadcast %225 : vector<1x1x32xf32> to vector<8x2x32xf32>
    %227 = arith.addf %224, %226 : vector<8x2x32xf32>
    %228 = arith.addf %217, %227 : vector<8x2x32xf32>
    %cst_107 = arith.constant dense<0.000000e+00> : vector<8x2xf32>
    %229 = vector.multi_reduction <add>, %228, %cst_107 [2] : vector<8x2x32xf32> to vector<8x2xf32>
    %230 = vector.shape_cast %229 : vector<8x2xf32> to vector<8x2x1xf32>
    %cst_108 = arith.constant 3.200000e+01 : f32
    %231 = vector.broadcast %cst_108 : f32 to vector<8x2x1xf32>
    %232 = arith.divf %230, %231 : vector<8x2x1xf32>
    %233 = vector.broadcast %232 : vector<8x2x1xf32> to vector<8x2x32xf32>
    %234 = arith.subf %228, %233 : vector<8x2x32xf32>
    %235 = arith.mulf %234, %234 : vector<8x2x32xf32>
    %cst_109 = arith.constant dense<0.000000e+00> : vector<8x2xf32>
    %236 = vector.multi_reduction <add>, %235, %cst_109 [2] : vector<8x2x32xf32> to vector<8x2xf32>
    %237 = vector.shape_cast %236 : vector<8x2xf32> to vector<8x2x1xf32>
    %cst_110 = arith.constant 3.200000e+01 : f32
    %238 = vector.broadcast %cst_110 : f32 to vector<8x2x1xf32>
    %239 = arith.divf %237, %238 : vector<8x2x1xf32>
    %240 = vector.broadcast %232 : vector<8x2x1xf32> to vector<8x2x32xf32>
    %241 = arith.subf %228, %240 : vector<8x2x32xf32>
    %cst_111 = arith.constant 9.99999974E-6 : f32
    %242 = vector.broadcast %cst_111 : f32 to vector<8x2x1xf32>
    %243 = arith.addf %239, %242 : vector<8x2x1xf32>
    %244 = math.rsqrt %243 : vector<8x2x1xf32>
    %245 = vector.broadcast %244 : vector<8x2x1xf32> to vector<8x2x32xf32>
    %246 = arith.mulf %241, %245 : vector<8x2x32xf32>
    %247 = vector.shape_cast %148 : vector<1x32xf32> to vector<1x1x32xf32>
    %248 = vector.broadcast %247 : vector<1x1x32xf32> to vector<8x2x32xf32>
    %249 = arith.mulf %246, %248 : vector<8x2x32xf32>
    %250 = vector.shape_cast %150 : vector<1x32xf32> to vector<1x1x32xf32>
    %251 = vector.broadcast %250 : vector<1x1x32xf32> to vector<8x2x32xf32>
    %252 = arith.addf %249, %251 : vector<8x2x32xf32>
    %cst_112 = arith.constant dense<0.000000e+00> : vector<2x32xf32>
    %253 = vector.multi_reduction <add>, %252, %cst_112 [0] : vector<8x2x32xf32> to vector<2x32xf32>
    %cst_113 = arith.constant 8.000000e+00 : f32
    %254 = vector.broadcast %cst_113 : f32 to vector<2x32xf32>
    %255 = arith.divf %253, %254 : vector<2x32xf32>
    %c0_114 = arith.constant 0 : index
    %c0_115 = arith.constant 0 : index
    %256 = vector.load %arg13[%c0_114, %c0_115] : memref<32x2xf32, #tpu.memory_space<vmem>>, vector<32x2xf32>
    %cst_116 = arith.constant dense<0.000000e+00> : vector<2x2xf32>
    %257 = tpu.matmul %255, %256, %cst_116 {dimension_numbers = #tpu.dot_dimension_numbers<[1], [0], [0], [1], [0, 0, 1, 1], [], []>} : vector<2x32xf32>, vector<32x2xf32>, vector<2x2xf32> -> vector<2x2xf32>
    %c0_117 = arith.constant 0 : index
    %c0_118 = arith.constant 0 : index
    %258 = vector.load %arg14[%c0_117, %c0_118] : memref<1x2xf32, #tpu.memory_space<vmem>>, vector<1x2xf32>
    %259 = vector.broadcast %258 : vector<1x2xf32> to vector<2x2xf32>
    %260 = arith.addf %257, %259 : vector<2x2xf32>
    %c0_119 = arith.constant 0 : index
    %c0_120 = arith.constant 0 : index
    %261 = vector.load %arg15[%c0_119, %c0_120] : memref<2x2xf32, #tpu.memory_space<vmem>>, vector<2x2xf32>
    tpu.vector_store %arg15[%c0_119, %c0_120], %260 {strides = array<i32>} : memref<2x2xf32, #tpu.memory_space<vmem>>, vector<2x2xf32>,
    return
  }
}

</mosaic_0001>

<bundles_post_ra>
// kernel: tpu_custom_call.1
= control target key start
LH: loop header
LB: loop body
LE: loop exit
PB: predicated region body
PF: predicated region fallthrough
CT: control target
= control target key end

     0   :  { %v105_v2 = vlaneseq  ;;  %v15349_v5 = vmov 1983009808   ;;  %s18509_s0 = inlined_call_operand.vmem [shape: f32[8,2,32], index: 0, kind: input, shape index: {}]   ;;  %s18510_s1 = inlined_call_operand.vmem [shape: f32[2,32,96], index: 1, kind: input, shape index: {}]   ;;  %s18511_s2 = inlined_call_operand.vmem [shape: f32[2,1,96], index: 2, kind: input, shape index: {}]   ;;  %s18512_s3 = inlined_call_operand.vmem [shape: f32[2,32,32], index: 3, kind: input, shape index: {}]   ;;  %s18513_s4 = inlined_call_operand.vmem [shape: f32[2,1,32], index: 4, kind: input, shape index: {}]   ;;  %s18514_s5 = inlined_call_operand.vmem [shape: f32[2,32,64], index: 5, kind: input, shape index: {}]   ;;  %s18515_s6 = inlined_call_operand.vmem [shape: f32[2,1,64], index: 6, kind: input, shape index: {}]   ;;  %s18516_s7 = inlined_call_operand.vmem [shape: f32[2,64,32], index: 7, kind: input, shape index: {}]   ;;  %s18517_s8 = inlined_call_operand.vmem [shape: f32[2,1,32], index: 8, kind: input, shape index: {}]   ;;  %s18518_s9 = inlined_call_operand.vmem [shape: f32[2,1,32], index: 9, kind: input, shape index: {}]   ;;  %s18519_s10 = inlined_call_operand.vmem [shape: f32[2,1,32], index: 10, kind: input, shape index: {}]   ;;  %s18520_s11 = inlined_call_operand.vmem [shape: f32[2,1,32], index: 11, kind: input, shape index: {}]   ;;  %s18521_s12 = inlined_call_operand.vmem [shape: f32[2,1,32], index: 12, kind: input, shape index: {}]   ;;  %s18522_s13 = inlined_call_operand.vmem [shape: f32[32,2], index: 13, kind: input, shape index: {}]   ;;  %s18523_s14 = inlined_call_operand.vmem [shape: f32[1,2], index: 14, kind: input, shape index: {}]   ;;  %s18524_s15 = inlined_call_operand.hbm [shape: f32[2,2], index: 15, kind: output, shape index: {}]  }
   0x1   :  { %v62_v0 = vld [vmem:[%s18510_s1 + $0x18] sm:$0xff]  ;;  %v61_v1 = vld [vmem:[%s18510_s1 + $0x10] sm:$0xff]  ;;  %v51_v3 = vld [vmem:[%s18509_s0] sm:$0x3]  ;;  %v103_v6 = vunpack.c.l.s4 %v15349_v5 }
   0x2   :  { %14232 = vmatprep.subr.mxu0 %v62_v0  ;;  %v52_v4 = vld [vmem:[%s18509_s0 + $0x2] sm:$0x3]  ;;  %v60_v7 = vld [vmem:[%s18510_s1 + $0x8] sm:$0xff]  ;;  %v53_v8 = vld [vmem:[%s18509_s0 + $0x4] sm:$0x3]  ;;  %v106_v10 = vshrl.u32 %v105_v2, 7 }
   0x3   :  { %14233 = vmatpush3.msra.mxu0 %v62_v0  ;;  %v54_v9 = vld [vmem:[%s18509_s0 + $0x6] sm:$0x3]  ;;  %v100_v11 = vcombine.low %v51_v3, %v52_v4  ;;  %v104_v13 = vunpack.c.0.s8 %v103_v6  ;;  %v55_v14 = vld [vmem:[%s18509_s0 + $0x8] sm:$0x3]  ;;  %v56_v15 = vld [vmem:[%s18509_s0 + $0xa] sm:$0x3] }
   0x4   :  { %14234 = vmatprep.subr.mxu0 %v61_v1  ;;  %v101_v12 = vcombine.low %v53_v8, %v54_v9  ;;  %v57_v16 = vld [vmem:[%s18509_s0 + $0xc] sm:$0x3]  ;;  %v59_v17 = vld [vmem:[%s18510_s1] sm:$0xff]  ;;  %v58_v18 = vld [vmem:[%s18509_s0 + $0xe] sm:$0x3]  ;;  %v117_v19 = vcombine.low %v55_v14, %v56_v15 }
   0x5   :  { %14235 = vmatpush3.msra.mxu0 %v61_v1 }
   0x6   :  { %20 = vsyncpa [#allocation3], 0  ;;  %14236 = vmatprep.subr.mxu0 %v60_v7  ;;  %v15477_v20 = vsub.s32 %v104_v13, %v106_v10  ;;  %v118_v21 = vcombine.low %v57_v16, %v58_v18  ;;  %vm144_vm0 = vcmask 261120   ;;  %v13597_v28 = vld [vmem:[%s18511_s2] ss:$0 sm:$0xff]  ;;  %s15350_s29 = smov 120  }
   0x7   :  { %14237 = vmatpush3.msra.mxu0 %v60_v7  ;;  %v134_v29 = vcombine.low %v13597_v28, %v13597_v28  ;;  %s15351_s30 = smov 112   ;;  %v18528_v46 = vmov 0.0   ;;  %vm15353_vm1 = vmmov 0   ;;  %s15354_s16 = smov 104   ;;  %vm317_vm2 = vcmask 64512  }
   0x8   :  { %18545 = vst [vmem:[#allocation5_spill] sm:$0xff] %v15477_v20  ;;  %14238 = vmatprep.subr.mxu0 %v59_v17  ;;  %v108_v22 = vrot.slane %v100_v11, %v15477_v20  ;;  %v115_v23 = vrot.slane %v101_v12, %v15477_v20  ;;  %v125_v24 = vrot.slane %v117_v19, %v15477_v20  ;;  %s15355_s17 = smov 96   ;;  %s15356_s18 = smov 64   ;;  %vm3356_vm3 = vcmask 1041408  }
   0x9   :  { %v132_v25 = vrot.slane %v118_v21, %v15477_v20  ;;  %14239 = vmatpush3.msra.mxu0 %v59_v17  ;;  %v141_v30 = vrot.slane %v134_v29, %v15477_v20  ;;  %14243 = vmatprep.subr.mxu1 %v18528_v46  ;;  %vm2997_vm4 = vcmask 9216   ;;  %vm3352_vm5 = vcmask 15360   ;;  %s15357_s19 = smov 8   ;;  %s15358_s20 = smov 16  }
   0xa   :  { %v116_v26 = vcombine.low %v108_v22, %v115_v23  ;;  %14263 = vmatprep.subr.mxu0 %v18528_v46  ;;  %14245 = vmatprep.mubr.msk.f32.mxu1 %vm15353_vm1, %v18528_v46  ;;  %s15359_s21 = smov 24   ;;  %vm5920_vm6 = vcmask 130048   ;;  %vm5929_vm7 = vcmask 195584   ;;  %vm6126_vm8 = vcmask 254976  }
   0xb   :  { %v133_v27 = vcombine.low %v125_v24, %v132_v25  ;;  %v142_v31 = vcombine.low %v141_v30, %v141_v30  ;;  %vm6505_vm9 = vcmask 523264  }
   0xc   :  { %14240 = vmatprep.mubr.msk.f32.mxu0 %vm144_vm0, %v116_v26 }
   0xd   :  { %14241 = vmatmul.mubr.msk.f32.vlgmr.msra.gmra.mxu0 %vm144_vm0, %v133_v27 }
   0xe   :  { %14265 = vmatprep.mubr.msk.f32.mxu0 %vm15353_vm1, %v18528_v46 }
  0xcd   :  { %v14242_v32 = vpop.f32.mrf.mxu0 }
  0xce   :  { %v221_v33 = vadd.f32 %v14242_v32, %v142_v31 }
  0xcf   :  { %v215_v34 = vpop.f32.mrf.mxu0 }
  0xd0   :  { %v15490_v35 = vrot.slane %v221_v33, %v15477_v20  ;;  %v216_v36 = vadd.f32 %v215_v34, %v142_v31  ;;  %v243_v40 = vcombine.high %v221_v33, %v221_v33 }
  0xd2   :  { %v226_v37 = vcombine.high %v216_v36, %v216_v36  ;;  %268 = vrot.lane.b32.xlu0 %v15490_v35, %s15350_s29  ;;  %v15496_v38 = vcombine.high %v15490_v35, %v15490_v35  ;;  %v15499_v39 = vrot.slane %v216_v36, %v15477_v20  ;;  %v15515_v43 = vrot.slane %v243_v40, %v15477_v20 }
  0xd3   :  { %v15597_v51 = vrot.slane %v15490_v35, %v15477_v20 }
  0xd4   :  { %270 = vrot.lane.b32.xlu1 %v15496_v38, %s15350_s29  ;;  %v15504_v41 = vrot.slane %v226_v37, %v15477_v20  ;;  %v15512_v42 = vcombine.high %v15499_v39, %v15499_v39  ;;  %v15529_v45 = vcombine.high %v15515_v43, %v15515_v43  ;;  %v15565_v47 = vrot.slane %v15499_v39, %v15477_v20 }
  0xd5   :  { %v15603_v52 = vrot.slane %v15496_v38, %v15477_v20  ;;  %v15609_v53 = vrot.slane %v15515_v43, %v15477_v20 }
  0xd6   :  { %260 = vrot.lane.b32.xlu0 %v15499_v39, %s15350_s29  ;;  %v15521_v44 = vcombine.high %v15504_v41, %v15504_v41  ;;  %v15575_v48 = vrot.slane %v15512_v42, %v15477_v20  ;;  %v15585_v49 = vrot.slane %v15504_v41, %v15477_v20  ;;  %v15615_v54 = vrot.slane %v15529_v45, %v15477_v20 }
  0xd8   :  { %264 = vrot.lane.b32.xlu1 %v15504_v41, %s15350_s29  ;;  %v15591_v50 = vrot.slane %v15521_v44, %v15477_v20 }
  0xda   :  { %262 = vrot.lane.b32.xlu0 %v15512_v42, %s15350_s29 }
  0xdc   :  { %266 = vrot.lane.b32.xlu1 %v15521_v44, %s15350_s29 }
  0xde   :  { %272 = vrot.lane.b32.xlu0 %v15515_v43, %s15350_s29 }
  0xe0   :  { %274 = vrot.lane.b32.xlu1 %v15529_v45, %s15350_s29 }
  0xe2   :  { %276 = vrot.lane.b32.xlu0 %v15499_v39, %s15351_s30 }
  0xe4   :  { %278 = vrot.lane.b32.xlu1 %v15512_v42, %s15351_s30 }
  0xe6   :  { %280 = vrot.lane.b32.xlu0 %v15504_v41, %s15351_s30 }
  0xe8   :  { %286 = vrot.lane.b32.xlu1 %v15496_v38, %s15351_s30 }
  0xea   :  { %284 = vrot.lane.b32.xlu0 %v15490_v35, %s15351_s30 }
  0xec   :  { %282 = vrot.lane.b32.xlu1 %v15521_v44, %s15351_s30 }
  0xee   :  { %288 = vrot.lane.b32.xlu0 %v15515_v43, %s15351_s30 }
  0xf0   :  { %290 = vrot.lane.b32.xlu1 %v15529_v45, %s15351_s30 }
  0xf2   :  { %292 = vrot.lane.b32.xlu0 %v15499_v39, %s15354_s16 }
  0xf4   :  { %294 = vrot.lane.b32.xlu1 %v15512_v42, %s15354_s16 }
  0xf6   :  { %296 = vrot.lane.b32.xlu0 %v15504_v41, %s15354_s16 }
  0xf8   :  { %300 = vrot.lane.b32.xlu1 %v15490_v35, %s15354_s16 }
  0xfa   :  { %315 = vrot.lane.b32.xlu0 %v15565_v47, %s15355_s17 }
  0xfc   :  { %298 = vrot.lane.b32.xlu1 %v15521_v44, %s15354_s16 }
  0xfe   :  { %302 = vrot.lane.b32.xlu0 %v15496_v38, %s15354_s16 }
 0x100   :  { %399 = vrot.lane.b32.xlu1 %v15575_v48, %s15355_s17 }
 0x102   :  { %304 = vrot.lane.b32.xlu0 %v15515_v43, %s15354_s16 }
 0x104   :  { %306 = vrot.lane.b32.xlu1 %v15529_v45, %s15354_s16 }
 0x106   :  { %482 = vrot.lane.b32.xlu0 %v15585_v49, %s15355_s17 }
 0x108   :  { %565 = vrot.lane.b32.xlu1 %v15591_v50, %s15355_s17 }
 0x10a   :  { %648 = vrot.lane.b32.xlu0 %v15597_v51, %s15355_s17 }
 0x10c   :  { %731 = vrot.lane.b32.xlu1 %v15603_v52, %s15355_s17 }
 0x10e   :  { %814 = vrot.lane.b32.xlu0 %v15609_v53, %s15355_s17 }
 0x110   :  { %897 = vrot.lane.b32.xlu1 %v15615_v54, %s15355_s17 }
 0x144   :  { %v15619_v55 = vpop.permute.xlu0 %268 }
 0x145   :  { %v15653_v1 = vrot.slane %v15619_v55, %v15477_v20 }
 0x146   :  { %v15621_v56 = vpop.permute.xlu1 %270 }
 0x147   :  { %v15669_v5 = vrot.slane %v15621_v56, %v15477_v20 }
 0x148   :  { %v15623_v57 = vpop.permute.xlu0 %260 }
 0x149   :  { %v15627_v58 = vrot.slane %v15623_v57, %v15477_v20 }
 0x14a   :  { %v15629_v59 = vpop.permute.xlu1 %264 }
 0x14b   :  { %980 = vrot.lane.b32.xlu0 %v15627_v58, %s15355_s17  ;;  %v15637_v61 = vrot.slane %v15629_v59, %v15477_v20 }
 0x14c   :  { %v15633_v60 = vpop.permute.xlu0 %262 }
 0x14d   :  { %v15641_v62 = vrot.slane %v15633_v60, %v15477_v20 }
 0x14e   :  { %v15643_v63 = vpop.permute.xlu1 %266 }
 0x14f   :  { %1146 = vrot.lane.b32.xlu0 %v15637_v61, %s15355_s17  ;;  %1063 = vrot.lane.b32.xlu1 %v15641_v62, %s15355_s17  ;;  %v15657_v2 = vrot.slane %v15643_v63, %v15477_v20 }
 0x150   :  { %v15649_v0 = vpop.permute.xlu0 %272 }
 0x151   :  { %v15673_v6 = vrot.slane %v15649_v0, %v15477_v20 }
 0x152   :  { %v15659_v3 = vpop.permute.xlu1 %274 }
 0x153   :  { %1312 = vrot.lane.b32.xlu0 %v15653_v1, %s15355_s17  ;;  %1229 = vrot.lane.b32.xlu1 %v15657_v2, %s15355_s17  ;;  %v15685_v9 = vrot.slane %v15659_v3, %v15477_v20 }
 0x154   :  { %v15665_v4 = vpop.permute.xlu0 %276 }
 0x155   :  { %v15689_v10 = vrot.slane %v15665_v4, %v15477_v20 }
 0x156   :  { %v15675_v7 = vpop.permute.xlu1 %278 }
 0x157   :  { %1478 = vrot.lane.b32.xlu0 %v15673_v6, %s15355_s17  ;;  %1395 = vrot.lane.b32.xlu1 %v15669_v5, %s15355_s17  ;;  %v15701_v13 = vrot.slane %v15675_v7, %v15477_v20 }
 0x158   :  { %v15681_v8 = vpop.permute.xlu0 %280 }
 0x159   :  { %v15705_v14 = vrot.slane %v15681_v8, %v15477_v20 }
 0x15a   :  { %v15691_v11 = vpop.permute.xlu1 %286 }
 0x15b   :  { %1644 = vrot.lane.b32.xlu0 %v15689_v10, %s15355_s17  ;;  %1561 = vrot.lane.b32.xlu1 %v15685_v9, %s15355_s17  ;;  %v15733_v22 = vrot.slane %v15691_v11, %v15477_v20 }
 0x15c   :  { %v15697_v12 = vpop.permute.xlu0 %284 }
 0x15d   :  { %v15717_v17 = vrot.slane %v15697_v12, %v15477_v20 }
 0x15e   :  { %v15707_v15 = vpop.permute.xlu1 %282 }
 0x15f   :  { %1810 = vrot.lane.b32.xlu0 %v15705_v14, %s15355_s17  ;;  %1727 = vrot.lane.b32.xlu1 %v15701_v13, %s15355_s17  ;;  %v15721_v18 = vrot.slane %v15707_v15, %v15477_v20 }
 0x160   :  { %v15713_v16 = vpop.permute.xlu0 %288 }
 0x161   :  { %v15737_v23 = vrot.slane %v15713_v16, %v15477_v20 }
 0x162   :  { %v15723_v19 = vpop.permute.xlu1 %290 }
 0x163   :  { %1976 = vrot.lane.b32.xlu0 %v15717_v17, %s15355_s17  ;;  %1893 = vrot.lane.b32.xlu1 %v15721_v18, %s15355_s17  ;;  %v15749_v26 = vrot.slane %v15723_v19, %v15477_v20 }
 0x164   :  { %v15729_v21 = vpop.permute.xlu0 %292 }
 0x165   :  { %v15753_v27 = vrot.slane %v15729_v21, %v15477_v20 }
 0x166   :  { %v15739_v24 = vpop.permute.xlu1 %294 }
 0x167   :  { %2142 = vrot.lane.b32.xlu0 %v15737_v23, %s15355_s17  ;;  %2059 = vrot.lane.b32.xlu1 %v15733_v22, %s15355_s17  ;;  %v15763_v30 = vrot.slane %v15739_v24, %v15477_v20 }
 0x168   :  { %v15745_v25 = vpop.permute.xlu0 %296 }
 0x169   :  { %v15767_v31 = vrot.slane %v15745_v25, %v15477_v20 }
 0x16a   :  { %v15755_v28 = vpop.permute.xlu1 %300 }
 0x16b   :  { %2308 = vrot.lane.b32.xlu0 %v15753_v27, %s15355_s17  ;;  %2225 = vrot.lane.b32.xlu1 %v15749_v26, %s15355_s17  ;;  %v15783_v34 = vrot.slane %v15755_v28, %v15477_v20 }
 0x16c   :  { %v316_v29 = vpop.permute.xlu0 %315 }
 0x16d   :  { %14244 = vmatpush3.xpose.msk.msra.mxu1 %vm317_vm2, %v316_v29  ;;  %18547 = vst [vmem:[#allocation7_spill] sm:$0xff] %v15783_v34 }
 0x16e   :  { %v15770_v32 = vpop.permute.xlu1 %298  ;;  %14248 = vmatprep.subr.mxu1 %v18528_v46 }
 0x16f   :  { %2474 = vrot.lane.b32.xlu0 %v15767_v31, %s15355_s17  ;;  %2391 = vrot.lane.b32.xlu1 %v15763_v30, %s15355_s17  ;;  %v15789_v36 = vrot.slane %v15770_v32, %v15477_v20 }
 0x170   :  { %14246 = vmatmul.mubr.msk.f32.vlgmr.msra.gmra.mxu1 %vm317_vm2, %v15499_v39  ;;  %v15779_v33 = vpop.permute.xlu0 %302 }
 0x171   :  { %18546 = vst [vmem:[#allocation6_spill] sm:$0xff] %v15779_v33  ;;  %14250 = vmatprep.mubr.msk.f32.mxu1 %vm15353_vm1, %v18528_v46  ;;  %v15805_v29 = vrot.slane %v15779_v33, %v15477_v20 }
 0x172   :  { %v400_v37 = vpop.permute.xlu1 %399 }
 0x173   :  { %2640 = vrot.lane.b32.xlu0 %v15783_v34, %s15355_s17  ;;  %14249 = vmatpush3.xpose.msk.msra.mxu1 %vm317_vm2, %v400_v37 }
 0x174   :  { %2557 = vrot.lane.b32.xlu1 %v15789_v36, %s15355_s17  ;;  %v15796_v39 = vpop.permute.xlu0 %304  ;;  %14253 = vmatprep.subr.mxu1 %v18528_v46 }
 0x175   :  { %18548 = vst [vmem:[#allocation8_spill] sm:$0xff] %v15796_v39  ;;  %v15801_v40 = vrot.slane %v15796_v39, %v15477_v20 }
 0x176   :  { %14251 = vmatmul.mubr.msk.f32.vlgmr.msra.gmra.mxu1 %vm317_vm2, %v15512_v42  ;;  %v15809_v34 = vpop.permute.xlu1 %306 }
 0x177   :  { %2806 = vrot.lane.b32.xlu0 %v15801_v40, %s15355_s17  ;;  %14255 = vmatprep.mubr.msk.f32.mxu1 %vm15353_vm1, %v18528_v46  ;;  %v15820_v33 = vrot.slane %v15809_v34, %v15477_v20 }
 0x178   :  { %2723 = vrot.lane.b32.xlu1 %v15805_v29, %s15355_s17  ;;  %v483_v37 = vpop.permute.xlu0 %482 }
 0x179   :  { %14254 = vmatpush3.xpose.msk.msra.mxu1 %vm317_vm2, %v483_v37 }
 0x17a   :  { %v566_v39 = vpop.permute.xlu1 %565  ;;  %14258 = vmatprep.subr.mxu1 %v18528_v46 }
 0x17b   :  { %3429 = vrot.lane.b32.xlu0 %v15575_v48, %s15356_s18 }
 0x17c   :  { %2889 = vrot.lane.b32.xlu1 %v15820_v33, %s15355_s17  ;;  %v649_v42 = vpop.permute.xlu0 %648  ;;  %14256 = vmatmul.mubr.msk.f32.vlgmr.msra.gmra.mxu1 %vm317_vm2, %v15504_v41 }
 0x17d   :  { %14259 = vmatpush3.xpose.msk.msra.mxu1 %vm317_vm2, %v566_v39  ;;  %14264 = vmatpush3.xpose.msk.msra.mxu0 %vm317_vm2, %v649_v42 }
 0x17e   :  { %14260 = vmatprep.mubr.msk.f32.mxu1 %vm15353_vm1, %v18528_v46  ;;  %14273 = vmatprep.subr.mxu0 %v18528_v46  ;;  %v732_v37 = vpop.permute.xlu1 %731 }
 0x17f   :  { %3583 = vrot.lane.b32.xlu0 %v15591_v50, %s15356_s18  ;;  %14268 = vmatprep.subr.mxu1 %v18528_v46 }
 0x180   :  { %3350 = vrot.lane.b32.xlu1 %v15565_v47, %s15356_s18  ;;  %14266 = vmatmul.mubr.msk.f32.vlgmr.msra.gmra.mxu0 %vm317_vm2, %v15490_v35  ;;  %v815_v41 = vpop.permute.xlu0 %814 }
 0x181   :  { %14261 = vmatmul.mubr.msk.f32.vlgmr.msra.gmra.mxu1 %vm317_vm2, %v15521_v44  ;;  %14274 = vmatpush3.xpose.msk.msra.mxu0 %vm317_vm2, %v815_v41 }
 0x182   :  { %14269 = vmatpush3.xpose.msk.msra.mxu1 %vm317_vm2, %v732_v37  ;;  %14275 = vmatprep.mubr.msk.f32.mxu0 %vm15353_vm1, %v18528_v46  ;;  %v898_v35 = vpop.permute.xlu1 %897 }
 0x183   :  { %3737 = vrot.lane.b32.xlu0 %v15603_v52, %s15356_s18  ;;  %14270 = vmatprep.mubr.msk.f32.mxu1 %vm15353_vm1, %v18528_v46 }
 0x184   :  { %3506 = vrot.lane.b32.xlu1 %v15585_v49, %s15356_s18  ;;  %14276 = vmatmul.mubr.msk.f32.vlgmr.msra.gmra.mxu0 %vm317_vm2, %v15515_v43 }
 0x185   :  { %14271 = vmatmul.mubr.msk.f32.vlgmr.msra.gmra.mxu1 %vm317_vm2, %v15496_v38  ;;  %14278 = vmatprep.subr.mxu1 %v18528_v46 }
 0x186   :  { %14279 = vmatpush3.xpose.msk.msra.mxu1 %vm317_vm2, %v898_v35  ;;  %14280 = vmatprep.mubr.msk.f32.mxu1 %vm15353_vm1, %v18528_v46 }
 0x187   :  { %3891 = vrot.lane.b32.xlu0 %v15615_v54, %s15356_s18  ;;  %14283 = vmatprep.subr.mxu0 %v18528_v46 }
 0x188   :  { %3660 = vrot.lane.b32.xlu1 %v15597_v51, %s15356_s18  ;;  %14285 = vmatprep.mubr.msk.f32.mxu0 %vm15353_vm1, %v18528_v46 }
 0x189   :  { %14281 = vmatmul.mubr.msk.f32.vlgmr.msra.gmra.mxu1 %vm317_vm2, %v15529_v45  ;;  %14288 = vmatprep.subr.mxu1 %v18528_v46 }
 0x18a   :  { %14290 = vmatprep.mubr.msk.f32.mxu1 %vm15353_vm1, %v18528_v46 }
 0x18b   :  { %4045 = vrot.lane.b32.xlu0 %v15641_v62, %s15356_s18 }
 0x18c   :  { %3814 = vrot.lane.b32.xlu1 %v15609_v53, %s15356_s18 }
 0x18f   :  { %4353 = vrot.lane.b32.xlu0 %v15669_v5, %s15356_s18 }
 0x190   :  { %3968 = vrot.lane.b32.xlu1 %v15627_v58, %s15356_s18 }
 0x193   :  { %4507 = vrot.lane.b32.xlu0 %v15685_v9, %s15356_s18 }
 0x194   :  { %4122 = vrot.lane.b32.xlu1 %v15637_v61, %s15356_s18 }
 0x197   :  { %4661 = vrot.lane.b32.xlu0 %v15701_v13, %s15356_s18 }
 0x198   :  { %4276 = vrot.lane.b32.xlu1 %v15653_v1, %s15356_s18 }
 0x19b   :  { %5046 = vrot.lane.b32.xlu0 %v15737_v23, %s15356_s18 }
 0x19c   :  { %4430 = vrot.lane.b32.xlu1 %v15673_v6, %s15356_s18 }
 0x19f   :  { %4199 = vrot.lane.b32.xlu0 %v15657_v2, %s15356_s18  ;;  %v18549_v2 = vld [vmem:[#allocation8_spill] sm:$0xff] }
 0x1a0   :  { %4584 = vrot.lane.b32.xlu1 %v15689_v10, %s15356_s18 }
 0x1a3   :  { %4815 = vrot.lane.b32.xlu0 %v15721_v18, %s15356_s18 }
 0x1a4   :  { %4738 = vrot.lane.b32.xlu1 %v15705_v14, %s15356_s18 }
 0x1a7   :  { %5200 = vrot.lane.b32.xlu0 %v15753_v27, %s15356_s18 }
 0x1a8   :  { %4892 = vrot.lane.b32.xlu1 %v15717_v17, %s15356_s18 }
 0x1ab   :  { %5354 = vrot.lane.b32.xlu0 %v15767_v31, %s15356_s18 }
 0x1ac   :  { %4969 = vrot.lane.b32.xlu1 %v15733_v22, %s15356_s18 }
 0x1b0   :  { %5123 = vrot.lane.b32.xlu1 %v15749_v26, %s15356_s18 }
 0x1b4   :  { %5277 = vrot.lane.b32.xlu1 %v15763_v30, %s15356_s18 }
 0x1b8   :  { %5431 = vrot.lane.b32.xlu1 %v15789_v36, %s15356_s18 }
 0x1bd   :  { %v981_v38 = vpop.permute.xlu0 %980 }
 0x1be   :  { %14284 = vmatpush3.xpose.msk.msra.mxu0 %vm317_vm2, %v981_v38 }
 0x1bf   :  { %14293 = vmatprep.subr.mxu0 %v18528_v46 }
 0x1c1   :  { %14286 = vmatmul.mubr.msk.f32.vlgmr.msra.gmra.mxu0 %vm317_vm2, %v15623_v57  ;;  %v1147_v43 = vpop.permute.xlu0 %1146  ;;  %v1064_v44 = vpop.permute.xlu1 %1063 }
 0x1c2   :  { %14289 = vmatpush3.xpose.msk.msra.mxu1 %vm317_vm2, %v1064_v44  ;;  %14294 = vmatpush3.xpose.msk.msra.mxu0 %vm317_vm2, %v1147_v43 }
 0x1c3   :  { %14295 = vmatprep.mubr.msk.f32.mxu0 %vm15353_vm1, %v18528_v46  ;;  %14303 = vmatprep.subr.mxu0 %v18528_v46 }
 0x1c4   :  { %14298 = vmatprep.subr.mxu1 %v18528_v46 }
 0x1c5   :  { %14296 = vmatmul.mubr.msk.f32.vlgmr.msra.gmra.mxu0 %vm317_vm2, %v15629_v59  ;;  %v1313_v45 = vpop.permute.xlu0 %1312  ;;  %14291 = vmatmul.mubr.msk.f32.vlgmr.msra.gmra.mxu1 %vm317_vm2, %v15633_v60  ;;  %v1230_v47 = vpop.permute.xlu1 %1229 }
 0x1c6   :  { %14299 = vmatpush3.xpose.msk.msra.mxu1 %vm317_vm2, %v1230_v47  ;;  %14304 = vmatpush3.xpose.msk.msra.mxu0 %vm317_vm2, %v1313_v45 }
 0x1c7   :  { %14300 = vmatprep.mubr.msk.f32.mxu1 %vm15353_vm1, %v18528_v46  ;;  %14305 = vmatprep.mubr.msk.f32.mxu0 %vm15353_vm1, %v18528_v46 }
 0x1c8   :  { %14313 = vmatprep.subr.mxu0 %v18528_v46  ;;  %14308 = vmatprep.subr.mxu1 %v18528_v46 }
 0x1c9   :  { %14306 = vmatmul.mubr.msk.f32.vlgmr.msra.gmra.mxu0 %vm317_vm2, %v15619_v55  ;;  %v1479_v48 = vpop.permute.xlu0 %1478  ;;  %14301 = vmatmul.mubr.msk.f32.vlgmr.msra.gmra.mxu1 %vm317_vm2, %v15643_v63  ;;  %v1396_v49 = vpop.permute.xlu1 %1395 }
 0x1ca   :  { %14309 = vmatpush3.xpose.msk.msra.mxu1 %vm317_vm2, %v1396_v49  ;;  %14314 = vmatpush3.xpose.msk.msra.mxu0 %vm317_vm2, %v1479_v48 }
 0x1cb   :  { %14310 = vmatprep.mubr.msk.f32.mxu1 %vm15353_vm1, %v18528_v46  ;;  %14315 = vmatprep.mubr.msk.f32.mxu0 %vm15353_vm1, %v18528_v46 }
 0x1cc   :  { %14323 = vmatprep.subr.mxu0 %v18528_v46  ;;  %14318 = vmatprep.subr.mxu1 %v18528_v46 }
 0x1cd   :  { %14316 = vmatmul.mubr.msk.f32.vlgmr.msra.gmra.mxu0 %vm317_vm2, %v15649_v0  ;;  %v1645_v50 = vpop.permute.xlu0 %1644  ;;  %14311 = vmatmul.mubr.msk.f32.vlgmr.msra.gmra.mxu1 %vm317_vm2, %v15621_v56  ;;  %v1562_v51 = vpop.permute.xlu1 %1561 }
 0x1ce   :  { %14319 = vmatpush3.xpose.msk.msra.mxu1 %vm317_vm2, %v1562_v51  ;;  %14324 = vmatpush3.xpose.msk.msra.mxu0 %vm317_vm2, %v1645_v50 }
 0x1cf   :  { %14320 = vmatprep.mubr.msk.f32.mxu1 %vm15353_vm1, %v18528_v46  ;;  %14325 = vmatprep.mubr.msk.f32.mxu0 %vm15353_vm1, %v18528_v46 }
 0x1d0   :  { %14333 = vmatprep.subr.mxu0 %v18528_v46  ;;  %14328 = vmatprep.subr.mxu1 %v18528_v46 }
 0x1d1   :  { %14326 = vmatmul.mubr.msk.f32.vlgmr.msra.gmra.mxu0 %vm317_vm2, %v15665_v4  ;;  %v1811_v52 = vpop.permute.xlu0 %1810  ;;  %14321 = vmatmul.mubr.msk.f32.vlgmr.msra.gmra.mxu1 %vm317_vm2, %v15659_v3  ;;  %v1728_v53 = vpop.permute.xlu1 %1727  ;;  %v18550_v3 = vld [vmem:[#allocation6_spill] sm:$0xff] }
 0x1d2   :  { %14329 = vmatpush3.xpose.msk.msra.mxu1 %vm317_vm2, %v1728_v53  ;;  %14334 = vmatpush3.xpose.msk.msra.mxu0 %vm317_vm2, %v1811_v52 }
 0x1d3   :  { %14330 = vmatprep.mubr.msk.f32.mxu1 %vm15353_vm1, %v18528_v46  ;;  %14335 = vmatprep.mubr.msk.f32.mxu0 %vm15353_vm1, %v18528_v46 }
 0x1d4   :  { %14343 = vmatprep.subr.mxu0 %v18528_v46  ;;  %14338 = vmatprep.subr.mxu1 %v18528_v46 }
 0x1d5   :  { %14336 = vmatmul.mubr.msk.f32.vlgmr.msra.gmra.mxu0 %vm317_vm2, %v15681_v8  ;;  %v1977_v54 = vpop.permute.xlu0 %1976  ;;  %14331 = vmatmul.mubr.msk.f32.vlgmr.msra.gmra.mxu1 %vm317_vm2, %v15675_v7  ;;  %v1894_v55 = vpop.permute.xlu1 %1893 }
 0x1d6   :  { %14339 = vmatpush3.xpose.msk.msra.mxu1 %vm317_vm2, %v1894_v55  ;;  %14344 = vmatpush3.xpose.msk.msra.mxu0 %vm317_vm2, %v1977_v54 }
 0x1d7   :  { %14340 = vmatprep.mubr.msk.f32.mxu1 %vm15353_vm1, %v18528_v46  ;;  %14345 = vmatprep.mubr.msk.f32.mxu0 %vm15353_vm1, %v18528_v46 }
 0x1d8   :  { %14353 = vmatprep.subr.mxu0 %v18528_v46  ;;  %14348 = vmatprep.subr.mxu1 %v18528_v46 }
 0x1d9   :  { %14346 = vmatmul.mubr.msk.f32.vlgmr.msra.gmra.mxu0 %vm317_vm2, %v15697_v12  ;;  %v2143_v56 = vpop.permute.xlu0 %2142  ;;  %14341 = vmatmul.mubr.msk.f32.vlgmr.msra.gmra.mxu1 %vm317_vm2, %v15707_v15  ;;  %v2060_v57 = vpop.permute.xlu1 %2059 }
 0x1da   :  { %14349 = vmatpush3.xpose.msk.msra.mxu1 %vm317_vm2, %v2060_v57  ;;  %14354 = vmatpush3.xpose.msk.msra.mxu0 %vm317_vm2, %v2143_v56 }
 0x1db   :  { %14350 = vmatprep.mubr.msk.f32.mxu1 %vm15353_vm1, %v18528_v46  ;;  %14355 = vmatprep.mubr.msk.f32.mxu0 %vm15353_vm1, %v18528_v46 }
 0x1dc   :  { %14363 = vmatprep.subr.mxu0 %v18528_v46  ;;  %14358 = vmatprep.subr.mxu1 %v18528_v46 }
 0x1dd   :  { %14356 = vmatmul.mubr.msk.f32.vlgmr.msra.gmra.mxu0 %vm317_vm2, %v15713_v16  ;;  %v2309_v58 = vpop.permute.xlu0 %2308  ;;  %14351 = vmatmul.mubr.msk.f32.vlgmr.msra.gmra.mxu1 %vm317_vm2, %v15691_v11  ;;  %v2226_v59 = vpop.permute.xlu1 %2225 }
 0x1de   :  { %14359 = vmatpush3.xpose.msk.msra.mxu1 %vm317_vm2, %v2226_v59  ;;  %14364 = vmatpush3.xpose.msk.msra.mxu0 %vm317_vm2, %v2309_v58 }
 0x1df   :  { %14360 = vmatprep.mubr.msk.f32.mxu1 %vm15353_vm1, %v18528_v46  ;;  %14365 = vmatprep.mubr.msk.f32.mxu0 %vm15353_vm1, %v18528_v46 }
 0x1e0   :  { %14373 = vmatprep.subr.mxu0 %v18528_v46  ;;  %14368 = vmatprep.subr.mxu1 %v18528_v46 }
 0x1e1   :  { %14366 = vmatmul.mubr.msk.f32.vlgmr.msra.gmra.mxu0 %vm317_vm2, %v15729_v21  ;;  %v2475_v60 = vpop.permute.xlu0 %2474  ;;  %14361 = vmatmul.mubr.msk.f32.vlgmr.msra.gmra.mxu1 %vm317_vm2, %v15723_v19  ;;  %v2392_v61 = vpop.permute.xlu1 %2391 }
 0x1e2   :  { %14369 = vmatpush3.xpose.msk.msra.mxu1 %vm317_vm2, %v2392_v61  ;;  %14374 = vmatpush3.xpose.msk.msra.mxu0 %vm317_vm2, %v2475_v60 }
 0x1e3   :  { %14370 = vmatprep.mubr.msk.f32.mxu1 %vm15353_vm1, %v18528_v46  ;;  %14375 = vmatprep.mubr.msk.f32.mxu0 %vm15353_vm1, %v18528_v46 }
 0x1e4   :  { %14383 = vmatprep.subr.mxu0 %v18528_v46  ;;  %14378 = vmatprep.subr.mxu1 %v18528_v46 }
 0x1e5   :  { %14376 = vmatmul.mubr.msk.f32.vlgmr.msra.gmra.mxu0 %vm317_vm2, %v15745_v25  ;;  %v2641_v62 = vpop.permute.xlu0 %2640  ;;  %14371 = vmatmul.mubr.msk.f32.vlgmr.msra.gmra.mxu1 %vm317_vm2, %v15739_v24 }
 0x1e6   :  { %v2558_v63 = vpop.permute.xlu1 %2557  ;;  %14384 = vmatpush3.xpose.msk.msra.mxu0 %vm317_vm2, %v2641_v62  ;;  %14380 = vmatprep.mubr.msk.f32.mxu1 %vm15353_vm1, %v18528_v46 }
 0x1e7   :  { %14379 = vmatpush3.xpose.msk.msra.mxu1 %vm317_vm2, %v2558_v63  ;;  %14385 = vmatprep.mubr.msk.f32.mxu0 %vm15353_vm1, %v18528_v46 }
 0x1e8   :  { %14393 = vmatprep.subr.mxu0 %v18528_v46  ;;  %14388 = vmatprep.subr.mxu1 %v18528_v46 }
 0x1e9   :  { %14386 = vmatmul.mubr.msk.f32.vlgmr.msra.gmra.mxu0 %vm317_vm2, %v15755_v28  ;;  %v2807_v0 = vpop.permute.xlu0 %2806 }
 0x1ea   :  { %14381 = vmatmul.mubr.msk.f32.vlgmr.msra.gmra.mxu1 %vm317_vm2, %v15770_v32  ;;  %v2724_v1 = vpop.permute.xlu1 %2723  ;;  %14394 = vmatpush3.xpose.msk.msra.mxu0 %vm317_vm2, %v2807_v0 }
 0x1eb   :  { %14389 = vmatpush3.xpose.msk.msra.mxu1 %vm317_vm2, %v2724_v1  ;;  %14390 = vmatprep.mubr.msk.f32.mxu1 %vm15353_vm1, %v18528_v46 }
 0x1ec   :  { %14395 = vmatprep.mubr.msk.f32.mxu0 %vm15353_vm1, %v18528_v46  ;;  %14398 = vmatprep.subr.mxu1 %v18528_v46 }
 0x1ed   :  { %14396 = vmatmul.mubr.msk.f32.vlgmr.msra.gmra.mxu0 %vm317_vm2, %v18549_v2  ;;  %14403 = vmatprep.subr.mxu0 %v18528_v46  ;;  %v3430_v5 = vpop.permute.xlu0 %3429 }
 0x1ee   :  { %14391 = vmatmul.mubr.msk.f32.vlgmr.msra.gmra.mxu1 %vm317_vm2, %v18550_v3  ;;  %v2890_v4 = vpop.permute.xlu1 %2889  ;;  %14405 = vmatprep.mubr.msk.f32.mxu0 %vm15353_vm1, %v18528_v46 }
 0x1ef   :  { %14399 = vmatpush3.xpose.msk.msra.mxu1 %vm317_vm2, %v2890_v4  ;;  %14400 = vmatprep.mubr.msk.f32.mxu1 %vm15353_vm1, %v18528_v46 }
 0x1f0   :  { %14408 = vmatprep.subr.mxu1 %v18528_v46 }
 0x1f1   :  { %v16097_v44 = vpop.permute.xlu0 %3583 }
 0x1f2   :  { %14401 = vmatmul.mubr.msk.f32.vlgmr.msra.gmra.mxu1 %vm317_vm2, %v15809_v34  ;;  %v3351_v6 = vpop.permute.xlu1 %3350 }
 0x1f3   :  { %14404 = vmatpush3.msk.msra.mxu0 %vm3356_vm3, %v3351_v6  ;;  %14409 = vmatpush3.msk.msra.mxu1 %vm3356_vm3, %v3430_v5 }
 0x1f4   :  { %14413 = vmatprep.subr.mxu0 %v18528_v46  ;;  %14410 = vmatprep.mubr.msk.f32.mxu1 %vm15353_vm1, %v18528_v46 }
 0x1f5   :  { %14418 = vmatprep.subr.mxu1 %v18528_v46  ;;  %v16103_v50 = vpop.permute.xlu0 %3737 }
 0x1f6   :  { %v16095_v43 = vpop.permute.xlu1 %3506 }
 0x1f9   :  { %v16117_v63 = vpop.permute.xlu0 %3891 }
 0x1fa   :  { %v16099_v45 = vpop.permute.xlu1 %3660 }
 0x1fe   :  { %v16107_v54 = vpop.permute.xlu1 %3814 }
 0x202   :  { %v16123_v4 = vpop.permute.xlu1 %3968 }
 0x230   :  { %v388_v7 = vpop.f32.mrf.mxu1 }
 0x231   :  { %v16063_v8 = vmul.f32 0.35355338, %v388_v7 }
 0x232   :  { %v14247_v9 = vpop.f32.mrf.mxu1 }
 0x233   :  { %v2998_v10 = vsel %vm2997_vm4, %v16063_v8, -inf }
 0x234   :  { %2999 = vmax.xlane.f32.xlu0 %v2998_v10 }
 0x236   :  { %v471_v11 = vpop.f32.mrf.mxu1 }
 0x237   :  { %v16083_v32 = vmul.f32 0.35355338, %v471_v11 }
 0x238   :  { %v14252_v12 = vpop.f32.mrf.mxu1 }
 0x239   :  { %v3001_v35 = vsel %vm2997_vm4, %v16083_v32, -inf }
 0x23c   :  { %v554_v13 = vpop.f32.mrf.mxu1 }
 0x23d   :  { %v16067_v14 = vmul.f32 0.35355338, %v554_v13 }
 0x23e   :  { %v14257_v15 = vpop.f32.mrf.mxu1 }
 0x23f   :  { %v3004_v16 = vsel %vm2997_vm4, %v16067_v14, -inf  ;;  %v16133_v15 = vpop.permute.xlu0 %4045 }
 0x240   :  { %v720_v17 = vpop.f32.mrf.mxu0  ;;  %3005 = vmax.xlane.f32.xlu0 %v3004_v16 }
 0x241   :  { %v16071_v18 = vmul.f32 0.35355338, %v720_v17  ;;  %v637_v19 = vpop.f32.mrf.mxu1 }
 0x242   :  { %v16073_v21 = vmul.f32 0.35355338, %v637_v19  ;;  %v14267_v22 = vpop.f32.mrf.mxu0 }
 0x243   :  { %v14262_v23 = vpop.f32.mrf.mxu1  ;;  %v3010_v24 = vsel %vm2997_vm4, %v16071_v18, -inf }
 0x244   :  { %v886_v25 = vpop.f32.mrf.mxu0  ;;  %3011 = vmax.xlane.f32.xlu1 %v3010_v24  ;;  %v3007_v26 = vsel %vm2997_vm4, %v16073_v21, -inf  ;;  %v16139_v23 = vpop.permute.xlu1 %4122 }
 0x245   :  { %v16079_v27 = vmul.f32 0.35355338, %v886_v25  ;;  %3008 = vmax.xlane.f32.xlu0 %v3007_v26  ;;  %v803_v28 = vpop.f32.mrf.mxu1 }
 0x246   :  { %v16081_v30 = vmul.f32 0.35355338, %v803_v28  ;;  %v14277_v31 = vpop.f32.mrf.mxu0 }
 0x247   :  { %v14272_v34 = vpop.f32.mrf.mxu1  ;;  %v3016_v36 = vsel %vm2997_vm4, %v16079_v27, -inf }
 0x248   :  { %3017 = vmax.xlane.f32.xlu1 %v3016_v36  ;;  %v3013_v39 = vsel %vm2997_vm4, %v16081_v30, -inf }
 0x249   :  { %3014 = vmax.xlane.f32.xlu0 %v3013_v39  ;;  %v969_v42 = vpop.f32.mrf.mxu1 }
 0x24a   :  { %v16089_v37 = vmul.f32 0.35355338, %v969_v42  ;;  %v16149_v42 = vpop.permute.xlu0 %4353 }
 0x24b   :  { %v14282_v41 = vpop.f32.mrf.mxu1 }
 0x24c   :  { %3002 = vmax.xlane.f32.xlu1 %v3001_v35  ;;  %v3019_v38 = vsel %vm2997_vm4, %v16089_v37, -inf }
 0x24d   :  { %3020 = vmax.xlane.f32.xlu0 %v3019_v38 }
 0x281   :  { %v1052_v47 = vpop.f32.mrf.mxu0 }
 0x282   :  { %v16101_v48 = vmul.f32 0.35355338, %v1052_v47 }
 0x283   :  { %v14287_v49 = vpop.f32.mrf.mxu0 }
 0x284   :  { %v3022_v51 = vsel %vm2997_vm4, %v16101_v48, -inf  ;;  %v16155_v49 = vpop.permute.xlu1 %4276 }
 0x285   :  { %v1218_v52 = vpop.f32.mrf.mxu0  ;;  %3023 = vmax.xlane.f32.xlu1 %v3022_v51  ;;  %v1135_v53 = vpop.f32.mrf.mxu1 }
 0x286   :  { %v16109_v55 = vmul.f32 0.35355338, %v1218_v52  ;;  %v16111_v56 = vmul.f32 0.35355338, %v1135_v53 }
 0x287   :  { %v14292_v57 = vpop.f32.mrf.mxu1  ;;  %v14297_v58 = vpop.f32.mrf.mxu0 }
 0x288   :  { %v3028_v59 = vsel %vm2997_vm4, %v16109_v55, -inf  ;;  %v3025_v60 = vsel %vm2997_vm4, %v16111_v56, -inf }
 0x289   :  { %v1384_v61 = vpop.f32.mrf.mxu0  ;;  %3029 = vmax.xlane.f32.xlu1 %v3028_v59  ;;  %3026 = vmax.xlane.f32.xlu0 %v3025_v60  ;;  %v1301_v62 = vpop.f32.mrf.mxu1 }
 0x28a   :  { %v16119_v0 = vmul.f32 0.35355338, %v1384_v61  ;;  %v16121_v1 = vmul.f32 0.35355338, %v1301_v62  ;;  %v16165_v62 = vpop.permute.xlu0 %4507 }
 0x28b   :  { %v14302_v2 = vpop.f32.mrf.mxu1  ;;  %v14307_v3 = vpop.f32.mrf.mxu0 }
 0x28c   :  { %v3034_v5 = vsel %vm2997_vm4, %v16119_v0, -inf  ;;  %v3031_v6 = vsel %vm2997_vm4, %v16121_v1, -inf }
 0x28d   :  { %v1550_v7 = vpop.f32.mrf.mxu0  ;;  %3035 = vmax.xlane.f32.xlu1 %v3034_v5  ;;  %3032 = vmax.xlane.f32.xlu0 %v3031_v6  ;;  %v1467_v9 = vpop.f32.mrf.mxu1 }
 0x28e   :  { %v16129_v10 = vmul.f32 0.35355338, %v1550_v7  ;;  %v16131_v11 = vmul.f32 0.35355338, %v1467_v9  ;;  %v16171_v7 = vpop.permute.xlu1 %4430 }
 0x28f   :  { %v14312_v12 = vpop.f32.mrf.mxu1  ;;  %v14317_v13 = vpop.f32.mrf.mxu0  ;;  %18551 = vst [vmem:[#allocation8_spill] sm:$0xff] %v16171_v7 }
 0x290   :  { %v3040_v16 = vsel %vm2997_vm4, %v16129_v10, -inf  ;;  %v3037_v17 = vsel %vm2997_vm4, %v16131_v11, -inf }
 0x291   :  { %v1716_v19 = vpop.f32.mrf.mxu0  ;;  %3041 = vmax.xlane.f32.xlu1 %v3040_v16  ;;  %3038 = vmax.xlane.f32.xlu0 %v3037_v17  ;;  %v1633_v22 = vpop.f32.mrf.mxu1 }
 0x292   :  { %v16141_v24 = vmul.f32 0.35355338, %v1716_v19  ;;  %v16143_v25 = vmul.f32 0.35355338, %v1633_v22 }
 0x293   :  { %v14322_v26 = vpop.f32.mrf.mxu1  ;;  %v14327_v28 = vpop.f32.mrf.mxu0 }
 0x294   :  { %v3046_v31 = vsel %vm2997_vm4, %v16141_v24, -inf  ;;  %v3043_v34 = vsel %vm2997_vm4, %v16143_v25, -inf  ;;  %v16181_v28 = vpop.permute.xlu0 %4661 }
 0x295   :  { %v1882_v36 = vpop.f32.mrf.mxu0  ;;  %3047 = vmax.xlane.f32.xlu1 %v3046_v31  ;;  %3044 = vmax.xlane.f32.xlu0 %v3043_v34  ;;  %v1799_v39 = vpop.f32.mrf.mxu1  ;;  %18552 = vst [vmem:[#allocation6_spill] sm:$0xff] %v16181_v28 }
 0x296   :  { %v16151_v41 = vmul.f32 0.35355338, %v1882_v36  ;;  %v16153_v35 = vmul.f32 0.35355338, %v1799_v39 }
 0x297   :  { %v14332_v38 = vpop.f32.mrf.mxu1  ;;  %v14337_v47 = vpop.f32.mrf.mxu0 }
 0x298   :  { %v3052_v51 = vsel %vm2997_vm4, %v16151_v41, -inf  ;;  %v3049_v52 = vsel %vm2997_vm4, %v16153_v35, -inf  ;;  %v16187_v38 = vpop.permute.xlu1 %4584 }
 0x299   :  { %v2048_v53 = vpop.f32.mrf.mxu0  ;;  %3053 = vmax.xlane.f32.xlu1 %v3052_v51  ;;  %3050 = vmax.xlane.f32.xlu0 %v3049_v52  ;;  %v1965_v57 = vpop.f32.mrf.mxu1  ;;  %18553 = vst [vmem:[#allocation9_spill] sm:$0xff] %v16187_v38 }
 0x29a   :  { %v16161_v58 = vmul.f32 0.35355338, %v2048_v53  ;;  %v16163_v59 = vmul.f32 0.35355338, %v1965_v57 }
 0x29b   :  { %v14342_v60 = vpop.f32.mrf.mxu1  ;;  %v14347_v61 = vpop.f32.mrf.mxu0 }
 0x29c   :  { %v3058_v2 = vsel %vm2997_vm4, %v16161_v58, -inf  ;;  %v3055_v3 = vsel %vm2997_vm4, %v16163_v59, -inf }
 0x29d   :  { %v2214_v5 = vpop.f32.mrf.mxu0  ;;  %3059 = vmax.xlane.f32.xlu1 %v3058_v2  ;;  %3056 = vmax.xlane.f32.xlu0 %v3055_v3  ;;  %v2131_v6 = vpop.f32.mrf.mxu1 }
 0x29e   :  { %v16173_v9 = vmul.f32 0.35355338, %v2214_v5  ;;  %v16175_v12 = vmul.f32 0.35355338, %v2131_v6  ;;  %v16201_v6 = vpop.permute.xlu0 %5046 }
 0x29f   :  { %v14352_v13 = vpop.f32.mrf.mxu1  ;;  %v14357_v16 = vpop.f32.mrf.mxu0  ;;  %18554 = vst [vmem:[#allocation10_spill] sm:$0xff] %v16201_v6 }
 0x2a0   :  { %v3064_v17 = vsel %vm2997_vm4, %v16173_v9, -inf  ;;  %v3061_v19 = vsel %vm2997_vm4, %v16175_v12, -inf }
 0x2a1   :  { %v2380_v22 = vpop.f32.mrf.mxu0  ;;  %3065 = vmax.xlane.f32.xlu1 %v3064_v17  ;;  %3062 = vmax.xlane.f32.xlu0 %v3061_v19  ;;  %v2297_v26 = vpop.f32.mrf.mxu1 }
 0x2a2   :  { %v16183_v31 = vmul.f32 0.35355338, %v2380_v22  ;;  %v16185_v34 = vmul.f32 0.35355338, %v2297_v26  ;;  %v16205_v19 = vpop.permute.xlu1 %4738 }
 0x2a3   :  { %v14362_v36 = vpop.f32.mrf.mxu1  ;;  %v14367_v39 = vpop.f32.mrf.mxu0  ;;  %18555 = vst [vmem:[#allocation11_spill] sm:$0xff] %v16205_v19 }
 0x2a4   :  { %v3070_v47 = vsel %vm2997_vm4, %v16183_v31, -inf  ;;  %v3067_v51 = vsel %vm2997_vm4, %v16185_v34, -inf }
 0x2a5   :  { %v2546_v52 = vpop.f32.mrf.mxu0  ;;  %3071 = vmax.xlane.f32.xlu1 %v3070_v47  ;;  %3068 = vmax.xlane.f32.xlu0 %v3067_v51  ;;  %v2463_v53 = vpop.f32.mrf.mxu1 }
 0x2a6   :  { %v16193_v57 = vmul.f32 0.35355338, %v2546_v52  ;;  %v16195_v60 = vmul.f32 0.35355338, %v2463_v53  ;;  %v16213_v53 = vpop.permute.xlu0 %4199 }
 0x2a7   :  { %v14372_v61 = vpop.f32.mrf.mxu1  ;;  %v14377_v2 = vpop.f32.mrf.mxu0 }
 0x2a8   :  { %v3076_v3 = vsel %vm2997_vm4, %v16193_v57, -inf  ;;  %v3073_v5 = vsel %vm2997_vm4, %v16195_v60, -inf }
 0x2a9   :  { %v2712_v13 = vpop.f32.mrf.mxu0  ;;  %3077 = vmax.xlane.f32.xlu1 %v3076_v3  ;;  %3074 = vmax.xlane.f32.xlu0 %v3073_v5  ;;  %v16217_v5 = vpop.permute.xlu1 %4892 }
 0x2aa   :  { %v16203_v16 = vmul.f32 0.35355338, %v2712_v13  ;;  %v2629_v17 = vpop.f32.mrf.mxu1  ;;  %18556 = vst [vmem:[#allocation12_spill] sm:$0xff] %v16217_v5  ;;  %v18564_v5 = vld [vmem:[#allocation7_spill] sm:$0xff] }
 0x2ab   :  { %v16207_v22 = vmul.f32 0.35355338, %v2629_v17  ;;  %v14387_v26 = vpop.f32.mrf.mxu0 }
 0x2ac   :  { %v14382_v36 = vpop.f32.mrf.mxu1  ;;  %v3082_v39 = vsel %vm2997_vm4, %v16203_v16, -inf }
 0x2ad   :  { %v2878_v47 = vpop.f32.mrf.mxu0  ;;  %3083 = vmax.xlane.f32.xlu1 %v3082_v39  ;;  %v3079_v51 = vsel %vm2997_vm4, %v16207_v22, -inf  ;;  %v16223_v39 = vpop.permute.xlu0 %4815 }
 0x2ae   :  { %3080 = vmax.xlane.f32.xlu0 %v3079_v51  ;;  %v2795_v52 = vpop.f32.mrf.mxu1  ;;  %18557 = vst [vmem:[#allocation13_spill] sm:$0xff] %v16223_v39 }
 0x2af   :  { %v16215_v61 = vmul.f32 0.35355338, %v2795_v52  ;;  %v14397_v2 = vpop.f32.mrf.mxu0  ;;  %v16227_v52 = vpop.permute.xlu1 %4969 }
 0x2b0   :  { %v14392_v3 = vpop.f32.mrf.mxu1  ;;  %18558 = vst [vmem:[#allocation14_spill] sm:$0xff] %v16227_v52 }
 0x2b1   :  { %v3085_v13 = vsel %vm2997_vm4, %v16215_v61, -inf  ;;  %v16229_v2 = vpop.permute.xlu0 %5200 }
 0x2b2   :  { %3086 = vmax.xlane.f32.xlu0 %v3085_v13  ;;  %v2961_v17 = vpop.f32.mrf.mxu1  ;;  %18559 = vst [vmem:[#allocation15_spill] sm:$0xff] %v16229_v2 }
 0x2b3   :  { %v16221_v26 = vmul.f32 0.35355338, %v2961_v17  ;;  %v16231_v3 = vpop.permute.xlu1 %5123 }
 0x2b4   :  { %v14402_v36 = vpop.f32.mrf.mxu1  ;;  %18560 = vst [vmem:[#allocation16_spill] sm:$0xff] %v16231_v3 }
 0x2b5   :  { %v3091_v51 = vsel %vm2997_vm4, %v16221_v26, -inf  ;;  %v16233_v46 = vpop.permute.xlu0 %5354 }
 0x2b6   :  { %3092 = vmax.xlane.f32.xlu0 %v3091_v51  ;;  %18561 = vst [vmem:[#allocation17_spill] sm:$0xff] %v16233_v46 }
 0x2b7   :  { %v16235_v20 = vpop.permute.xlu1 %5277 }
 0x2b8   :  { %18562 = vst [vmem:[#allocation18_spill] sm:$0xff] %v16235_v20 }
 0x2bb   :  { %v16237_v17 = vpop.permute.xlu1 %5431 }
 0x2bc   :  { %18563 = vst [vmem:[#allocation19_spill] sm:$0xff] %v16237_v17 }
 0x2bd   :  { %v3000_v13 = vpop.xlane.xlu0 %2999 }
 0x2be   :  { %v3094_v6 = vsub.f32 %v16063_v8, %v3000_v13 }
 0x2c0   :  { %v3126_v2 = vmul.f32 1.442695, %v3094_v6 }
 0x2c9   :  { %v3006_v36 = vpop.xlane.xlu0 %3005 }
 0x2cc   :  { %5508 = vrot.lane.b32.xlu0 %v18564_v5, %s15356_s18 }
 0x2cd   :  { %v3012_v51 = vpop.xlane.xlu1 %3011 }
 0x2ce   :  { %v3098_v19 = vsub.f32 %v16071_v18, %v3012_v51  ;;  %v3009_v52 = vpop.xlane.xlu0 %3008 }
 0x2cf   :  { %v3097_v17 = vsub.f32 %v16073_v21, %v3009_v52 }
 0x2d0   :  { %v3134_v38 = vmul.f32 1.442695, %v3098_v19 }
 0x2d1   :  { %v3018_v3 = vpop.xlane.xlu1 %3017  ;;  %v3132_v5 = vmul.f32 1.442695, %v3097_v17 }
 0x2d2   :  { %14999 = vpow2.f32 %v3134_v38  ;;  %v3100_v46 = vsub.f32 %v16079_v27, %v3018_v3  ;;  %v3015_v20 = vpop.xlane.xlu0 %3014 }
 0x2d3   :  { %15001 = vpow2.f32 %v3126_v2  ;;  %v3099_v28 = vsub.f32 %v16081_v30, %v3015_v20 }
 0x2d4   :  { %v3138_v13 = vmul.f32 1.442695, %v3100_v46 }
 0x2d5   :  { %v3003_v39 = vpop.xlane.xlu1 %3002  ;;  %v3136_v6 = vmul.f32 1.442695, %v3099_v28 }
 0x2d6   :  { %v3095_v8 = vsub.f32 %v16083_v32, %v3003_v39  ;;  %v3021_v18 = vpop.xlane.xlu0 %3020  ;;  %v16254_v32 = vmul.f32 0.35355338, %v2878_v47 }
 0x2d7   :  { %v3101_v38 = vsub.f32 %v16089_v37, %v3021_v18 }
 0x2d8   :  { %v3128_v7 = vmul.f32 1.442695, %v3095_v8  ;;  %v3088_v37 = vsel %vm2997_vm4, %v16254_v32, -inf  ;;  %v3096_v8 = vsub.f32 %v16067_v14, %v3006_v36 }
 0x2d9   :  { %v3140_v46 = vmul.f32 1.442695, %v3101_v38 }
 0x2da   :  { %15003 = vpow2.f32 %v3128_v7 }
 0x2db   :  { %15005 = vpow2.f32 %v3138_v13  ;;  %v3130_v13 = vmul.f32 1.442695, %v3096_v8 }
 0x2dc   :  { %15007 = vpow2.f32 %v3132_v5 }
 0x2dd   :  { %15009 = vpow2.f32 %v3136_v6 }
 0x2de   :  { %15011 = vpow2.f32 %v3140_v46 }
 0x2df   :  { %v16248_v19 = vpop.eup %14999  ;;  %15013 = vpow2.f32 %v3130_v13 }
 0x2e0   :  { %v3202_v27 = vsel %vm2997_vm4, %v16248_v19, 0.0  ;;  %v16252_v21 = vpop.eup %15001 }
 0x2e1   :  { %3203 = vadd.xlane.f32.xlu1 %v3202_v27  ;;  %v3190_v20 = vsel %vm2997_vm4, %v16252_v21, 0.0 }
 0x2e5   :  { %3191 = vadd.xlane.f32.xlu1 %v3190_v20 }
 0x2e7   :  { %v16258_v30 = vpop.eup %15003 }
 0x2e8   :  { %v3193_v7 = vsel %vm2997_vm4, %v16258_v30, 0.0  ;;  %v16264_v28 = vpop.eup %15005 }
 0x2e9   :  { %3089 = vmax.xlane.f32.xlu1 %v3088_v37  ;;  %v16266_v39 = vpop.eup %15007  ;;  %v3208_v47 = vsel %vm2997_vm4, %v16264_v28, 0.0 }
 0x2ea   :  { %v3199_v52 = vsel %vm2997_vm4, %v16266_v39, 0.0  ;;  %v16272_v2 = vpop.eup %15009 }
 0x2eb   :  { %3194 = vadd.xlane.f32.xlu0 %v3193_v7  ;;  %v3205_v3 = vsel %vm2997_vm4, %v16272_v2, 0.0  ;;  %v16276_v17 = vpop.eup %15011 }
 0x2ec   :  { %v3211_v51 = vsel %vm2997_vm4, %v16276_v17, 0.0 }
 0x2ed   :  { %3209 = vadd.xlane.f32.xlu1 %v3208_v47 }
 0x2ef   :  { %3200 = vadd.xlane.f32.xlu0 %v3199_v52 }
 0x2f3   :  { %3206 = vadd.xlane.f32.xlu0 %v3205_v3 }
 0x2f7   :  { %3212 = vadd.xlane.f32.xlu0 %v3211_v51 }
 0x2fe   :  { %5585 = vrot.lane.b32.xlu1 %v15805_v29, %s15356_s18 }
 0x30e   :  { %v3024_v5 = vpop.xlane.xlu1 %3023 }
 0x30f   :  { %v3102_v18 = vsub.f32 %v16101_v48, %v3024_v5  ;;  %v16290_v5 = vpop.eup %15013 }
 0x311   :  { %v3142_v6 = vmul.f32 1.442695, %v3102_v18 }
 0x312   :  { %v3027_v38 = vpop.xlane.xlu0 %3026  ;;  %v3030_v27 = vpop.xlane.xlu1 %3029 }
 0x313   :  { %v3103_v46 = vsub.f32 %v16111_v56, %v3027_v38  ;;  %v3104_v20 = vsub.f32 %v16109_v55, %v3030_v27  ;;  %15015 = vpow2.f32 %v3142_v6 }
 0x315   :  { %v3144_v37 = vmul.f32 1.442695, %v3103_v46  ;;  %v3146_v7 = vmul.f32 1.442695, %v3104_v20 }
 0x316   :  { %v3033_v47 = vpop.xlane.xlu0 %3032  ;;  %v3036_v52 = vpop.xlane.xlu1 %3035 }
 0x317   :  { %15017 = vpow2.f32 %v3144_v37  ;;  %v3105_v29 = vsub.f32 %v16121_v1, %v3033_v47  ;;  %v3106_v14 = vsub.f32 %v16119_v0, %v3036_v52 }
 0x318   :  { %15019 = vpow2.f32 %v3146_v7 }
 0x319   :  { %v3148_v48 = vmul.f32 1.442695, %v3105_v29  ;;  %v3150_v36 = vmul.f32 1.442695, %v3106_v14 }
 0x31a   :  { %v3039_v3 = vpop.xlane.xlu0 %3038  ;;  %v3042_v51 = vpop.xlane.xlu1 %3041 }
 0x31b   :  { %15021 = vpow2.f32 %v3148_v48  ;;  %v3107_v56 = vsub.f32 %v16131_v11, %v3039_v3  ;;  %v3108_v55 = vsub.f32 %v16129_v10, %v3042_v51  ;;  %v3196_v11 = vsel %vm2997_vm4, %v16290_v5, 0.0 }
 0x31c   :  { %15023 = vpow2.f32 %v3150_v36 }
 0x31d   :  { %v3152_v8 = vmul.f32 1.442695, %v3107_v56  ;;  %v3154_v13 = vmul.f32 1.442695, %v3108_v55 }
 0x31e   :  { %v3045_v18 = vpop.xlane.xlu0 %3044  ;;  %v3048_v6 = vpop.xlane.xlu1 %3047 }
 0x31f   :  { %15025 = vpow2.f32 %v3152_v8  ;;  %v3109_v0 = vsub.f32 %v16143_v25, %v3045_v18  ;;  %v3110_v1 = vsub.f32 %v16141_v24, %v3048_v6 }
 0x320   :  { %15027 = vpow2.f32 %v3154_v13  ;;  %v16296_v46 = vpop.eup %15015 }
 0x321   :  { %v3156_v38 = vmul.f32 1.442695, %v3109_v0  ;;  %v3158_v27 = vmul.f32 1.442695, %v3110_v1  ;;  %v3214_v14 = vsel %vm2997_vm4, %v16296_v46, 0.0 }
 0x322   :  { %v3051_v10 = vpop.xlane.xlu0 %3050  ;;  %3197 = vadd.xlane.f32.xlu1 %v3196_v11  ;;  %v3054_v20 = vpop.xlane.xlu1 %3053 }
 0x323   :  { %15029 = vpow2.f32 %v3156_v38  ;;  %v3111_v37 = vsub.f32 %v16153_v35, %v3051_v10  ;;  %v3112_v7 = vsub.f32 %v16151_v41, %v3054_v20 }
 0x324   :  { %v16300_v47 = vpop.eup %15017  ;;  %15031 = vpow2.f32 %v3158_v27 }
 0x325   :  { %v16302_v24 = vpop.eup %15019  ;;  %v3160_v25 = vmul.f32 1.442695, %v3111_v37  ;;  %v3162_v52 = vmul.f32 1.442695, %v3112_v7  ;;  %v3217_v29 = vsel %vm2997_vm4, %v16300_v47, 0.0 }
 0x326   :  { %v3057_v48 = vpop.xlane.xlu0 %3056  ;;  %3218 = vadd.xlane.f32.xlu0 %v3217_v29  ;;  %3215 = vadd.xlane.f32.xlu1 %v3214_v14  ;;  %v3060_v36 = vpop.xlane.xlu1 %3059  ;;  %v3220_v51 = vsel %vm2997_vm4, %v16302_v24, 0.0 }
 0x327   :  { %15033 = vpow2.f32 %v3160_v25  ;;  %v3113_v41 = vsub.f32 %v16163_v59, %v3057_v48  ;;  %v3114_v35 = vsub.f32 %v16161_v58, %v3060_v36 }
 0x328   :  { %v16310_v3 = vpop.eup %15021  ;;  %15035 = vpow2.f32 %v3162_v52 }
 0x329   :  { %v16314_v56 = vpop.eup %15023  ;;  %v3164_v55 = vmul.f32 1.442695, %v3113_v41  ;;  %v3166_v8 = vmul.f32 1.442695, %v3114_v35  ;;  %v3223_v13 = vsel %vm2997_vm4, %v16310_v3, 0.0 }
 0x32a   :  { %v3063_v18 = vpop.xlane.xlu0 %3062  ;;  %3224 = vadd.xlane.f32.xlu0 %v3223_v13  ;;  %3221 = vadd.xlane.f32.xlu1 %v3220_v51  ;;  %v3066_v6 = vpop.xlane.xlu1 %3065  ;;  %v3226_v1 = vsel %vm2997_vm4, %v16314_v56, 0.0 }
 0x32b   :  { %15037 = vpow2.f32 %v3164_v55  ;;  %v3115_v58 = vsub.f32 %v16175_v12, %v3063_v18  ;;  %v3116_v59 = vsub.f32 %v16173_v9, %v3066_v6 }
 0x32c   :  { %v16320_v0 = vpop.eup %15025  ;;  %15039 = vpow2.f32 %v3166_v8 }
 0x32d   :  { %v16324_v38 = vpop.eup %15027  ;;  %v3168_v27 = vmul.f32 1.442695, %v3115_v58  ;;  %v3170_v11 = vmul.f32 1.442695, %v3116_v59  ;;  %v3229_v10 = vsel %vm2997_vm4, %v16320_v0, 0.0 }
 0x32e   :  { %v3069_v20 = vpop.xlane.xlu0 %3068  ;;  %3230 = vadd.xlane.f32.xlu0 %v3229_v10  ;;  %3227 = vadd.xlane.f32.xlu1 %v3226_v1  ;;  %v3072_v37 = vpop.xlane.xlu1 %3071  ;;  %v3232_v25 = vsel %vm2997_vm4, %v16324_v38, 0.0 }
 0x32f   :  { %15041 = vpow2.f32 %v3168_v27  ;;  %v3117_v9 = vsub.f32 %v16185_v34, %v3069_v20  ;;  %v3118_v12 = vsub.f32 %v16183_v31, %v3072_v37 }
 0x330   :  { %v16330_v7 = vpop.eup %15029  ;;  %15043 = vpow2.f32 %v3170_v11 }
 0x331   :  { %v16334_v52 = vpop.eup %15031  ;;  %v3172_v29 = vmul.f32 1.442695, %v3117_v9  ;;  %v3174_v14 = vmul.f32 1.442695, %v3118_v12  ;;  %v3235_v48 = vsel %vm2997_vm4, %v16330_v7, 0.0 }
 0x332   :  { %v3075_v36 = vpop.xlane.xlu0 %3074  ;;  %3236 = vadd.xlane.f32.xlu0 %v3235_v48  ;;  %3233 = vadd.xlane.f32.xlu1 %v3232_v25  ;;  %v3078_v41 = vpop.xlane.xlu1 %3077  ;;  %v3238_v51 = vsel %vm2997_vm4, %v16334_v52, 0.0 }
 0x333   :  { %15045 = vpow2.f32 %v3172_v29  ;;  %v3119_v31 = vsub.f32 %v16195_v60, %v3075_v36  ;;  %v3120_v34 = vsub.f32 %v16193_v57, %v3078_v41 }
 0x334   :  { %v16340_v35 = vpop.eup %15033  ;;  %15047 = vpow2.f32 %v3174_v14 }
 0x335   :  { %v3176_v55 = vmul.f32 1.442695, %v3119_v31  ;;  %v3178_v8 = vmul.f32 1.442695, %v3120_v34  ;;  %v3241_v13 = vsel %vm2997_vm4, %v16340_v35, 0.0  ;;  %v16346_v18 = vpop.eup %15035 }
 0x336   :  { %3242 = vadd.xlane.f32.xlu0 %v3241_v13  ;;  %3239 = vadd.xlane.f32.xlu1 %v3238_v51  ;;  %v3084_v6 = vpop.xlane.xlu1 %3083  ;;  %v3244_v11 = vsel %vm2997_vm4, %v16346_v18, 0.0 }
 0x337   :  { %15049 = vpow2.f32 %v3176_v55  ;;  %v3081_v60 = vpop.xlane.xlu0 %3080  ;;  %v3122_v57 = vsub.f32 %v16203_v16, %v3084_v6 }
 0x338   :  { %v16349_v58 = vpop.eup %15037  ;;  %v3121_v59 = vsub.f32 %v16207_v22, %v3081_v60  ;;  %15051 = vpow2.f32 %v3178_v8 }
 0x339   :  { %v3182_v1 = vmul.f32 1.442695, %v3122_v57  ;;  %v3247_v27 = vsel %vm2997_vm4, %v16349_v58, 0.0  ;;  %v16356_v10 = vpop.eup %15039 }
 0x33a   :  { %v3180_v20 = vmul.f32 1.442695, %v3121_v59  ;;  %3248 = vadd.xlane.f32.xlu0 %v3247_v27  ;;  %3245 = vadd.xlane.f32.xlu1 %v3244_v11  ;;  %v3250_v12 = vsel %vm2997_vm4, %v16356_v10, 0.0 }
 0x33b   :  { %v3087_v37 = vpop.xlane.xlu0 %3086 }
 0x33c   :  { %v16358_v9 = vpop.eup %15041  ;;  %15053 = vpow2.f32 %v3180_v20  ;;  %v3123_v16 = vsub.f32 %v16215_v61, %v3087_v37 }
 0x33d   :  { %15055 = vpow2.f32 %v3182_v1  ;;  %v3253_v22 = vsel %vm2997_vm4, %v16358_v9, 0.0  ;;  %v16365_v25 = vpop.eup %15043 }
 0x33e   :  { %v3184_v29 = vmul.f32 1.442695, %v3123_v16  ;;  %3254 = vadd.xlane.f32.xlu0 %v3253_v22  ;;  %3251 = vadd.xlane.f32.xlu1 %v3250_v12  ;;  %v3256_v41 = vsel %vm2997_vm4, %v16365_v25, 0.0 }
 0x33f   :  { %v3093_v14 = vpop.xlane.xlu0 %3092 }
 0x340   :  { %v16367_v48 = vpop.eup %15045  ;;  %15057 = vpow2.f32 %v3184_v29  ;;  %v3125_v36 = vsub.f32 %v16221_v26, %v3093_v14 }
 0x341   :  { %v3259_v61 = vsel %vm2997_vm4, %v16367_v48, 0.0  ;;  %v16374_v31 = vpop.eup %15047 }
 0x342   :  { %v3188_v34 = vmul.f32 1.442695, %v3125_v36  ;;  %3260 = vadd.xlane.f32.xlu0 %v3259_v61  ;;  %3257 = vadd.xlane.f32.xlu1 %v3256_v41  ;;  %v3262_v26 = vsel %vm2997_vm4, %v16374_v31, 0.0 }
 0x343   :  { %v16404_v22 = vpop.permute.xlu0 %5508 }
 0x344   :  { %v16376_v51 = vpop.eup %15049  ;;  %15059 = vpow2.f32 %v3188_v34 }
 0x345   :  { %v3265_v55 = vsel %vm2997_vm4, %v16376_v51, 0.0  ;;  %v16382_v8 = vpop.eup %15051 }
 0x346   :  { %3266 = vadd.xlane.f32.xlu0 %v3265_v55  ;;  %3263 = vadd.xlane.f32.xlu1 %v3262_v26  ;;  %v3268_v6 = vsel %vm2997_vm4, %v16382_v8, 0.0  ;;  %v18565_v26 = vmov 0.0  }
 0x349   :  { %v16384_v13 = vpop.eup %15053 }
 0x34a   :  { %v16388_v60 = vpop.eup %15055  ;;  %v3271_v57 = vsel %vm2997_vm4, %v16384_v13, 0.0  ;;  %3269 = vadd.xlane.f32.xlu1 %v3268_v6 }
 0x34b   :  { %3272 = vadd.xlane.f32.xlu0 %v3271_v57  ;;  %v3274_v1 = vsel %vm2997_vm4, %v16388_v60, 0.0 }
 0x34d   :  { %v16392_v59 = vpop.eup %15057 }
 0x34e   :  { %v3277_v27 = vsel %vm2997_vm4, %v16392_v59, 0.0  ;;  %3275 = vadd.xlane.f32.xlu1 %v3274_v1 }
 0x34f   :  { %3278 = vadd.xlane.f32.xlu0 %v3277_v27 }
 0x351   :  { %v16398_v11 = vpop.eup %15059 }
 0x352   :  { %v3283_v20 = vsel %vm2997_vm4, %v16398_v11, 0.0 }
 0x353   :  { %3284 = vadd.xlane.f32.xlu0 %v3283_v20 }
 0x369   :  { %5662 = vrot.lane.b32.xlu0 %v15801_v40, %s15356_s18 }
 0x36a   :  { %v3204_v37 = vpop.xlane.xlu1 %3203 }
 0x36e   :  { %v3192_v16 = vpop.xlane.xlu1 %3191 }
 0x36f   :  { %15061 = vrcp.f32 %v3192_v16 }
 0x372   :  { %v3090_v12 = vpop.xlane.xlu1 %3089 }
 0x373   :  { %v3124_v29 = vsub.f32 %v16254_v32, %v3090_v12 }
 0x374   :  { %v3195_v14 = vpop.xlane.xlu0 %3194 }
 0x375   :  { %v3186_v36 = vmul.f32 1.442695, %v3124_v29  ;;  %15063 = vrcp.f32 %v3195_v14 }
 0x377   :  { %15065 = vpow2.f32 %v3186_v36 }
 0x378   :  { %v3201_v61 = vpop.xlane.xlu0 %3200 }
 0x379   :  { %15067 = vrcp.f32 %v3201_v61 }
 0x37c   :  { %v15062_v41 = vpop.eup %15061  ;;  %v3207_v34 = vpop.xlane.xlu0 %3206 }
 0x37d   :  { %15069 = vrcp.f32 %v3207_v34  ;;  %v3318_v40 = vmul.f32 %v15062_v41, %v16252_v21 }
 0x37f   :  { %14406 = vmatmul.mubr.msk.f32.vlgmr.msra.gmra.mxu0 %vm3352_vm5, %v3318_v40 }
 0x380   :  { %v3213_v55 = vpop.xlane.xlu0 %3212  ;;  %14414 = vmatpush3.msk.msra.mxu0 %vm3356_vm3, %v16095_v43  ;;  %14415 = vmatprep.mubr.msk.f32.mxu0 %vm15353_vm1, %v18565_v26 }
 0x381   :  { %15071 = vrcp.f32 %v3213_v55  ;;  %14423 = vmatprep.subr.mxu0 %v18565_v26 }
 0x382   :  { %v15064_v32 = vpop.eup %15063 }
 0x383   :  { %v3319_v6 = vmul.f32 %v15064_v32, %v16258_v30 }
 0x384   :  { %v16415_v57 = vpop.eup %15065 }
 0x385   :  { %14411 = vmatmul.mubr.msk.f32.vlgmr.msra.gmra.mxu1 %vm3352_vm5, %v3319_v6  ;;  %v3280_v21 = vsel %vm2997_vm4, %v16415_v57, 0.0 }
 0x386   :  { %v15068_v1 = vpop.eup %15067  ;;  %14419 = vmatpush3.msk.msra.mxu1 %vm3356_vm3, %v16097_v44  ;;  %3281 = vadd.xlane.f32.xlu1 %v3280_v21 }
 0x387   :  { %14420 = vmatprep.mubr.msk.f32.mxu1 %vm15353_vm1, %v18565_v26  ;;  %14428 = vmatprep.subr.mxu1 %v18565_v26  ;;  %v3321_v43 = vmul.f32 %v15068_v1, %v16266_v39 }
 0x389   :  { %14421 = vmatmul.mubr.msk.f32.vlgmr.msra.gmra.mxu1 %vm3352_vm5, %v3321_v43 }
 0x38a   :  { %v15070_v30 = vpop.eup %15069  ;;  %14429 = vmatpush3.msk.msra.mxu1 %vm3356_vm3, %v16103_v50  ;;  %14430 = vmatprep.mubr.msk.f32.mxu1 %vm15353_vm1, %v18565_v26 }
 0x38b   :  { %14438 = vmatprep.subr.mxu1 %v18565_v26  ;;  %v3323_v44 = vmul.f32 %v15070_v30, %v16272_v2 }
 0x38d   :  { %14431 = vmatmul.mubr.msk.f32.vlgmr.msra.gmra.mxu1 %vm3352_vm5, %v3323_v44 }
 0x38e   :  { %v15072_v27 = vpop.eup %15071  ;;  %14439 = vmatpush3.msk.msra.mxu1 %vm3356_vm3, %v16117_v63  ;;  %14440 = vmatprep.mubr.msk.f32.mxu1 %vm15353_vm1, %v18565_v26  ;;  %v3210_v63 = vpop.xlane.xlu1 %3209 }
 0x38f   :  { %14448 = vmatprep.subr.mxu1 %v18565_v26  ;;  %v3325_v50 = vmul.f32 %v15072_v27, %v16276_v17 }
 0x391   :  { %14441 = vmatmul.mubr.msk.f32.vlgmr.msra.gmra.mxu1 %vm3352_vm5, %v3325_v50 }
 0x392   :  { %14449 = vmatpush3.msk.msra.mxu1 %vm3356_vm3, %v16133_v15  ;;  %14450 = vmatprep.mubr.msk.f32.mxu1 %vm15353_vm1, %v18565_v26  ;;  %v16448_v39 = vpop.permute.xlu1 %5585 }
 0x393   :  { %14458 = vmatprep.subr.mxu1 %v18565_v26 }
 0x397   :  { %5739 = vrot.lane.b32.xlu1 %v15820_v33, %s15356_s18 }
 0x3ab   :  { %v3198_v2 = vpop.xlane.xlu1 %3197 }
 0x3ac   :  { %15073 = vrcp.f32 %v3198_v2 }
 0x3ad   :  { %15075 = vrcp.f32 %v3204_v37 }
 0x3af   :  { %v3219_v17 = vpop.xlane.xlu0 %3218  ;;  %v3216_v20 = vpop.xlane.xlu1 %3215 }
 0x3b0   :  { %15077 = vrcp.f32 %v3219_v17  ;;  %v18567_v17 = vld [vmem:[#allocation8_spill] sm:$0xff] }
 0x3b1   :  { %15079 = vrcp.f32 %v3210_v63 }
 0x3b3   :  { %v3225_v16 = vpop.xlane.xlu0 %3224  ;;  %v3222_v15 = vpop.xlane.xlu1 %3221 }
 0x3b4   :  { %15081 = vrcp.f32 %v3225_v16 }
 0x3b5   :  { %15083 = vrcp.f32 %v3216_v20 }
 0x3b7   :  { %v3231_v12 = vpop.xlane.xlu0 %3230  ;;  %v3228_v29 = vpop.xlane.xlu1 %3227 }
 0x3b8   :  { %15085 = vrcp.f32 %v3231_v12 }
 0x3b9   :  { %v15074_v14 = vpop.eup %15073  ;;  %15087 = vrcp.f32 %v3222_v15 }
 0x3ba   :  { %v3320_v33 = vmul.f32 %v15074_v14, %v16290_v5  ;;  %v15076_v36 = vpop.eup %15075  ;;  %v18569_v14 = vld [vmem:[#allocation9_spill] sm:$0xff] }
 0x3bb   :  { %v3237_v61 = vpop.xlane.xlu0 %3236  ;;  %v3234_v41 = vpop.xlane.xlu1 %3233  ;;  %v3322_v34 = vmul.f32 %v15076_v36, %v16248_v19 }
 0x3bc   :  { %15089 = vrcp.f32 %v3237_v61  ;;  %14416 = vmatmul.mubr.msk.f32.vlgmr.msra.gmra.mxu0 %vm3352_vm5, %v3320_v33 }
 0x3bd   :  { %v15078_v37 = vpop.eup %15077  ;;  %14424 = vmatpush3.msk.msra.mxu0 %vm3356_vm3, %v16099_v45  ;;  %14425 = vmatprep.mubr.msk.f32.mxu0 %vm15353_vm1, %v18565_v26  ;;  %15091 = vrcp.f32 %v3228_v29 }
 0x3be   :  { %14433 = vmatprep.subr.mxu0 %v18565_v26  ;;  %v3327_v5 = vmul.f32 %v15078_v37, %v16300_v47  ;;  %v15080_v40 = vpop.eup %15079  ;;  %v18571_v37 = vld [vmem:[#allocation11_spill] sm:$0xff] }
 0x3bf   :  { %v3243_v55 = vpop.xlane.xlu0 %3242  ;;  %v3240_v32 = vpop.xlane.xlu1 %3239  ;;  %v3324_v45 = vmul.f32 %v15080_v40, %v16264_v28 }
 0x3c0   :  { %15093 = vrcp.f32 %v3243_v55  ;;  %14426 = vmatmul.mubr.msk.f32.vlgmr.msra.gmra.mxu0 %vm3352_vm5, %v3322_v34  ;;  %14451 = vmatmul.mubr.msk.f32.vlgmr.msra.gmra.mxu1 %vm3352_vm5, %v3327_v5  ;;  %v18572_v34 = vld [vmem:[#allocation16_spill] sm:$0xff] }
 0x3c1   :  { %v15082_v6 = vpop.eup %15081  ;;  %14434 = vmatpush3.msk.msra.mxu0 %vm3356_vm3, %v16107_v54  ;;  %14459 = vmatpush3.msk.msra.mxu1 %vm3356_vm3, %v16213_v53  ;;  %15095 = vrcp.f32 %v3234_v41 }
 0x3c2   :  { %14460 = vmatprep.mubr.msk.f32.mxu1 %vm15353_vm1, %v18565_v26  ;;  %14468 = vmatprep.subr.mxu1 %v18565_v26  ;;  %v3329_v19 = vmul.f32 %v15082_v6, %v16310_v3  ;;  %v15084_v47 = vpop.eup %15083  ;;  %v18574_v6 = vld [vmem:[#allocation18_spill] sm:$0xff] }
 0x3c3   :  { %v3249_v21 = vpop.xlane.xlu0 %3248  ;;  %14435 = vmatprep.mubr.msk.f32.mxu0 %vm15353_vm1, %v18565_v26  ;;  %14443 = vmatprep.subr.mxu0 %v18565_v26  ;;  %v3246_v54 = vpop.xlane.xlu1 %3245  ;;  %v3326_v28 = vmul.f32 %v15084_v47, %v16296_v46  ;;  %v18576_v47 = vld [vmem:[#allocation19_spill] sm:$0xff] }
 0x3c4   :  { %15097 = vrcp.f32 %v3249_v21  ;;  %14436 = vmatmul.mubr.msk.f32.vlgmr.msra.gmra.mxu0 %vm3352_vm5, %v3324_v45  ;;  %14461 = vmatmul.mubr.msk.f32.vlgmr.msra.gmra.mxu1 %vm3352_vm5, %v3329_v19  ;;  %v18575_v19 = vld [vmem:[#allocation10_spill] sm:$0xff] }
 0x3c5   :  { %v15086_v53 = vpop.eup %15085  ;;  %14444 = vmatpush3.msk.msra.mxu0 %vm3356_vm3, %v16123_v4  ;;  %14469 = vmatpush3.msk.msra.mxu1 %vm3356_vm3, %v16149_v42  ;;  %15099 = vrcp.f32 %v3240_v32  ;;  %v18573_v32 = vld [vmem:[#allocation12_spill] sm:$0xff] }
 0x3c6   :  { %14470 = vmatprep.mubr.msk.f32.mxu1 %vm15353_vm1, %v18565_v26  ;;  %14478 = vmatprep.subr.mxu1 %v18565_v26  ;;  %v3331_v3 = vmul.f32 %v15086_v53, %v16320_v0  ;;  %v15088_v1 = vpop.eup %15087  ;;  %v18577_v53 = vld [vmem:[#allocation15_spill] sm:$0xff] }
 0x3c7   :  { %v3255_v43 = vpop.xlane.xlu0 %3254  ;;  %14445 = vmatprep.mubr.msk.f32.mxu0 %vm15353_vm1, %v18565_v26  ;;  %14453 = vmatprep.subr.mxu0 %v18565_v26  ;;  %v3252_v4 = vpop.xlane.xlu1 %3251  ;;  %v3328_v46 = vmul.f32 %v15088_v1, %v16302_v24  ;;  %v18566_v24 = vld [vmem:[#allocation6_spill] sm:$0xff]  ;;  %v18578_v1 = vld [vmem:[#allocation17_spill] sm:$0xff] }
 0x3c8   :  { %15101 = vrcp.f32 %v3255_v43  ;;  %14446 = vmatmul.mubr.msk.f32.vlgmr.msra.gmra.mxu0 %vm3352_vm5, %v3326_v28  ;;  %14471 = vmatmul.mubr.msk.f32.vlgmr.msra.gmra.mxu1 %vm3352_vm5, %v3331_v3 }
 0x3c9   :  { %v15090_v42 = vpop.eup %15089  ;;  %14454 = vmatpush3.msk.msra.mxu0 %vm3356_vm3, %v16139_v23  ;;  %14479 = vmatpush3.msk.msra.mxu1 %vm3356_vm3, %v16165_v62  ;;  %15103 = vrcp.f32 %v3246_v54 }
 0x3ca   :  { %14480 = vmatprep.mubr.msk.f32.mxu1 %vm15353_vm1, %v18565_v26  ;;  %14488 = vmatprep.subr.mxu1 %v18565_v26  ;;  %v3333_v0 = vmul.f32 %v15090_v42, %v16330_v7  ;;  %v15092_v30 = vpop.eup %15091 }
 0x3cb   :  { %v3261_v44 = vpop.xlane.xlu0 %3260  ;;  %14455 = vmatprep.mubr.msk.f32.mxu0 %vm15353_vm1, %v18565_v26  ;;  %14463 = vmatprep.subr.mxu0 %v18565_v26  ;;  %v3258_v23 = vpop.xlane.xlu1 %3257  ;;  %v3330_v7 = vmul.f32 %v15092_v30, %v16314_v56  ;;  %v18568_v56 = vld [vmem:[#allocation13_spill] sm:$0xff] }
 0x3cc   :  { %15105 = vrcp.f32 %v3261_v44  ;;  %14456 = vmatmul.mubr.msk.f32.vlgmr.msra.gmra.mxu0 %vm3352_vm5, %v3328_v46  ;;  %14481 = vmatmul.mubr.msk.f32.vlgmr.msra.gmra.mxu1 %vm3352_vm5, %v3333_v0 }
 0x3cd   :  { %v15094_v62 = vpop.eup %15093  ;;  %14464 = vmatpush3.msk.msra.mxu0 %vm3356_vm3, %v16155_v49  ;;  %14489 = vmatpush3.msk.msra.mxu1 %vm3356_vm3, %v18566_v24  ;;  %15107 = vrcp.f32 %v3252_v4 }
 0x3ce   :  { %14490 = vmatprep.mubr.msk.f32.mxu1 %vm15353_vm1, %v18565_v26  ;;  %14498 = vmatprep.subr.mxu1 %v18565_v26  ;;  %v3335_v27 = vmul.f32 %v15094_v62, %v16340_v35  ;;  %v15096_v50 = vpop.eup %15095 }
 0x3cf   :  { %v3267_v63 = vpop.xlane.xlu0 %3266  ;;  %14465 = vmatprep.mubr.msk.f32.mxu0 %vm15353_vm1, %v18565_v26  ;;  %14473 = vmatprep.subr.mxu0 %v18565_v26  ;;  %v3264_v49 = vpop.xlane.xlu1 %3263  ;;  %v3332_v35 = vmul.f32 %v15096_v50, %v16324_v38  ;;  %v18570_v38 = vld [vmem:[#allocation14_spill] sm:$0xff] }
 0x3d0   :  { %15109 = vrcp.f32 %v3267_v63  ;;  %14466 = vmatmul.mubr.msk.f32.vlgmr.msra.gmra.mxu0 %vm3352_vm5, %v3330_v7  ;;  %14491 = vmatmul.mubr.msk.f32.vlgmr.msra.gmra.mxu1 %vm3352_vm5, %v3335_v27 }
 0x3d1   :  { %v15098_v2 = vpop.eup %15097  ;;  %14474 = vmatpush3.msk.msra.mxu0 %vm3356_vm3, %v18567_v17  ;;  %14499 = vmatpush3.msk.msra.mxu1 %vm3356_vm3, %v18568_v56  ;;  %15111 = vrcp.f32 %v3258_v23 }
 0x3d2   :  { %14500 = vmatprep.mubr.msk.f32.mxu1 %vm15353_vm1, %v18565_v26  ;;  %14508 = vmatprep.subr.mxu1 %v18565_v26  ;;  %v3337_v20 = vmul.f32 %v15098_v2, %v16349_v58  ;;  %v15100_v16 = vpop.eup %15099 }
 0x3d3   :  { %14475 = vmatprep.mubr.msk.f32.mxu0 %vm15353_vm1, %v18565_v26  ;;  %14483 = vmatprep.subr.mxu0 %v18565_v26  ;;  %v3270_v29 = vpop.xlane.xlu1 %3269  ;;  %v3334_v58 = vmul.f32 %v15100_v16, %v16334_v52 }
 0x3d4   :  { %v3273_v15 = vpop.xlane.xlu0 %3272  ;;  %14476 = vmatmul.mubr.msk.f32.vlgmr.msra.gmra.mxu0 %vm3352_vm5, %v3332_v35  ;;  %14501 = vmatmul.mubr.msk.f32.vlgmr.msra.gmra.mxu1 %vm3352_vm5, %v3337_v20 }
 0x3d5   :  { %v15102_v12 = vpop.eup %15101  ;;  %15113 = vrcp.f32 %v3273_v15  ;;  %14484 = vmatpush3.msk.msra.mxu0 %vm3356_vm3, %v18569_v14  ;;  %14509 = vmatpush3.msk.msra.mxu1 %vm3356_vm3, %v18570_v38 }
 0x3d6   :  { %15115 = vrcp.f32 %v3264_v49  ;;  %14510 = vmatprep.mubr.msk.f32.mxu1 %vm15353_vm1, %v18565_v26  ;;  %14518 = vmatprep.subr.mxu1 %v18565_v26  ;;  %v3339_v33 = vmul.f32 %v15102_v12, %v16358_v9  ;;  %v15104_v36 = vpop.eup %15103 }
 0x3d7   :  { %14485 = vmatprep.mubr.msk.f32.mxu0 %vm15353_vm1, %v18565_v26  ;;  %14493 = vmatprep.subr.mxu0 %v18565_v26  ;;  %v3336_v52 = vmul.f32 %v15104_v36, %v16346_v18  ;;  %v3276_v40 = vpop.xlane.xlu1 %3275 }
 0x3d8   :  { %v3279_v61 = vpop.xlane.xlu0 %3278  ;;  %14486 = vmatmul.mubr.msk.f32.vlgmr.msra.gmra.mxu0 %vm3352_vm5, %v3334_v58  ;;  %14511 = vmatmul.mubr.msk.f32.vlgmr.msra.gmra.mxu1 %vm3352_vm5, %v3339_v33 }
 0x3d9   :  { %v15106_v41 = vpop.eup %15105  ;;  %15117 = vrcp.f32 %v3279_v61  ;;  %14494 = vmatpush3.msk.msra.mxu0 %vm3356_vm3, %v18571_v37  ;;  %14519 = vmatpush3.msk.msra.mxu1 %vm3356_vm3, %v18572_v34 }
 0x3da   :  { %15119 = vrcp.f32 %v3270_v29  ;;  %14520 = vmatprep.mubr.msk.f32.mxu1 %vm15353_vm1, %v18565_v26  ;;  %14528 = vmatprep.subr.mxu1 %v18565_v26  ;;  %v3341_v9 = vmul.f32 %v15106_v41, %v16367_v48  ;;  %v15108_v5 = vpop.eup %15107 }
 0x3db   :  { %14495 = vmatprep.mubr.msk.f32.mxu0 %vm15353_vm1, %v18565_v26  ;;  %14503 = vmatprep.subr.mxu0 %v18565_v26  ;;  %15121 = vrcp.f32 %v3276_v40  ;;  %v3338_v18 = vmul.f32 %v15108_v5, %v16356_v10 }
 0x3dc   :  { %14496 = vmatmul.mubr.msk.f32.vlgmr.msra.gmra.mxu0 %vm3352_vm5, %v3336_v52  ;;  %14521 = vmatmul.mubr.msk.f32.vlgmr.msra.gmra.mxu1 %vm3352_vm5, %v3341_v9 }
 0x3dd   :  { %v15110_v55 = vpop.eup %15109  ;;  %14504 = vmatpush3.msk.msra.mxu0 %vm3356_vm3, %v18573_v32  ;;  %14529 = vmatpush3.msk.msra.mxu1 %vm3356_vm3, %v18574_v6 }
 0x3de   :  { %14530 = vmatprep.mubr.msk.f32.mxu1 %vm15353_vm1, %v18565_v26  ;;  %14538 = vmatprep.subr.mxu1 %v18565_v26  ;;  %v3343_v48 = vmul.f32 %v15110_v55, %v16376_v51  ;;  %v15112_v45 = vpop.eup %15111 }
 0x3df   :  { %14505 = vmatprep.mubr.msk.f32.mxu0 %vm15353_vm1, %v18565_v26  ;;  %14513 = vmatprep.subr.mxu0 %v18565_v26  ;;  %v3340_v10 = vmul.f32 %v15112_v45, %v16365_v25 }
 0x3e0   :  { %14506 = vmatmul.mubr.msk.f32.vlgmr.msra.gmra.mxu0 %vm3352_vm5, %v3338_v18  ;;  %14531 = vmatmul.mubr.msk.f32.vlgmr.msra.gmra.mxu1 %vm3352_vm5, %v3343_v48 }
 0x3e1   :  { %14514 = vmatpush3.msk.msra.mxu0 %vm3356_vm3, %v18575_v19  ;;  %14539 = vmatpush3.msk.msra.mxu1 %vm3356_vm3, %v18576_v47 }
 0x3e2   :  { %v15114_v21 = vpop.eup %15113  ;;  %14515 = vmatprep.mubr.msk.f32.mxu0 %vm15353_vm1, %v18565_v26  ;;  %14523 = vmatprep.subr.mxu0 %v18565_v26 }
 0x3e3   :  { %v15116_v51 = vpop.eup %15115  ;;  %14540 = vmatprep.mubr.msk.f32.mxu1 %vm15353_vm1, %v18565_v26  ;;  %14548 = vmatprep.subr.mxu1 %v18565_v26  ;;  %v3345_v54 = vmul.f32 %v15114_v21, %v16384_v13 }
 0x3e4   :  { %14516 = vmatmul.mubr.msk.f32.vlgmr.msra.gmra.mxu0 %vm3352_vm5, %v3340_v10  ;;  %v3342_v25 = vmul.f32 %v15116_v51, %v16374_v31 }
 0x3e5   :  { %14524 = vmatpush3.msk.msra.mxu0 %vm3356_vm3, %v18577_v53  ;;  %14541 = vmatmul.mubr.msk.f32.vlgmr.msra.gmra.mxu1 %vm3352_vm5, %v3345_v54 }
 0x3e6   :  { %v15118_v28 = vpop.eup %15117  ;;  %14549 = vmatpush3.msk.msra.mxu1 %vm3356_vm3, %v16448_v39  ;;  %14525 = vmatprep.mubr.msk.f32.mxu0 %vm15353_vm1, %v18565_v26  ;;  %v3285_v39 = vpop.xlane.xlu0 %3284 }
 0x3e7   :  { %v15120_v3 = vpop.eup %15119  ;;  %14533 = vmatprep.subr.mxu0 %v18565_v26  ;;  %14550 = vmatprep.mubr.msk.f32.mxu1 %vm15353_vm1, %v18565_v26  ;;  %v3347_v13 = vmul.f32 %v15118_v28, %v16392_v59  ;;  %15123 = vrcp.f32 %v3285_v39 }
 0x3e8   :  { %14526 = vmatmul.mubr.msk.f32.vlgmr.msra.gmra.mxu0 %vm3352_vm5, %v3342_v25  ;;  %14558 = vmatprep.subr.mxu1 %v18565_v26  ;;  %v3344_v31 = vmul.f32 %v15120_v3, %v16382_v8  ;;  %v15122_v43 = vpop.eup %15121 }
 0x3e9   :  { %14534 = vmatpush3.msk.msra.mxu0 %vm3356_vm3, %v18578_v1  ;;  %14551 = vmatmul.mubr.msk.f32.vlgmr.msra.gmra.mxu1 %vm3352_vm5, %v3347_v13  ;;  %v3346_v59 = vmul.f32 %v15122_v43, %v16388_v60 }
 0x3ea   :  { %14535 = vmatprep.mubr.msk.f32.mxu0 %vm15353_vm1, %v18565_v26  ;;  %14543 = vmatprep.subr.mxu0 %v18565_v26  ;;  %v5663_v4 = vpop.permute.xlu0 %5662 }
 0x3eb   :  { %14560 = vmatprep.mubr.msk.f32.mxu1 %vm15353_vm1, %v18565_v26 }
 0x3ec   :  { %14536 = vmatmul.mubr.msk.f32.vlgmr.msra.gmra.mxu0 %vm3352_vm5, %v3344_v31 }
 0x3ed   :  { %14544 = vmatpush3.msk.msra.mxu0 %vm3356_vm3, %v16404_v22  ;;  %14545 = vmatprep.mubr.msk.f32.mxu0 %vm15353_vm1, %v18565_v26 }
 0x3ee   :  { %14553 = vmatprep.subr.mxu0 %v18565_v26 }
 0x3f0   :  { %14546 = vmatmul.mubr.msk.f32.vlgmr.msra.gmra.mxu0 %vm3352_vm5, %v3346_v59 }
 0x3f1   :  { %14554 = vmatpush3.msk.msra.mxu0 %vm3356_vm3, %v5663_v4  ;;  %14555 = vmatprep.mubr.msk.f32.mxu0 %vm15353_vm1, %v18565_v26 }
 0x3f4   :  { %v15124_v42 = vpop.eup %15123 }
 0x3f5   :  { %v3349_v46 = vmul.f32 %v15124_v42, %v16398_v11 }
 0x40f   :  { %v3282_v8 = vpop.xlane.xlu1 %3281 }
 0x410   :  { %15125 = vrcp.f32 %v3282_v8 }
 0x413   :  { %v5740_v22 = vpop.permute.xlu1 %5739 }
 0x414   :  { %14559 = vmatpush3.msk.msra.mxu1 %vm3356_vm3, %v5740_v22 }
 0x415   :  { %14561 = vmatmul.mubr.msk.f32.vlgmr.msra.gmra.mxu1 %vm3352_vm5, %v3349_v46  ;;  %v67_v46 = vld [vmem:[%s18512_s3 + $0x18] sm:$0xff] }
 0x416   :  { %14563 = vmatprep.subr.mxu0 %v67_v46 }
 0x41d   :  { %v15126_v60 = vpop.eup %15125 }
 0x41e   :  { %v3348_v0 = vmul.f32 %v15126_v60, %v16415_v57 }
 0x420   :  { %14556 = vmatmul.mubr.msk.f32.vlgmr.msra.gmra.mxu0 %vm3352_vm5, %v3348_v0  ;;  %v66_v0 = vld [vmem:[%s18512_s3 + $0x10] sm:$0xff] }
 0x421   :  { %14564 = vmatpush3.msra.mxu0 %v67_v46 }
 0x422   :  { %14565 = vmatprep.subr.mxu0 %v66_v0 }
 0x423   :  { %14566 = vmatpush3.msra.mxu0 %v66_v0 }
 0x43f   :  { %v16625_v30 = vpop.f32.mrf.mxu0 }
 0x441   :  { %v14407_v44 = vpop.f32.mrf.mxu0 }
 0x445   :  { %v16627_v23 = vpop.f32.mrf.mxu1 }
 0x447   :  { %v14412_v62 = vpop.f32.mrf.mxu1 }
 0x448   :  { %v65_v62 = vld [vmem:[%s18512_s3 + $0x8] sm:$0xff] }
 0x449   :  { %v16629_v24 = vpop.f32.mrf.mxu1  ;;  %14567 = vmatprep.subr.mxu0 %v65_v62 }
 0x44a   :  { %14568 = vmatpush3.msra.mxu0 %v65_v62 }
 0x44b   :  { %v14422_v7 = vpop.f32.mrf.mxu1 }
 0x44c   :  { %v64_v7 = vld [vmem:[%s18512_s3] sm:$0xff] }
 0x44d   :  { %v16631_v27 = vpop.f32.mrf.mxu1  ;;  %14569 = vmatprep.subr.mxu0 %v64_v7 }
 0x44e   :  { %14570 = vmatpush3.msra.mxu0 %v64_v7 }
 0x44f   :  { %v14432_v11 = vpop.f32.mrf.mxu1 }
 0x451   :  { %v16633_v50 = vpop.f32.mrf.mxu1 }
 0x453   :  { %v14442_v63 = vpop.f32.mrf.mxu1 }
 0x47c   :  { %v16635_v49 = vpop.f32.mrf.mxu0 }
 0x47e   :  { %v14417_v57 = vpop.f32.mrf.mxu0 }
 0x480   :  { %v16637_v2 = vpop.f32.mrf.mxu0  ;;  %v4118_v17 = vpop.f32.mrf.mxu1 }
 0x481   :  { %5826 = vrot.lane.b32.xlu1 %v4118_v17, %s15357_s19 }
 0x482   :  { %v14427_v56 = vpop.f32.mrf.mxu0  ;;  %v14452_v35 = vpop.f32.mrf.mxu1 }
 0x484   :  { %v16640_v20 = vpop.f32.mrf.mxu0  ;;  %v4272_v16 = vpop.f32.mrf.mxu1 }
 0x485   :  { %5830 = vrot.lane.b32.xlu1 %v4272_v16, %s15357_s19 }
 0x486   :  { %v14437_v15 = vpop.f32.mrf.mxu0  ;;  %v14462_v12 = vpop.f32.mrf.mxu1 }
 0x488   :  { %v4041_v29 = vpop.f32.mrf.mxu0  ;;  %v4426_v14 = vpop.f32.mrf.mxu1 }
 0x489   :  { %5834 = vrot.lane.b32.xlu1 %v4426_v14, %s15357_s19  ;;  %5824 = vrot.lane.b32.xlu0 %v4041_v29, %s15357_s19 }
 0x48a   :  { %v14447_v38 = vpop.f32.mrf.mxu0  ;;  %v14472_v58 = vpop.f32.mrf.mxu1 }
 0x48c   :  { %v4195_v33 = vpop.f32.mrf.mxu0  ;;  %v4580_v36 = vpop.f32.mrf.mxu1 }
 0x48d   :  { %5838 = vrot.lane.b32.xlu1 %v4580_v36, %s15357_s19  ;;  %5828 = vrot.lane.b32.xlu0 %v4195_v33, %s15357_s19 }
 0x48e   :  { %v14457_v61 = vpop.f32.mrf.mxu0  ;;  %v14482_v41 = vpop.f32.mrf.mxu1 }
 0x490   :  { %v4349_v37 = vpop.f32.mrf.mxu0  ;;  %v4734_v34 = vpop.f32.mrf.mxu1 }
 0x491   :  { %5858 = vrot.lane.b32.xlu1 %v4734_v34, %s15358_s20  ;;  %5832 = vrot.lane.b32.xlu0 %v4349_v37, %s15357_s19 }
 0x492   :  { %v14467_v52 = vpop.f32.mrf.mxu0  ;;  %v14492_v9 = vpop.f32.mrf.mxu1 }
 0x494   :  { %v4503_v5 = vpop.f32.mrf.mxu0  ;;  %v4888_v40 = vpop.f32.mrf.mxu1 }
 0x495   :  { %5862 = vrot.lane.b32.xlu1 %v4888_v40, %s15358_s20  ;;  %5836 = vrot.lane.b32.xlu0 %v4503_v5, %s15357_s19 }
 0x496   :  { %v14477_v55 = vpop.f32.mrf.mxu0  ;;  %v14502_v32 = vpop.f32.mrf.mxu1 }
 0x498   :  { %v4657_v6 = vpop.f32.mrf.mxu0  ;;  %v5042_v18 = vpop.f32.mrf.mxu1 }
 0x499   :  { %5866 = vrot.lane.b32.xlu1 %v5042_v18, %s15358_s20  ;;  %5856 = vrot.lane.b32.xlu0 %v4657_v6, %s15358_s20 }
 0x49a   :  { %v14487_v48 = vpop.f32.mrf.mxu0  ;;  %v14512_v45 = vpop.f32.mrf.mxu1 }
 0x49c   :  { %v4811_v19 = vpop.f32.mrf.mxu0  ;;  %v5196_v47 = vpop.f32.mrf.mxu1 }
 0x49d   :  { %5870 = vrot.lane.b32.xlu1 %v5196_v47, %s15358_s20  ;;  %5860 = vrot.lane.b32.xlu0 %v4811_v19, %s15358_s20 }
 0x49e   :  { %v14497_v21 = vpop.f32.mrf.mxu0  ;;  %v14522_v10 = vpop.f32.mrf.mxu1 }
 0x4a0   :  { %v4965_v51 = vpop.f32.mrf.mxu0  ;;  %v5350_v54 = vpop.f32.mrf.mxu1 }
 0x4a1   :  { %5890 = vrot.lane.b32.xlu1 %v5350_v54, %s15359_s21  ;;  %5864 = vrot.lane.b32.xlu0 %v4965_v51, %s15358_s20  ;;  %v18579_v54 = vld [vmem:[#allocation5_spill] sm:$0xff] }
 0x4a2   :  { %v14507_v53 = vpop.f32.mrf.mxu0  ;;  %v14532_v28 = vpop.f32.mrf.mxu1 }
 0x4a4   :  { %v5119_v25 = vpop.f32.mrf.mxu0 }
 0x4a5   :  { %v5504_v3 = vpop.f32.mrf.mxu1  ;;  %5868 = vrot.lane.b32.xlu0 %v5119_v25, %s15358_s20 }
 0x4a6   :  { %5894 = vrot.lane.b32.xlu1 %v5504_v3, %s15359_s21  ;;  %v14517_v13 = vpop.f32.mrf.mxu0 }
 0x4a7   :  { %v14542_v1 = vpop.f32.mrf.mxu1 }
 0x4a8   :  { %v5273_v39 = vpop.f32.mrf.mxu0 }
 0x4a9   :  { %v5658_v31 = vpop.f32.mrf.mxu1  ;;  %5888 = vrot.lane.b32.xlu0 %v5273_v39, %s15359_s21 }
 0x4aa   :  { %5898 = vrot.lane.b32.xlu1 %v5658_v31, %s15359_s21  ;;  %v14527_v43 = vpop.f32.mrf.mxu0 }
 0x4ab   :  { %v14552_v59 = vpop.f32.mrf.mxu1 }
 0x4ac   :  { %v5427_v4 = vpop.f32.mrf.mxu0 }
 0x4ad   :  { %5892 = vrot.lane.b32.xlu0 %v5427_v4, %s15359_s21 }
 0x4ae   :  { %v14537_v8 = vpop.f32.mrf.mxu0 }
 0x4b0   :  { %v5581_v42 = vpop.f32.mrf.mxu0 }
 0x4b1   :  { %5896 = vrot.lane.b32.xlu0 %v5581_v42, %s15359_s21 }
 0x4b2   :  { %v14547_v22 = vpop.f32.mrf.mxu0 }
 0x4d5   :  { %v5812_v60 = vpop.f32.mrf.mxu1 }
 0x4d6   :  { %5902 = vrot.lane.b32.xlu1 %v5812_v60, %s15359_s21 }
 0x4d7   :  { %v14562_v44 = vpop.f32.mrf.mxu1 }
 0x4e0   :  { %v5735_v11 = vpop.f32.mrf.mxu0 }
 0x4e1   :  { %5900 = vrot.lane.b32.xlu0 %v5735_v11, %s15359_s21 }
 0x4e2   :  { %v14557_v63 = vpop.f32.mrf.mxu0 }
 0x4f3   :  { %v5827_v57 = vpop.permute.xlu1 %5826 }
 0x4f4   :  { %v5913_v40 = vsel %vm317_vm2, %v16627_v23, %v5827_v57 }
 0x4f7   :  { %v5831_v17 = vpop.permute.xlu1 %5830 }
 0x4f8   :  { %v5915_v18 = vsel %vm317_vm2, %v16629_v24, %v5831_v17 }
 0x4fb   :  { %v5825_v56 = vpop.permute.xlu0 %5824  ;;  %v5835_v35 = vpop.permute.xlu1 %5834 }
 0x4fc   :  { %v5912_v52 = vsel %vm317_vm2, %v16625_v30, %v5825_v56  ;;  %v5917_v1 = vsel %vm317_vm2, %v16631_v27, %v5835_v35 }
 0x4ff   :  { %v5829_v16 = vpop.permute.xlu0 %5828  ;;  %v5839_v15 = vpop.permute.xlu1 %5838 }
 0x500   :  { %v5914_v48 = vsel %vm317_vm2, %v16635_v49, %v5829_v16  ;;  %v5919_v59 = vsel %vm317_vm2, %v16633_v50, %v5839_v15 }
 0x503   :  { %v5833_v12 = vpop.permute.xlu0 %5832  ;;  %v5859_v29 = vpop.permute.xlu1 %5858 }
 0x504   :  { %v5922_v32 = vsel %vm5920_vm6, %v5913_v40, %v5859_v29  ;;  %v5916_v3 = vsel %vm317_vm2, %v16637_v2, %v5833_v12  ;;  %v15322_v40 = vld [vmem:[%s18509_s0 + $0xa] sm:$0x3] }
 0x507   :  { %v5837_v14 = vpop.permute.xlu0 %5836  ;;  %v5863_v38 = vpop.permute.xlu1 %5862 }
 0x508   :  { %v5924_v45 = vsel %vm5920_vm6, %v5915_v18, %v5863_v38  ;;  %v5918_v4 = vsel %vm317_vm2, %v16640_v20, %v5837_v14  ;;  %v13728_v20 = vld [vmem:[%s18513_s4] ss:$0 sm:$0xff]  ;;  %v15319_v38 = vld [vmem:[%s18509_s0 + $0x8] sm:$0x3] }
 0x509   :  { %v5985_v7 = vcombine.low %v13728_v20, %v13728_v20 }
 0x50b   :  { %v5857_v58 = vpop.permute.xlu0 %5856  ;;  %v5867_v33 = vpop.permute.xlu1 %5866  ;;  %v5992_v11 = vrot.slane %v5985_v7, %v18579_v54 }
 0x50c   :  { %v5921_v9 = vsel %vm5920_vm6, %v5912_v52, %v5857_v58  ;;  %v5926_v31 = vsel %vm5920_vm6, %v5917_v1, %v5867_v33 }
 0x50d   :  { %v5993_v63 = vcombine.low %v5992_v11, %v5992_v11 }
 0x50f   :  { %v5861_v36 = vpop.permute.xlu0 %5860  ;;  %v5871_v61 = vpop.permute.xlu1 %5870 }
 0x510   :  { %v5923_v19 = vsel %vm5920_vm6, %v5914_v48, %v5861_v36  ;;  %v5928_v2 = vsel %vm5920_vm6, %v5919_v59, %v5871_v61  ;;  %v15320_v36 = vld [vmem:[%s18509_s0] sm:$0x3] }
 0x513   :  { %v5865_v41 = vpop.permute.xlu0 %5864  ;;  %v5891_v37 = vpop.permute.xlu1 %5890 }
 0x514   :  { %v5931_v30 = vsel %vm5929_vm7, %v5922_v32, %v5891_v37  ;;  %v5925_v13 = vsel %vm5920_vm6, %v5916_v3, %v5865_v41 }
 0x517   :  { %v5869_v34 = vpop.permute.xlu0 %5868 }
 0x518   :  { %v5895_v6 = vpop.permute.xlu1 %5894  ;;  %v5927_v42 = vsel %vm5920_vm6, %v5918_v4, %v5869_v34 }
 0x519   :  { %v5933_v23 = vsel %vm5929_vm7, %v5924_v45, %v5895_v6  ;;  %v15323_v6 = vld [vmem:[%s18509_s0 + $0xc] sm:$0x3] }
 0x51b   :  { %v5889_v5 = vpop.permute.xlu0 %5888 }
 0x51c   :  { %v5930_v55 = vsel %vm5929_vm7, %v5921_v9, %v5889_v5  ;;  %v5899_v49 = vpop.permute.xlu1 %5898  ;;  %v15321_v9 = vld [vmem:[%s18509_s0 + $0x2] sm:$0x3] }
 0x51d   :  { %v5951_v47 = vcombine.low %v5930_v55, %v5931_v30  ;;  %v5935_v8 = vsel %vm5929_vm7, %v5926_v31, %v5899_v49  ;;  %v15324_v30 = vld [vmem:[%s18509_s0 + $0x4] sm:$0x3] }
 0x51f   :  { %v5893_v21 = vpop.permute.xlu0 %5892  ;;  %v5959_v53 = vrot.slane %v5951_v47, %v18579_v54 }
 0x520   :  { %v5932_v10 = vsel %vm5929_vm7, %v5923_v19, %v5893_v21 }
 0x521   :  { %v5952_v51 = vcombine.low %v5932_v10, %v5933_v23  ;;  %v15325_v23 = vld [vmem:[%s18509_s0 + $0x6] sm:$0x3] }
 0x523   :  { %v5966_v24 = vrot.slane %v5952_v51, %v18579_v54  ;;  %v5897_v25 = vpop.permute.xlu0 %5896 }
 0x524   :  { %v5934_v39 = vsel %vm5929_vm7, %v5925_v13, %v5897_v25 }
 0x525   :  { %v5967_v28 = vcombine.low %v5959_v53, %v5966_v24  ;;  %v5968_v22 = vcombine.low %v5934_v39, %v5935_v8  ;;  %v15326_v24 = vld [vmem:[%s18509_s0 + $0xe] sm:$0x3] }
 0x527   :  { %14571 = vmatprep.mubr.msk.f32.mxu0 %vm144_vm0, %v5967_v28  ;;  %v5976_v44 = vrot.slane %v5968_v22, %v18579_v54 }
 0x548   :  { %v5903_v43 = vpop.permute.xlu1 %5902 }
 0x549   :  { %v5937_v27 = vsel %vm5929_vm7, %v5928_v2, %v5903_v43 }
 0x553   :  { %v5901_v46 = vpop.permute.xlu0 %5900 }
 0x554   :  { %v5936_v60 = vsel %vm5929_vm7, %v5927_v42, %v5901_v46 }
 0x555   :  { %v5969_v0 = vcombine.low %v5936_v60, %v5937_v27 }
 0x557   :  { %v5983_v50 = vrot.slane %v5969_v0, %v18579_v54 }
 0x559   :  { %v5984_v62 = vcombine.low %v5976_v44, %v5983_v50 }
 0x55b   :  { %14572 = vmatmul.mubr.msk.f32.vlgmr.msra.gmra.mxu0 %vm144_vm0, %v5984_v62 }
 0x61b   :  { %v14573_v57 = vpop.f32.mrf.mxu0 }
 0x61c   :  { %v6071_v17 = vadd.f32 %v14573_v57, %v5993_v63 }
 0x61d   :  { %v6065_v56 = vpop.f32.mrf.mxu0 }
 0x61e   :  { %v6100_v35 = vrot.slane %v6071_v17, %v18579_v54  ;;  %v6066_v16 = vadd.f32 %v6065_v56, %v5993_v63  ;;  %v6093_v15 = vcombine.high %v6071_v17, %v6071_v17 }
 0x620   :  { %v6108_v12 = vcombine.high %v6100_v35, %v6100_v35  ;;  %v6076_v29 = vcombine.high %v6066_v16, %v6066_v16  ;;  %v6083_v14 = vrot.slane %v6066_v16, %v18579_v54  ;;  %v6122_v58 = vadd.f32 %v15319_v38, %v6100_v35 }
 0x621   :  { %v6107_v41 = vrot.slane %v6093_v15, %v18579_v54 }
 0x622   :  { %v6091_v33 = vcombine.high %v6083_v14, %v6083_v14  ;;  %v6118_v61 = vadd.f32 %v15320_v36, %v6083_v14  ;;  %v6139_v37 = vsel %vm6126_vm8, %v6122_v58, 0.0  ;;  %v6090_v34 = vrot.slane %v6076_v29, %v18579_v54 }
 0x623   :  { %6140 = vadd.xlane.f32.xlu1 %v6139_v37  ;;  %v6123_v55 = vadd.f32 %v15322_v40, %v6108_v12  ;;  %v6124_v18 = vadd.f32 %v15323_v6, %v6107_v41  ;;  %v6109_v51 = vcombine.high %v6107_v41, %v6107_v41 }
 0x624   :  { %v6127_v52 = vsel %vm6126_vm8, %v6118_v61, 0.0  ;;  %v6119_v5 = vadd.f32 %v15321_v9, %v6091_v33  ;;  %v6120_v45 = vadd.f32 %v15324_v30, %v6090_v34  ;;  %v6092_v19 = vcombine.high %v6090_v34, %v6090_v34  ;;  %v72_v34 = vld [vmem:[%s18514_s5 + $0x18] sm:$0xff]  ;;  %v70_v9 = vld [vmem:[%s18514_s5 + $0x8] sm:$0xff] }
 0x625   :  { %6128 = vadd.xlane.f32.xlu0 %v6127_v52  ;;  %v6142_v48 = vsel %vm6126_vm8, %v6123_v55, 0.0  ;;  %v6145_v47 = vsel %vm6126_vm8, %v6124_v18, 0.0  ;;  %v6125_v28 = vadd.f32 %v15326_v24, %v6109_v51  ;;  %v71_v52 = vld [vmem:[%s18514_s5 + $0x10] sm:$0xff]  ;;  %14574 = vmatprep.subr.mxu1 %v72_v34 }
 0x626   :  { %v6130_v32 = vsel %vm6126_vm8, %v6119_v5, 0.0  ;;  %v6133_v21 = vsel %vm6126_vm8, %v6120_v45, 0.0  ;;  %v6121_v10 = vadd.f32 %v15325_v23, %v6092_v19  ;;  %14575 = vmatpush3.msra.mxu1 %v72_v34 }
 0x627   :  { %6131 = vadd.xlane.f32.xlu1 %v6130_v32  ;;  %v6148_v49 = vsel %vm6126_vm8, %v6125_v28, 0.0  ;;  %14576 = vmatprep.subr.mxu1 %v71_v52 }
 0x628   :  { %v6136_v53 = vsel %vm6126_vm8, %v6121_v10, 0.0  ;;  %14577 = vmatpush3.msra.mxu1 %v71_v52 }
 0x629   :  { %6143 = vadd.xlane.f32.xlu0 %v6142_v48  ;;  %14578 = vmatprep.subr.mxu1 %v70_v9 }
 0x62a   :  { %14579 = vmatpush3.msra.mxu1 %v70_v9 }
 0x62b   :  { %6146 = vadd.xlane.f32.xlu1 %v6145_v47 }
 0x62d   :  { %6134 = vadd.xlane.f32.xlu0 %v6133_v21 }
 0x631   :  { %6137 = vadd.xlane.f32.xlu0 %v6136_v53 }
 0x635   :  { %6149 = vadd.xlane.f32.xlu0 %v6148_v49 }
 0x6ac   :  { %v6141_v25 = vpop.xlane.xlu1 %6140 }
 0x6ad   :  { %v6156_v3 = vmul.f32 0.03125, %v6141_v25 }
 0x6ae   :  { %v6129_v13 = vpop.xlane.xlu0 %6128 }
 0x6af   :  { %v6152_v1 = vmul.f32 0.03125, %v6129_v13  ;;  %v16755_v39 = vsub.f32 %v6122_v58, %v6156_v3 }
 0x6b0   :  { %v6132_v43 = vpop.xlane.xlu1 %6131 }
 0x6b1   :  { %v16757_v31 = vsub.f32 %v6118_v61, %v6152_v1  ;;  %v6153_v59 = vmul.f32 0.03125, %v6132_v43  ;;  %v6172_v8 = vmul.f32 %v16755_v39, %v16755_v39 }
 0x6b2   :  { %v6144_v4 = vpop.xlane.xlu0 %6143 }
 0x6b3   :  { %v6157_v2 = vmul.f32 0.03125, %v6144_v4  ;;  %v6188_v42 = vsel %vm6126_vm8, %v6172_v8, 0.0  ;;  %v6168_v22 = vmul.f32 %v16757_v31, %v16757_v31  ;;  %v16764_v46 = vsub.f32 %v6119_v5, %v6153_v59  ;;  %v69_v5 = vld [vmem:[%s18514_s5] sm:$0xff] }
 0x6b4   :  { %6189 = vadd.xlane.f32.xlu1 %v6188_v42  ;;  %v6147_v60 = vpop.xlane.xlu1 %6146  ;;  %14580 = vmatprep.subr.mxu1 %v69_v5 }
 0x6b5   :  { %v16766_v27 = vsub.f32 %v6123_v55, %v6157_v2  ;;  %v6158_v0 = vmul.f32 0.03125, %v6147_v60  ;;  %v6176_v20 = vsel %vm6126_vm8, %v6168_v22, 0.0  ;;  %v6169_v57 = vmul.f32 %v16764_v46, %v16764_v46  ;;  %14581 = vmatpush3.msra.mxu1 %v69_v5 }
 0x6b6   :  { %v6135_v44 = vpop.xlane.xlu0 %6134 }
 0x6b7   :  { %v6154_v50 = vmul.f32 0.03125, %v6135_v44  ;;  %v6173_v62 = vmul.f32 %v16766_v27, %v16766_v27  ;;  %v16771_v7 = vsub.f32 %v6124_v18, %v6158_v0  ;;  %v6179_v12 = vsel %vm6126_vm8, %v6169_v57, 0.0 }
 0x6b8   :  { %6177 = vadd.xlane.f32.xlu1 %v6176_v20 }
 0x6b9   :  { %v16773_v11 = vsub.f32 %v6120_v45, %v6154_v50  ;;  %v6191_v63 = vsel %vm6126_vm8, %v6173_v62, 0.0  ;;  %v6174_v29 = vmul.f32 %v16771_v7, %v16771_v7  ;;  %v13731_v62 = vld [vmem:[%s18518_s9] ss:$0 sm:$0xff] }
 0x6ba   :  { %6192 = vadd.xlane.f32.xlu0 %v6191_v63  ;;  %v6138_v17 = vpop.xlane.xlu0 %6137 }
 0x6bb   :  { %v6155_v56 = vmul.f32 0.03125, %v6138_v17  ;;  %v6170_v35 = vmul.f32 %v16773_v11, %v16773_v11  ;;  %v6194_v36 = vsel %vm6126_vm8, %v6174_v29, 0.0 }
 0x6bd   :  { %v16780_v16 = vsub.f32 %v6121_v10, %v6155_v56  ;;  %v6182_v15 = vsel %vm6126_vm8, %v6170_v35, 0.0 }
 0x6be   :  { %6183 = vadd.xlane.f32.xlu1 %v6182_v15  ;;  %6180 = vadd.xlane.f32.xlu0 %v6179_v12  ;;  %v6150_v14 = vpop.xlane.xlu0 %6149 }
 0x6bf   :  { %v6159_v38 = vmul.f32 0.03125, %v6150_v14  ;;  %v6171_v58 = vmul.f32 %v16780_v16, %v16780_v16 }
 0x6c1   :  { %v16788_v33 = vsub.f32 %v6125_v28, %v6159_v38  ;;  %v6185_v61 = vsel %vm6126_vm8, %v6171_v58, 0.0 }
 0x6c2   :  { %6195 = vadd.xlane.f32.xlu1 %v6194_v36  ;;  %6186 = vadd.xlane.f32.xlu0 %v6185_v61 }
 0x6c3   :  { %v6175_v41 = vmul.f32 %v16788_v33, %v16788_v33 }
 0x6c5   :  { %v6197_v37 = vsel %vm6126_vm8, %v6175_v41, 0.0 }
 0x6c6   :  { %6198 = vadd.xlane.f32.xlu0 %v6197_v37 }
 0x73d   :  { %v6190_v40 = vpop.xlane.xlu1 %6189 }
 0x73e   :  { %v6204_v32 = vmul.f32 0.03125, %v6190_v40 }
 0x740   :  { %v6212_v19 = vadd.f32 1e-05, %v6204_v32 }
 0x741   :  { %v6178_v55 = vpop.xlane.xlu1 %6177 }
 0x742   :  { %v6200_v6 = vmul.f32 0.03125, %v6178_v55 }
 0x743   :  { %v6193_v18 = vpop.xlane.xlu0 %6192 }
 0x744   :  { %v6205_v48 = vmul.f32 0.03125, %v6193_v18  ;;  %v6208_v30 = vadd.f32 1e-05, %v6200_v6 }
 0x746   :  { %v6213_v45 = vadd.f32 1e-05, %v6205_v48  ;;  %15127 = vrsqrt.f32 %v6208_v30  ;;  %v81_v30 = vld [vmem:[%s18516_s7 + $0x38] sm:$0xff] }
 0x747   :  { %v6184_v47 = vpop.xlane.xlu1 %6183  ;;  %v6181_v21 = vpop.xlane.xlu0 %6180  ;;  %14585 = vmatprep.subr.mxu0 %v81_v30 }
 0x748   :  { %v6202_v23 = vmul.f32 0.03125, %v6184_v47  ;;  %v6201_v10 = vmul.f32 0.03125, %v6181_v21  ;;  %15129 = vrsqrt.f32 %v6213_v45  ;;  %14586 = vmatpush3.msra.mxu0 %v81_v30  ;;  %v80_v45 = vld [vmem:[%s18516_s7 + $0x30] sm:$0xff]  ;;  %v78_v47 = vld [vmem:[%s18516_s7 + $0x20] sm:$0xff]  ;;  %v77_v21 = vld [vmem:[%s18516_s7 + $0x18] sm:$0xff] }
 0x749   :  { %15131 = vrsqrt.f32 %v6212_v19  ;;  %14587 = vmatprep.subr.mxu0 %v80_v45  ;;  %v79_v19 = vld [vmem:[%s18516_s7 + $0x28] sm:$0xff] }
 0x74a   :  { %v6210_v51 = vadd.f32 1e-05, %v6202_v23  ;;  %v6209_v53 = vadd.f32 1e-05, %v6201_v10  ;;  %14588 = vmatpush3.msra.mxu0 %v80_v45  ;;  %v76_v23 = vld [vmem:[%s18516_s7 + $0x10] sm:$0xff]  ;;  %v75_v10 = vld [vmem:[%s18516_s7 + $0x8] sm:$0xff] }
 0x74b   :  { %v6196_v24 = vpop.xlane.xlu1 %6195  ;;  %v6187_v28 = vpop.xlane.xlu0 %6186  ;;  %14589 = vmatprep.subr.mxu0 %v79_v19 }
 0x74c   :  { %15133 = vrsqrt.f32 %v6210_v51  ;;  %v6206_v49 = vmul.f32 0.03125, %v6196_v24  ;;  %v6203_v25 = vmul.f32 0.03125, %v6187_v28  ;;  %14590 = vmatpush3.msra.mxu0 %v79_v19  ;;  %v74_v51 = vld [vmem:[%s18516_s7] sm:$0xff] }
 0x74d   :  { %15135 = vrsqrt.f32 %v6209_v53  ;;  %14591 = vmatprep.subr.mxu0 %v78_v47  ;;  %v13733_v53 = vld [vmem:[%s18515_s6] ss:$0 sm:$0xff] }
 0x74e   :  { %v6214_v3 = vadd.f32 1e-05, %v6206_v49  ;;  %v6211_v13 = vadd.f32 1e-05, %v6203_v25  ;;  %14592 = vmatpush3.msra.mxu0 %v78_v47  ;;  %v6307_v24 = vcombine.low %v13733_v53, %v13733_v53 }
 0x74f   :  { %v6199_v1 = vpop.xlane.xlu0 %6198  ;;  %14593 = vmatprep.subr.mxu0 %v77_v21 }
 0x750   :  { %15137 = vrsqrt.f32 %v6214_v3  ;;  %v6207_v43 = vmul.f32 0.03125, %v6199_v1  ;;  %14594 = vmatpush3.msra.mxu0 %v77_v21  ;;  %v6314_v28 = vrot.slane %v6307_v24, %v18579_v54 }
 0x751   :  { %15139 = vrsqrt.f32 %v6211_v13  ;;  %14595 = vmatprep.subr.mxu0 %v76_v23 }
 0x752   :  { %v6215_v59 = vadd.f32 1e-05, %v6207_v43  ;;  %14596 = vmatpush3.msra.mxu0 %v76_v23  ;;  %v6315_v49 = vcombine.low %v6314_v28, %v6314_v28 }
 0x753   :  { %v15128_v4 = vpop.eup %15127  ;;  %14597 = vmatprep.subr.mxu0 %v75_v10 }
 0x754   :  { %15141 = vrsqrt.f32 %v6215_v59  ;;  %v6224_v22 = vmul.f32 %v15128_v4, %v16757_v31  ;;  %14598 = vmatpush3.msra.mxu0 %v75_v10 }
 0x755   :  { %v15130_v8 = vpop.eup %15129  ;;  %14599 = vmatprep.subr.mxu0 %v74_v51 }
 0x756   :  { %v15132_v2 = vpop.eup %15131  ;;  %v6229_v0 = vmul.f32 %v15130_v8, %v16766_v27  ;;  %v6238_v57 = vmul.f32 %v13731_v62, %v6224_v22  ;;  %v13732_v27 = vld [vmem:[%s18519_s10] ss:$0 sm:$0xff]  ;;  %14600 = vmatpush3.msra.mxu0 %v74_v51 }
 0x757   :  { %v6228_v20 = vmul.f32 %v15132_v2, %v16755_v39  ;;  %14625 = vmatprep.subr.mxu0 %v18565_v26 }
 0x758   :  { %v6243_v35 = vmul.f32 %v13731_v62, %v6229_v0  ;;  %v16822_v39 = vadd.f32 %v13732_v27, %v6238_v57 }
 0x759   :  { %v15134_v42 = vpop.eup %15133  ;;  %v6242_v12 = vmul.f32 %v13731_v62, %v6228_v20 }
 0x75a   :  { %v15136_v60 = vpop.eup %15135  ;;  %v6226_v44 = vmul.f32 %v15134_v42, %v16773_v11  ;;  %v16825_v36 = vadd.f32 %v13732_v27, %v6243_v35 }
 0x75b   :  { %v6225_v50 = vmul.f32 %v15136_v60, %v16764_v46  ;;  %v16833_v37 = vadd.f32 %v13732_v27, %v6242_v12 }
 0x75c   :  { %v6240_v46 = vmul.f32 %v13731_v62, %v6226_v44 }
 0x75d   :  { %v15138_v63 = vpop.eup %15137  ;;  %v6239_v17 = vmul.f32 %v13731_v62, %v6225_v50 }
 0x75e   :  { %v15140_v56 = vpop.eup %15139  ;;  %v6230_v31 = vmul.f32 %v15138_v63, %v16771_v7  ;;  %v16827_v7 = vadd.f32 %v13732_v27, %v6240_v46 }
 0x75f   :  { %v6227_v11 = vmul.f32 %v15140_v56, %v16780_v16  ;;  %v16820_v15 = vadd.f32 %v13732_v27, %v6239_v17 }
 0x760   :  { %v6244_v38 = vmul.f32 %v13731_v62, %v6230_v31 }
 0x761   :  { %v15142_v29 = vpop.eup %15141  ;;  %v6241_v14 = vmul.f32 %v13731_v62, %v6227_v11  ;;  %v6273_v16 = vcombine.low %v16822_v39, %v16820_v15 }
 0x762   :  { %v6231_v58 = vmul.f32 %v15142_v29, %v16788_v33  ;;  %v16837_v52 = vadd.f32 %v13732_v27, %v6244_v38  ;;  %v6290_v33 = vcombine.low %v16833_v37, %v16825_v36 }
 0x763   :  { %v16829_v61 = vadd.f32 %v13732_v27, %v6241_v14  ;;  %v6281_v5 = vrot.slane %v6273_v16, %v18579_v54 }
 0x764   :  { %v6245_v41 = vmul.f32 %v13731_v62, %v6231_v58  ;;  %v6298_v6 = vrot.slane %v6290_v33, %v18579_v54 }
 0x765   :  { %v6274_v34 = vcombine.low %v16827_v7, %v16829_v61 }
 0x766   :  { %v16839_v9 = vadd.f32 %v13732_v27, %v6245_v41  ;;  %v13736_v41 = vld [vmem:[%s18517_s8] ss:$0 sm:$0xff] }
 0x767   :  { %v6288_v40 = vrot.slane %v6274_v34, %v18579_v54  ;;  %v6495_v34 = vcombine.low %v13736_v41, %v13736_v41 }
 0x768   :  { %v6291_v55 = vcombine.low %v16837_v52, %v16839_v9 }
 0x769   :  { %v6289_v32 = vcombine.low %v6281_v5, %v6288_v40  ;;  %v6502_v33 = vrot.slane %v6495_v34, %v18579_v54 }
 0x76a   :  { %v6305_v18 = vrot.slane %v6291_v55, %v18579_v54 }
 0x76b   :  { %14582 = vmatprep.mubr.msk.f32.mxu1 %vm144_vm0, %v6289_v32  ;;  %v6503_v5 = vcombine.low %v6502_v33, %v6502_v33 }
 0x76c   :  { %v6306_v48 = vcombine.low %v6298_v6, %v6305_v18 }
 0x76e   :  { %14583 = vmatmul.mubr.msk.f32.vlgmr.msra.gmra.mxu1 %vm144_vm0, %v6306_v48 }
 0x82e   :  { %v14584_v25 = vpop.f32.mrf.mxu1 }
 0x82f   :  { %v6393_v3 = vadd.f32 %v14584_v25, %v6315_v49 }
 0x830   :  { %v6387_v13 = vpop.f32.mrf.mxu1 }
 0x831   :  { %v6415_v1 = vcombine.high %v6393_v3, %v6393_v3  ;;  %v6422_v43 = vrot.slane %v6393_v3, %v18579_v54  ;;  %v6388_v59 = vadd.f32 %v6387_v13, %v6315_v49 }
 0x833   :  { %v6429_v4 = vrot.slane %v6415_v1, %v18579_v54  ;;  %v6430_v8 = vcombine.high %v6422_v43, %v6422_v43  ;;  %v6398_v2 = vcombine.high %v6388_v59, %v6388_v59  ;;  %v6405_v42 = vrot.slane %v6388_v59, %v18579_v54 }
 0x834   :  { %v6444_v63 = vmax.f32 %v6422_v43, 0.0 }
 0x835   :  { %v6431_v22 = vcombine.high %v6429_v4, %v6429_v4  ;;  %v6412_v60 = vrot.slane %v6398_v2, %v18579_v54  ;;  %v6445_v0 = vmax.f32 %v6430_v8, 0.0  ;;  %v6413_v44 = vcombine.high %v6405_v42, %v6405_v42 }
 0x836   :  { %v6446_v50 = vmax.f32 %v6429_v4, 0.0  ;;  %v6440_v57 = vmax.f32 %v6405_v42, 0.0 }
 0x837   :  { %v6447_v62 = vmax.f32 %v6431_v22, 0.0  ;;  %v6414_v20 = vcombine.high %v6412_v60, %v6412_v60  ;;  %v6441_v17 = vmax.f32 %v6413_v44, 0.0  ;;  %v6442_v35 = vmax.f32 %v6412_v60, 0.0 }
 0x838   :  { %v6478_v27 = vcombine.low %v6444_v63, %v6445_v0 }
 0x839   :  { %v6479_v56 = vcombine.low %v6446_v50, %v6447_v62  ;;  %v6443_v31 = vmax.f32 %v6414_v20, 0.0  ;;  %v6461_v11 = vcombine.low %v6440_v57, %v6441_v17 }
 0x83a   :  { %v6486_v38 = vrot.slane %v6478_v27, %v18579_v54 }
 0x83b   :  { %v6462_v46 = vcombine.low %v6442_v35, %v6443_v31  ;;  %v6493_v12 = vrot.slane %v6479_v56, %v18579_v54  ;;  %v6469_v29 = vrot.slane %v6461_v11, %v18579_v54 }
 0x83d   :  { %v6476_v14 = vrot.slane %v6462_v46, %v18579_v54  ;;  %v6494_v16 = vcombine.low %v6486_v38, %v6493_v12 }
 0x83f   :  { %v6477_v58 = vcombine.low %v6469_v29, %v6476_v14 }
 0x841   :  { %14601 = vmatprep.mubr.msk.f32.mxu0 %vm6505_vm9, %v6477_v58 }
 0x842   :  { %14602 = vmatmul.mubr.msk.f32.vlgmr.msra.gmra.mxu0 %vm6505_vm9, %v6494_v16 }
 0x843   :  { %14627 = vmatprep.mubr.msk.f32.mxu0 %vm15353_vm1, %v18565_v26 }
 0x902   :  { %v14603_v40 = vpop.f32.mrf.mxu0 }
 0x903   :  { %v6582_v55 = vadd.f32 %v14603_v40, %v6503_v5 }
 0x904   :  { %v6576_v32 = vpop.f32.mrf.mxu0 }
 0x905   :  { %v6611_v6 = vrot.slane %v6582_v55, %v18579_v54  ;;  %v6577_v18 = vadd.f32 %v6576_v32, %v6503_v5  ;;  %v6604_v48 = vcombine.high %v6582_v55, %v6582_v55 }
 0x907   :  { %v6619_v30 = vcombine.high %v6611_v6, %v6611_v6  ;;  %v6587_v45 = vcombine.high %v6577_v18, %v6577_v18  ;;  %v6594_v19 = vrot.slane %v6577_v18, %v18579_v54  ;;  %v6633_v47 = vadd.f32 %v6611_v6, %v16833_v37 }
 0x908   :  { %v6618_v24 = vrot.slane %v6604_v48, %v18579_v54 }
 0x909   :  { %v6601_v21 = vrot.slane %v6587_v45, %v18579_v54  ;;  %v6602_v23 = vcombine.high %v6594_v19, %v6594_v19  ;;  %v6634_v10 = vadd.f32 %v6619_v30, %v16825_v36  ;;  %v6649_v51 = vsel %vm6126_vm8, %v6633_v47, 0.0 }
 0x90a   :  { %v6629_v53 = vadd.f32 %v6594_v19, %v16822_v39  ;;  %6650 = vadd.xlane.f32.xlu1 %v6649_v51  ;;  %v6620_v1 = vcombine.high %v6618_v24, %v6618_v24  ;;  %v6635_v43 = vadd.f32 %v6618_v24, %v16837_v52  ;;  %v13744_v19 = vld [vmem:[%s18510_s1 + $0x38] sm:$0xff] }
 0x90b   :  { %v6652_v28 = vsel %vm6126_vm8, %v6634_v10, 0.0  ;;  %v6630_v49 = vadd.f32 %v6602_v23, %v16820_v15  ;;  %v6603_v25 = vcombine.high %v6601_v21, %v6601_v21  ;;  %v6631_v3 = vadd.f32 %v6601_v21, %v16827_v7  ;;  %14604 = vmatprep.subr.mxu1 %v13744_v19  ;;  %v13742_v21 = vld [vmem:[%s18510_s1 + $0x28] sm:$0xff]  ;;  %v13741_v23 = vld [vmem:[%s18510_s1 + $0x20] sm:$0xff] }
 0x90c   :  { %6653 = vadd.xlane.f32.xlu0 %v6652_v28  ;;  %v6637_v37 = vsel %vm6126_vm8, %v6629_v53, 0.0  ;;  %v6636_v59 = vadd.f32 %v6620_v1, %v16839_v9  ;;  %v6655_v4 = vsel %vm6126_vm8, %v6635_v43, 0.0  ;;  %14605 = vmatpush3.msra.mxu1 %v13744_v19 }
 0x90d   :  { %v6640_v36 = vsel %vm6126_vm8, %v6630_v49, 0.0  ;;  %v6632_v13 = vadd.f32 %v6603_v25, %v16829_v61  ;;  %v6643_v39 = vsel %vm6126_vm8, %v6631_v3, 0.0 }
 0x90e   :  { %6638 = vadd.xlane.f32.xlu1 %v6637_v37  ;;  %v6658_v7 = vsel %vm6126_vm8, %v6636_v59, 0.0 }
 0x90f   :  { %v6646_v15 = vsel %vm6126_vm8, %v6632_v13, 0.0 }
 0x910   :  { %6641 = vadd.xlane.f32.xlu0 %v6640_v36 }
 0x912   :  { %6644 = vadd.xlane.f32.xlu1 %v6643_v39 }
 0x914   :  { %6647 = vadd.xlane.f32.xlu0 %v6646_v15 }
 0x916   :  { %6656 = vadd.xlane.f32.xlu1 %v6655_v4 }
 0x918   :  { %6659 = vadd.xlane.f32.xlu0 %v6658_v7 }
 0x993   :  { %v6651_v8 = vpop.xlane.xlu1 %6650 }
 0x994   :  { %v6665_v61 = vmul.f32 0.03125, %v6651_v8 }
 0x995   :  { %v6654_v2 = vpop.xlane.xlu0 %6653 }
 0x996   :  { %v6666_v42 = vmul.f32 0.03125, %v6654_v2  ;;  %v16916_v22 = vsub.f32 %v6633_v47, %v6665_v61  ;;  %v13743_v47 = vld [vmem:[%s18510_s1 + $0x30] sm:$0xff] }
 0x997   :  { %v6639_v52 = vpop.xlane.xlu1 %6638  ;;  %14606 = vmatprep.subr.mxu1 %v13743_v47 }
 0x998   :  { %v16918_v60 = vsub.f32 %v6634_v10, %v6666_v42  ;;  %v6661_v0 = vmul.f32 0.03125, %v6639_v52  ;;  %v6681_v9 = vmul.f32 %v16916_v22, %v16916_v22  ;;  %14607 = vmatpush3.msra.mxu1 %v13743_v47 }
 0x999   :  { %v6642_v44 = vpop.xlane.xlu0 %6641  ;;  %14608 = vmatprep.subr.mxu1 %v13742_v21 }
 0x99a   :  { %v6662_v50 = vmul.f32 0.03125, %v6642_v44  ;;  %v6682_v62 = vmul.f32 %v16918_v60, %v16918_v60  ;;  %v16924_v20 = vsub.f32 %v6629_v53, %v6661_v0  ;;  %v6697_v63 = vsel %vm6126_vm8, %v6681_v9, 0.0  ;;  %14609 = vmatpush3.msra.mxu1 %v13742_v21 }
 0x99b   :  { %6698 = vadd.xlane.f32.xlu1 %v6697_v63  ;;  %v6645_v17 = vpop.xlane.xlu1 %6644  ;;  %14610 = vmatprep.subr.mxu1 %v13741_v23 }
 0x99c   :  { %v16927_v57 = vsub.f32 %v6630_v49, %v6662_v50  ;;  %v6700_v56 = vsel %vm6126_vm8, %v6682_v62, 0.0  ;;  %v6663_v35 = vmul.f32 0.03125, %v6645_v17  ;;  %v6677_v27 = vmul.f32 %v16924_v20, %v16924_v20  ;;  %14611 = vmatpush3.msra.mxu1 %v13741_v23 }
 0x99d   :  { %6701 = vadd.xlane.f32.xlu0 %v6700_v56  ;;  %v6648_v31 = vpop.xlane.xlu0 %6647  ;;  %14615 = vmatprep.subr.mxu1 %v18565_v26 }
 0x99e   :  { %v6664_v11 = vmul.f32 0.03125, %v6648_v31  ;;  %v6678_v46 = vmul.f32 %v16927_v57, %v16927_v57  ;;  %v16934_v12 = vsub.f32 %v6631_v3, %v6663_v35  ;;  %v6685_v29 = vsel %vm6126_vm8, %v6677_v27, 0.0  ;;  %v13739_v35 = vld [vmem:[%s18520_s11] ss:$0 sm:$0xff] }
 0x99f   :  { %6686 = vadd.xlane.f32.xlu1 %v6685_v29  ;;  %v6657_v38 = vpop.xlane.xlu1 %6656 }
 0x9a0   :  { %v16937_v14 = vsub.f32 %v6632_v13, %v6664_v11  ;;  %v6688_v58 = vsel %vm6126_vm8, %v6678_v46, 0.0  ;;  %v6667_v16 = vmul.f32 0.03125, %v6657_v38  ;;  %v6679_v34 = vmul.f32 %v16934_v12, %v16934_v12 }
 0x9a1   :  { %6689 = vadd.xlane.f32.xlu0 %v6688_v58  ;;  %v6660_v41 = vpop.xlane.xlu0 %6659 }
 0x9a2   :  { %v6668_v33 = vmul.f32 0.03125, %v6660_v41  ;;  %v6680_v5 = vmul.f32 %v16937_v14, %v16937_v14  ;;  %v16944_v40 = vsub.f32 %v6635_v43, %v6667_v16  ;;  %v6691_v55 = vsel %vm6126_vm8, %v6679_v34, 0.0 }
 0x9a3   :  { %6692 = vadd.xlane.f32.xlu1 %v6691_v55 }
 0x9a4   :  { %v16947_v32 = vsub.f32 %v6636_v59, %v6668_v33  ;;  %v6694_v6 = vsel %vm6126_vm8, %v6680_v5, 0.0  ;;  %v6683_v18 = vmul.f32 %v16944_v40, %v16944_v40 }
 0x9a5   :  { %6695 = vadd.xlane.f32.xlu0 %v6694_v6 }
 0x9a6   :  { %v6684_v48 = vmul.f32 %v16947_v32, %v16947_v32  ;;  %v6703_v30 = vsel %vm6126_vm8, %v6683_v18, 0.0 }
 0x9a7   :  { %6704 = vadd.xlane.f32.xlu1 %v6703_v30 }
 0x9a8   :  { %v6706_v45 = vsel %vm6126_vm8, %v6684_v48, 0.0 }
 0x9a9   :  { %6707 = vadd.xlane.f32.xlu0 %v6706_v45 }
 0xa24   :  { %v6699_v10 = vpop.xlane.xlu1 %6698 }
 0xa25   :  { %v6713_v51 = vmul.f32 0.03125, %v6699_v10 }
 0xa26   :  { %v6702_v53 = vpop.xlane.xlu0 %6701 }
 0xa27   :  { %v6714_v24 = vmul.f32 0.03125, %v6702_v53  ;;  %v6721_v28 = vadd.f32 1e-05, %v6713_v51 }
 0xa28   :  { %v6687_v25 = vpop.xlane.xlu1 %6686 }
 0xa29   :  { %v6722_v49 = vadd.f32 1e-05, %v6714_v24  ;;  %v6709_v37 = vmul.f32 0.03125, %v6687_v25  ;;  %v13769_v25 = vld [vmem:[%s18511_s2 + $0x1] ss:$0 sm:$0xff] }
 0xa2a   :  { %v6690_v3 = vpop.xlane.xlu0 %6689 }
 0xa2b   :  { %v6710_v36 = vmul.f32 0.03125, %v6690_v3  ;;  %15143 = vrsqrt.f32 %v6722_v49  ;;  %v6717_v13 = vadd.f32 1e-05, %v6709_v37  ;;  %v6856_v37 = vcombine.low %v13769_v25, %v13769_v25 }
 0xa2c   :  { %15145 = vrsqrt.f32 %v6721_v28  ;;  %v6693_v39 = vpop.xlane.xlu1 %6692 }
 0xa2d   :  { %v6718_v1 = vadd.f32 1e-05, %v6710_v36  ;;  %15147 = vrsqrt.f32 %v6717_v13  ;;  %v6711_v43 = vmul.f32 0.03125, %v6693_v39  ;;  %v6863_v3 = vrot.slane %v6856_v37, %v18579_v54 }
 0xa2e   :  { %v6696_v15 = vpop.xlane.xlu0 %6695 }
 0xa2f   :  { %15149 = vrsqrt.f32 %v6718_v1  ;;  %v6712_v59 = vmul.f32 0.03125, %v6696_v15  ;;  %v6719_v4 = vadd.f32 1e-05, %v6711_v43  ;;  %v6864_v36 = vcombine.low %v6863_v3, %v6863_v3 }
 0xa30   :  { %v6705_v8 = vpop.xlane.xlu1 %6704 }
 0xa31   :  { %v6720_v7 = vadd.f32 1e-05, %v6712_v59  ;;  %15151 = vrsqrt.f32 %v6719_v4  ;;  %v6715_v61 = vmul.f32 0.03125, %v6705_v8 }
 0xa32   :  { %v6708_v2 = vpop.xlane.xlu0 %6707 }
 0xa33   :  { %15153 = vrsqrt.f32 %v6720_v7  ;;  %v6716_v42 = vmul.f32 0.03125, %v6708_v2  ;;  %v6723_v52 = vadd.f32 1e-05, %v6715_v61 }
 0xa35   :  { %v6724_v0 = vadd.f32 1e-05, %v6716_v42  ;;  %15155 = vrsqrt.f32 %v6723_v52 }
 0xa37   :  { %15157 = vrsqrt.f32 %v6724_v0 }
 0xa38   :  { %v15144_v44 = vpop.eup %15143 }
 0xa39   :  { %v15146_v9 = vpop.eup %15145  ;;  %v6738_v63 = vmul.f32 %v15144_v44, %v16918_v60  ;;  %v13740_v60 = vld [vmem:[%s18521_s12] ss:$0 sm:$0xff] }
 0xa3a   :  { %v15148_v50 = vpop.eup %15147  ;;  %v6737_v31 = vmul.f32 %v15146_v9, %v16916_v22 }
 0xa3b   :  { %v6733_v17 = vmul.f32 %v15148_v50, %v16924_v20  ;;  %v6752_v38 = vmul.f32 %v13739_v35, %v6738_v63 }
 0xa3c   :  { %v15150_v62 = vpop.eup %15149  ;;  %v6751_v16 = vmul.f32 %v13739_v35, %v6737_v31 }
 0xa3d   :  { %v6734_v56 = vmul.f32 %v15150_v62, %v16927_v57  ;;  %v6747_v11 = vmul.f32 %v13739_v35, %v6733_v17  ;;  %v16986_v6 = vadd.f32 %v13740_v60, %v6752_v38 }
 0xa3e   :  { %v15152_v27 = vpop.eup %15151  ;;  %v16995_v45 = vadd.f32 %v13740_v60, %v6751_v16 }
 0xa3f   :  { %v6748_v46 = vmul.f32 %v13739_v35, %v6734_v56  ;;  %v6735_v58 = vmul.f32 %v15152_v27, %v16934_v12  ;;  %v16983_v22 = vadd.f32 %v13740_v60, %v6747_v11  ;;  %18582 = vst [vmem:[#allocation8_spill] sm:$0xff] %v16986_v6 }
 0xa40   :  { %v15154_v29 = vpop.eup %15153  ;;  %18585 = vst [vmem:[#allocation14_spill] sm:$0xff] %v16995_v45 }
 0xa41   :  { %v6736_v20 = vmul.f32 %v15154_v29, %v16937_v14  ;;  %v16981_v57 = vadd.f32 %v13740_v60, %v6748_v46  ;;  %v6749_v41 = vmul.f32 %v13739_v35, %v6735_v58  ;;  %18581 = vst [vmem:[#allocation6_spill] sm:$0xff] %v16983_v22 }
 0xa42   :  { %v15156_v34 = vpop.eup %15155 }
 0xa43   :  { %18580 = vst [vmem:[#allocation7_spill] sm:$0xff] %v16981_v57  ;;  %v6750_v33 = vmul.f32 %v13739_v35, %v6736_v20  ;;  %v6739_v55 = vmul.f32 %v15156_v34, %v16944_v40  ;;  %v16989_v18 = vadd.f32 %v13740_v60, %v6749_v41  ;;  %v6822_v14 = vcombine.low %v16983_v22, %v16981_v57 }
 0xa44   :  { %v15158_v5 = vpop.eup %15157  ;;  %v6839_v40 = vcombine.low %v16995_v45, %v16986_v6 }
 0xa45   :  { %v6740_v12 = vmul.f32 %v15158_v5, %v16947_v32  ;;  %18583 = vst [vmem:[#allocation13_spill] sm:$0xff] %v16989_v18  ;;  %v16991_v48 = vadd.f32 %v13740_v60, %v6750_v33  ;;  %v6753_v30 = vmul.f32 %v13739_v35, %v6739_v55  ;;  %v6830_v21 = vrot.slane %v6822_v14, %v18579_v54 }
 0xa46   :  { %v6847_v24 = vrot.slane %v6839_v40, %v18579_v54 }
 0xa47   :  { %18584 = vst [vmem:[#allocation9_spill] sm:$0xff] %v16991_v48  ;;  %v6754_v19 = vmul.f32 %v13739_v35, %v6740_v12  ;;  %v6823_v47 = vcombine.low %v16989_v18, %v16991_v48  ;;  %v17003_v23 = vadd.f32 %v13740_v60, %v6753_v30 }
 0xa49   :  { %v6837_v32 = vrot.slane %v6823_v47, %v18579_v54  ;;  %18586 = vst [vmem:[#allocation11_spill] sm:$0xff] %v17003_v23  ;;  %v17005_v10 = vadd.f32 %v13740_v60, %v6754_v19 }
 0xa4b   :  { %18587 = vst [vmem:[#allocation16_spill] sm:$0xff] %v17005_v10  ;;  %v6838_v51 = vcombine.low %v6830_v21, %v6837_v32  ;;  %v6840_v53 = vcombine.low %v17003_v23, %v17005_v10 }
 0xa4d   :  { %14612 = vmatprep.mubr.msk.f32.mxu1 %vm144_vm0, %v6838_v51  ;;  %v6854_v28 = vrot.slane %v6840_v53, %v18579_v54 }
 0xa4f   :  { %v6855_v49 = vcombine.low %v6847_v24, %v6854_v28 }
 0xa51   :  { %14613 = vmatmul.mubr.msk.f32.vlgmr.msra.gmra.mxu1 %vm144_vm0, %v6855_v49 }
 0xa52   :  { %14617 = vmatprep.mubr.msk.f32.mxu1 %vm15353_vm1, %v18565_v26 }
 0xb11   :  { %v14614_v13 = vpop.f32.mrf.mxu1 }
 0xb12   :  { %v6942_v1 = vadd.f32 %v14614_v13, %v6864_v36 }
 0xb13   :  { %v6936_v39 = vpop.f32.mrf.mxu1 }
 0xb14   :  { %v6937_v43 = vadd.f32 %v6936_v39, %v6864_v36  ;;  %v17020_v15 = vrot.slane %v6942_v1, %v18579_v54  ;;  %v6964_v61 = vcombine.high %v6942_v1, %v6942_v1 }
 0xb16   :  { %v17023_v59 = vrot.slane %v6937_v43, %v18579_v54  ;;  %v6947_v7 = vcombine.high %v6937_v43, %v6937_v43  ;;  %v17035_v8 = vcombine.high %v17020_v15, %v17020_v15  ;;  %v17045_v42 = vrot.slane %v6964_v61, %v18579_v54 }
 0xb17   :  { %v17115_v62 = vrot.slane %v17020_v15, %v18579_v54 }
 0xb18   :  { %6981 = vrot.lane.b32.xlu1 %v17023_v59, %s15350_s29  ;;  %v17029_v4 = vcombine.high %v17023_v59, %v17023_v59  ;;  %v17040_v2 = vrot.slane %v6947_v7, %v18579_v54  ;;  %v17061_v0 = vcombine.high %v17045_v42, %v17045_v42  ;;  %v17091_v44 = vrot.slane %v17023_v59, %v18579_v54 }
 0xb19   :  { %v17127_v17 = vrot.slane %v17045_v42, %v18579_v54  ;;  %v17133_v56 = vrot.slane %v17035_v8, %v18579_v54 }
 0xb1a   :  { %6983 = vrot.lane.b32.xlu0 %v17029_v4, %s15350_s29  ;;  %v17053_v52 = vcombine.high %v17040_v2, %v17040_v2  ;;  %v17103_v9 = vrot.slane %v17040_v2, %v18579_v54  ;;  %v17109_v50 = vrot.slane %v17029_v4, %v18579_v54  ;;  %v17139_v35 = vrot.slane %v17061_v0, %v18579_v54 }
 0xb1c   :  { %6991 = vrot.lane.b32.xlu1 %v17035_v8, %s15350_s29  ;;  %v17121_v63 = vrot.slane %v17053_v52, %v18579_v54 }
 0xb1e   :  { %6989 = vrot.lane.b32.xlu0 %v17020_v15, %s15350_s29 }
 0xb20   :  { %6985 = vrot.lane.b32.xlu1 %v17040_v2, %s15350_s29 }
 0xb22   :  { %6993 = vrot.lane.b32.xlu0 %v17045_v42, %s15350_s29 }
 0xb24   :  { %6987 = vrot.lane.b32.xlu1 %v17053_v52, %s15350_s29 }
 0xb26   :  { %6997 = vrot.lane.b32.xlu0 %v17023_v59, %s15351_s30 }
 0xb28   :  { %6995 = vrot.lane.b32.xlu1 %v17061_v0, %s15350_s29 }
 0xb2a   :  { %7001 = vrot.lane.b32.xlu0 %v17040_v2, %s15351_s30 }
 0xb2c   :  { %6999 = vrot.lane.b32.xlu1 %v17029_v4, %s15351_s30 }
 0xb2e   :  { %7005 = vrot.lane.b32.xlu0 %v17020_v15, %s15351_s30 }
 0xb30   :  { %7007 = vrot.lane.b32.xlu1 %v17035_v8, %s15351_s30 }
 0xb32   :  { %7009 = vrot.lane.b32.xlu0 %v17045_v42, %s15351_s30 }
 0xb34   :  { %7003 = vrot.lane.b32.xlu1 %v17053_v52, %s15351_s30 }
 0xb36   :  { %7013 = vrot.lane.b32.xlu0 %v17023_v59, %s15354_s16 }
 0xb38   :  { %7011 = vrot.lane.b32.xlu1 %v17061_v0, %s15351_s30 }
 0xb3a   :  { %7017 = vrot.lane.b32.xlu0 %v17040_v2, %s15354_s16 }
 0xb3c   :  { %7015 = vrot.lane.b32.xlu1 %v17029_v4, %s15354_s16 }
 0xb3e   :  { %7021 = vrot.lane.b32.xlu0 %v17020_v15, %s15354_s16 }
 0xb40   :  { %7023 = vrot.lane.b32.xlu1 %v17035_v8, %s15354_s16 }
 0xb42   :  { %7036 = vrot.lane.b32.xlu0 %v17091_v44, %s15355_s17 }
 0xb44   :  { %7019 = vrot.lane.b32.xlu1 %v17053_v52, %s15354_s16 }
 0xb46   :  { %7027 = vrot.lane.b32.xlu0 %v17061_v0, %s15354_s16 }
 0xb48   :  { %7025 = vrot.lane.b32.xlu1 %v17045_v42, %s15354_s16 }
 0xb4a   :  { %7202 = vrot.lane.b32.xlu0 %v17103_v9, %s15355_s17 }
 0xb4c   :  { %7119 = vrot.lane.b32.xlu1 %v17109_v50, %s15355_s17 }
 0xb4e   :  { %7368 = vrot.lane.b32.xlu0 %v17115_v62, %s15355_s17 }
 0xb50   :  { %7285 = vrot.lane.b32.xlu1 %v17121_v63, %s15355_s17 }
 0xb52   :  { %7534 = vrot.lane.b32.xlu0 %v17127_v17, %s15355_s17 }
 0xb54   :  { %7451 = vrot.lane.b32.xlu1 %v17133_v56, %s15355_s17 }
 0xb58   :  { %7617 = vrot.lane.b32.xlu1 %v17139_v35, %s15355_s17 }
 0xb8a   :  { %v17143_v31 = vpop.permute.xlu1 %6981 }
 0xb8b   :  { %v17147_v27 = vrot.slane %v17143_v31, %v18579_v54 }
 0xb8c   :  { %v17149_v11 = vpop.permute.xlu0 %6983 }
 0xb8d   :  { %v17153_v46 = vrot.slane %v17149_v11, %v18579_v54  ;;  %7700 = vrot.lane.b32.xlu0 %v17147_v27, %s15355_s17 }
 0xb8e   :  { %v17157_v29 = vpop.permute.xlu1 %6991 }
 0xb8f   :  { %7783 = vrot.lane.b32.xlu1 %v17153_v46, %s15355_s17  ;;  %v17193_v55 = vrot.slane %v17157_v29, %v18579_v54 }
 0xb90   :  { %v17161_v38 = vpop.permute.xlu0 %6989 }
 0xb91   :  { %v17177_v41 = vrot.slane %v17161_v38, %v18579_v54 }
 0xb92   :  { %v17163_v58 = vpop.permute.xlu1 %6985 }
 0xb93   :  { %v17167_v60 = vrot.slane %v17163_v58, %v18579_v54 }
 0xb94   :  { %v17169_v20 = vpop.permute.xlu0 %6993 }
 0xb95   :  { %7866 = vrot.lane.b32.xlu0 %v17167_v60, %s15355_s17  ;;  %v17197_v12 = vrot.slane %v17169_v20, %v18579_v54 }
 0xb96   :  { %v17173_v16 = vpop.permute.xlu1 %6987 }
 0xb97   :  { %v17181_v34 = vrot.slane %v17173_v16, %v18579_v54 }
 0xb98   :  { %v17183_v33 = vpop.permute.xlu0 %6997 }
 0xb99   :  { %8032 = vrot.lane.b32.xlu0 %v17177_v41, %s15355_s17  ;;  %7949 = vrot.lane.b32.xlu1 %v17181_v34, %s15355_s17  ;;  %v17209_v19 = vrot.slane %v17183_v33, %v18579_v54 }
 0xb9a   :  { %v17189_v5 = vpop.permute.xlu1 %6995 }
 0xb9b   :  { %v17213_v47 = vrot.slane %v17189_v5, %v18579_v54 }
 0xb9c   :  { %v17199_v14 = vpop.permute.xlu0 %7001 }
 0xb9d   :  { %8198 = vrot.lane.b32.xlu0 %v17197_v12, %s15355_s17  ;;  %8115 = vrot.lane.b32.xlu1 %v17193_v55, %s15355_s17  ;;  %v17225_v32 = vrot.slane %v17199_v14, %v18579_v54 }
 0xb9e   :  { %v17205_v30 = vpop.permute.xlu1 %6999 }
 0xb9f   :  { %v17229_v51 = vrot.slane %v17205_v30, %v18579_v54 }
 0xba0   :  { %v17215_v40 = vpop.permute.xlu0 %7005 }
 0xba1   :  { %8364 = vrot.lane.b32.xlu0 %v17209_v19, %s15355_s17  ;;  %8281 = vrot.lane.b32.xlu1 %v17213_v47, %s15355_s17  ;;  %v17241_v28 = vrot.slane %v17215_v40, %v18579_v54 }
 0xba2   :  { %v17221_v21 = vpop.permute.xlu1 %7007 }
 0xba3   :  { %v17257_v3 = vrot.slane %v17221_v21, %v18579_v54 }
 0xba4   :  { %v17231_v53 = vpop.permute.xlu0 %7009 }
 0xba5   :  { %8530 = vrot.lane.b32.xlu0 %v17225_v32, %s15355_s17  ;;  %8447 = vrot.lane.b32.xlu1 %v17229_v51, %s15355_s17  ;;  %v17261_v36 = vrot.slane %v17231_v53, %v18579_v54 }
 0xba6   :  { %v17237_v24 = vpop.permute.xlu1 %7003 }
 0xba7   :  { %v17245_v49 = vrot.slane %v17237_v24, %v18579_v54 }
 0xba8   :  { %v17247_v25 = vpop.permute.xlu0 %7013 }
 0xba9   :  { %8696 = vrot.lane.b32.xlu0 %v17241_v28, %s15355_s17  ;;  %8613 = vrot.lane.b32.xlu1 %v17245_v49, %s15355_s17  ;;  %v17273_v39 = vrot.slane %v17247_v25, %v18579_v54 }
 0xbaa   :  { %v17253_v37 = vpop.permute.xlu1 %7011 }
 0xbab   :  { %v17277_v43 = vrot.slane %v17253_v37, %v18579_v54 }
 0xbac   :  { %v17263_v13 = vpop.permute.xlu0 %7017 }
 0xbad   :  { %8862 = vrot.lane.b32.xlu0 %v17261_v36, %s15355_s17  ;;  %8779 = vrot.lane.b32.xlu1 %v17257_v3, %s15355_s17  ;;  %v17289_v10 = vrot.slane %v17263_v13, %v18579_v54 }
 0xbae   :  { %v17269_v1 = vpop.permute.xlu1 %7015 }
 0xbaf   :  { %v17293_v48 = vrot.slane %v17269_v1, %v18579_v54 }
 0xbb0   :  { %v17279_v7 = vpop.permute.xlu0 %7021 }
 0xbb1   :  { %9028 = vrot.lane.b32.xlu0 %v17273_v39, %s15355_s17  ;;  %8945 = vrot.lane.b32.xlu1 %v17277_v43, %s15355_s17  ;;  %v17305_v6 = vrot.slane %v17279_v7, %v18579_v54 }
 0xbb2   :  { %v17285_v61 = vpop.permute.xlu1 %7023 }
 0xbb3   :  { %18588 = vst [vmem:[#allocation12_spill] sm:$0xff] %v17285_v61  ;;  %18590 = vst [vmem:[#allocation10_spill] sm:$0xff] %v17305_v6 }
 0xbb4   :  { %v7037_v18 = vpop.permute.xlu0 %7036 }
 0xbb5   :  { %14616 = vmatpush3.xpose.msk.msra.mxu1 %vm317_vm2, %v7037_v18  ;;  %9194 = vrot.lane.b32.xlu0 %v17289_v10, %s15355_s17 }
 0xbb6   :  { %9111 = vrot.lane.b32.xlu1 %v17293_v48, %s15355_s17  ;;  %v17300_v23 = vpop.permute.xlu1 %7019  ;;  %14620 = vmatprep.subr.mxu1 %v18565_v26 }
 0xbb7   :  { %18589 = vst [vmem:[#allocation18_spill] sm:$0xff] %v17300_v23  ;;  %v17309_v57 = vrot.slane %v17300_v23, %v18579_v54 }
 0xbb8   :  { %14618 = vmatmul.mubr.msk.f32.vlgmr.msra.gmra.mxu1 %vm317_vm2, %v17023_v59  ;;  %v17313_v18 = vpop.permute.xlu0 %7027  ;;  %v17329_v59 = vrot.slane %v17285_v61, %v18579_v54 }
 0xbb9   :  { %9360 = vrot.lane.b32.xlu0 %v17305_v6, %s15355_s17  ;;  %14622 = vmatprep.mubr.msk.f32.mxu1 %vm15353_vm1, %v18565_v26 }
 0xbba   :  { %9277 = vrot.lane.b32.xlu1 %v17309_v57, %s15355_s17  ;;  %v17321_v22 = vpop.permute.xlu1 %7025 }
 0xbbb   :  { %18591 = vst [vmem:[#allocation19_spill] sm:$0xff] %v17321_v22  ;;  %v17325_v45 = vrot.slane %v17321_v22, %v18579_v54  ;;  %v17340_v22 = vrot.slane %v17313_v18, %v18579_v54 }
 0xbbc   :  { %v7203_v23 = vpop.permute.xlu0 %7202 }
 0xbbd   :  { %14626 = vmatpush3.xpose.msk.msra.mxu0 %vm317_vm2, %v7203_v23  ;;  %9526 = vrot.lane.b32.xlu0 %v17325_v45, %s15355_s17 }
 0xbbe   :  { %9443 = vrot.lane.b32.xlu1 %v17329_v59, %s15355_s17  ;;  %v7120_v6 = vpop.permute.xlu1 %7119  ;;  %14635 = vmatprep.subr.mxu0 %v18565_v26 }
 0xbbf   :  { %14621 = vmatpush3.xpose.msk.msra.mxu1 %vm317_vm2, %v7120_v6 }
 0xbc0   :  { %14628 = vmatmul.mubr.msk.f32.vlgmr.msra.gmra.mxu0 %vm317_vm2, %v17040_v2  ;;  %v7369_v61 = vpop.permute.xlu0 %7368  ;;  %14630 = vmatprep.subr.mxu1 %v18565_v26 }
 0xbc1   :  { %14636 = vmatpush3.xpose.msk.msra.mxu0 %vm317_vm2, %v7369_v61  ;;  %10146 = vrot.lane.b32.xlu0 %v17109_v50, %s15356_s18 }
 0xbc2   :  { %9609 = vrot.lane.b32.xlu1 %v17340_v22, %s15355_s17  ;;  %14623 = vmatmul.mubr.msk.f32.vlgmr.msra.gmra.mxu1 %vm317_vm2, %v17029_v4  ;;  %v7286_v6 = vpop.permute.xlu1 %7285  ;;  %s15360_s17 = smov [#allocation2]  }
 0xbc3   :  { %14631 = vmatpush3.xpose.msk.msra.mxu1 %vm317_vm2, %v7286_v6  ;;  %14637 = vmatprep.mubr.msk.f32.mxu0 %vm15353_vm1, %v18565_v26 }
 0xbc4   :  { %14638 = vmatmul.mubr.msk.f32.vlgmr.msra.gmra.mxu0 %vm317_vm2, %v17020_v15  ;;  %14645 = vmatprep.subr.mxu0 %v18565_v26  ;;  %v7535_v23 = vpop.permute.xlu0 %7534 }
 0xbc5   :  { %14632 = vmatprep.mubr.msk.f32.mxu1 %vm15353_vm1, %v18565_v26  ;;  %14646 = vmatpush3.xpose.msk.msra.mxu0 %vm317_vm2, %v7535_v23 }
 0xbc6   :  { %10300 = vrot.lane.b32.xlu0 %v17121_v63, %s15356_s18  ;;  %10069 = vrot.lane.b32.xlu1 %v17091_v44, %s15356_s18  ;;  %v7452_v4 = vpop.permute.xlu1 %7451 }
 0xbc7   :  { %14633 = vmatmul.mubr.msk.f32.vlgmr.msra.gmra.mxu1 %vm317_vm2, %v17053_v52  ;;  %14640 = vmatprep.subr.mxu1 %v18565_v26 }
 0xbc8   :  { %14641 = vmatpush3.xpose.msk.msra.mxu1 %vm317_vm2, %v7452_v4  ;;  %14647 = vmatprep.mubr.msk.f32.mxu0 %vm15353_vm1, %v18565_v26 }
 0xbc9   :  { %14648 = vmatmul.mubr.msk.f32.vlgmr.msra.gmra.mxu0 %vm317_vm2, %v17045_v42  ;;  %14642 = vmatprep.mubr.msk.f32.mxu1 %vm15353_vm1, %v18565_v26 }
 0xbca   :  { %10454 = vrot.lane.b32.xlu0 %v17133_v56, %s15356_s18  ;;  %10223 = vrot.lane.b32.xlu1 %v17103_v9, %s15356_s18  ;;  %v7618_v15 = vpop.permute.xlu1 %7617 }
 0xbcb   :  { %14643 = vmatmul.mubr.msk.f32.vlgmr.msra.gmra.mxu1 %vm317_vm2, %v17035_v8  ;;  %14650 = vmatprep.subr.mxu1 %v18565_v26 }
 0xbcc   :  { %14651 = vmatpush3.xpose.msk.msra.mxu1 %vm317_vm2, %v7618_v15  ;;  %14652 = vmatprep.mubr.msk.f32.mxu1 %vm15353_vm1, %v18565_v26 }
 0xbcd   :  { %14655 = vmatprep.subr.mxu0 %v18565_v26  ;;  %14660 = vmatprep.subr.mxu1 %v18565_v26 }
 0xbce   :  { %10608 = vrot.lane.b32.xlu0 %v17139_v35, %s15356_s18  ;;  %10377 = vrot.lane.b32.xlu1 %v17115_v62, %s15356_s18 }
 0xbcf   :  { %14653 = vmatmul.mubr.msk.f32.vlgmr.msra.gmra.mxu1 %vm317_vm2, %v17061_v0  ;;  %14657 = vmatprep.mubr.msk.f32.mxu0 %vm15353_vm1, %v18565_v26 }
 0xbd0   :  { %14662 = vmatprep.mubr.msk.f32.mxu1 %vm15353_vm1, %v18565_v26 }
 0xbd2   :  { %10762 = vrot.lane.b32.xlu0 %v17153_v46, %s15356_s18  ;;  %10531 = vrot.lane.b32.xlu1 %v17127_v17, %s15356_s18 }
 0xbd6   :  { %11070 = vrot.lane.b32.xlu0 %v17193_v55, %s15356_s18  ;;  %10685 = vrot.lane.b32.xlu1 %v17147_v27, %s15356_s18 }
 0xbda   :  { %11224 = vrot.lane.b32.xlu0 %v17213_v47, %s15356_s18  ;;  %10839 = vrot.lane.b32.xlu1 %v17167_v60, %s15356_s18 }
 0xbde   :  { %11378 = vrot.lane.b32.xlu0 %v17229_v51, %s15356_s18  ;;  %10993 = vrot.lane.b32.xlu1 %v17177_v41, %s15356_s18 }
 0xbe2   :  { %11763 = vrot.lane.b32.xlu0 %v17261_v36, %s15356_s18  ;;  %11147 = vrot.lane.b32.xlu1 %v17197_v12, %s15356_s18 }
 0xbe6   :  { %11917 = vrot.lane.b32.xlu0 %v17273_v39, %s15356_s18  ;;  %11301 = vrot.lane.b32.xlu1 %v17209_v19, %s15356_s18 }
 0xbea   :  { %12071 = vrot.lane.b32.xlu0 %v17289_v10, %s15356_s18  ;;  %11455 = vrot.lane.b32.xlu1 %v17225_v32, %s15356_s18 }
 0xbee   :  { %10916 = vrot.lane.b32.xlu0 %v17181_v34, %s15356_s18  ;;  %11609 = vrot.lane.b32.xlu1 %v17241_v28, %s15356_s18 }
 0xbf2   :  { %11532 = vrot.lane.b32.xlu0 %v17245_v49, %s15356_s18  ;;  %11686 = vrot.lane.b32.xlu1 %v17257_v3, %s15356_s18 }
 0xbf6   :  { %11840 = vrot.lane.b32.xlu1 %v17277_v43, %s15356_s18 }
 0xbfa   :  { %11994 = vrot.lane.b32.xlu1 %v17293_v48, %s15356_s18 }
 0xbfe   :  { %12148 = vrot.lane.b32.xlu1 %v17309_v57, %s15356_s18 }
 0xbff   :  { %v7701_v10 = vpop.permute.xlu0 %7700 }
 0xc00   :  { %14656 = vmatpush3.xpose.msk.msra.mxu0 %vm317_vm2, %v7701_v10 }
 0xc01   :  { %v7784_v8 = vpop.permute.xlu1 %7783  ;;  %14665 = vmatprep.subr.mxu0 %v18565_v26 }
 0xc02   :  { %14661 = vmatpush3.xpose.msk.msra.mxu1 %vm317_vm2, %v7784_v8 }
 0xc03   :  { %14658 = vmatmul.mubr.msk.f32.vlgmr.msra.gmra.mxu0 %vm317_vm2, %v17143_v31  ;;  %14670 = vmatprep.subr.mxu1 %v18565_v26 }
 0xc04   :  { %14667 = vmatprep.mubr.msk.f32.mxu0 %vm15353_vm1, %v18565_v26 }
 0xc05   :  { %14663 = vmatmul.mubr.msk.f32.vlgmr.msra.gmra.mxu1 %vm317_vm2, %v17149_v11 }
 0xc06   :  { %14672 = vmatprep.mubr.msk.f32.mxu1 %vm15353_vm1, %v18565_v26 }
 0xc07   :  { %v7867_v57 = vpop.permute.xlu0 %7866 }
 0xc08   :  { %14666 = vmatpush3.xpose.msk.msra.mxu0 %vm317_vm2, %v7867_v57 }
 0xc09   :  { %14675 = vmatprep.subr.mxu0 %v18565_v26 }
 0xc0b   :  { %14668 = vmatmul.mubr.msk.f32.vlgmr.msra.gmra.mxu0 %vm317_vm2, %v17163_v58  ;;  %v8033_v48 = vpop.permute.xlu0 %8032  ;;  %v7950_v2 = vpop.permute.xlu1 %7949  ;;  %v18592_v58 = vld [vmem:[#allocation18_spill] sm:$0xff] }
 0xc0c   :  { %14671 = vmatpush3.xpose.msk.msra.mxu1 %vm317_vm2, %v7950_v2  ;;  %14676 = vmatpush3.xpose.msk.msra.mxu0 %vm317_vm2, %v8033_v48 }
 0xc0d   :  { %14677 = vmatprep.mubr.msk.f32.mxu0 %vm15353_vm1, %v18565_v26  ;;  %14685 = vmatprep.subr.mxu0 %v18565_v26 }
 0xc0e   :  { %14680 = vmatprep.subr.mxu1 %v18565_v26 }
 0xc0f   :  { %14678 = vmatmul.mubr.msk.f32.vlgmr.msra.gmra.mxu0 %vm317_vm2, %v17161_v38  ;;  %v8199_v42 = vpop.permute.xlu0 %8198  ;;  %14673 = vmatmul.mubr.msk.f32.vlgmr.msra.gmra.mxu1 %vm317_vm2, %v17173_v16  ;;  %v8116_v52 = vpop.permute.xlu1 %8115  ;;  %v18594_v16 = vld [vmem:[#allocation12_spill] sm:$0xff] }
 0xc10   :  { %14681 = vmatpush3.xpose.msk.msra.mxu1 %vm317_vm2, %v8116_v52  ;;  %14686 = vmatpush3.xpose.msk.msra.mxu0 %vm317_vm2, %v8199_v42 }
 0xc11   :  { %14682 = vmatprep.mubr.msk.f32.mxu1 %vm15353_vm1, %v18565_v26  ;;  %14687 = vmatprep.mubr.msk.f32.mxu0 %vm15353_vm1, %v18565_v26 }
 0xc12   :  { %14695 = vmatprep.subr.mxu0 %v18565_v26  ;;  %14690 = vmatprep.subr.mxu1 %v18565_v26 }
 0xc13   :  { %14688 = vmatmul.mubr.msk.f32.vlgmr.msra.gmra.mxu0 %vm317_vm2, %v17169_v20  ;;  %v8365_v0 = vpop.permute.xlu0 %8364  ;;  %14683 = vmatmul.mubr.msk.f32.vlgmr.msra.gmra.mxu1 %vm317_vm2, %v17157_v29  ;;  %v8282_v44 = vpop.permute.xlu1 %8281  ;;  %v18593_v20 = vld [vmem:[#allocation19_spill] sm:$0xff] }
 0xc14   :  { %14691 = vmatpush3.xpose.msk.msra.mxu1 %vm317_vm2, %v8282_v44  ;;  %14696 = vmatpush3.xpose.msk.msra.mxu0 %vm317_vm2, %v8365_v0 }
 0xc15   :  { %14692 = vmatprep.mubr.msk.f32.mxu1 %vm15353_vm1, %v18565_v26  ;;  %14697 = vmatprep.mubr.msk.f32.mxu0 %vm15353_vm1, %v18565_v26 }
 0xc16   :  { %14705 = vmatprep.subr.mxu0 %v18565_v26  ;;  %14700 = vmatprep.subr.mxu1 %v18565_v26 }
 0xc17   :  { %14698 = vmatmul.mubr.msk.f32.vlgmr.msra.gmra.mxu0 %vm317_vm2, %v17183_v33  ;;  %v8531_v9 = vpop.permute.xlu0 %8530  ;;  %14693 = vmatmul.mubr.msk.f32.vlgmr.msra.gmra.mxu1 %vm317_vm2, %v17189_v5  ;;  %v8448_v50 = vpop.permute.xlu1 %8447 }
 0xc18   :  { %14701 = vmatpush3.xpose.msk.msra.mxu1 %vm317_vm2, %v8448_v50  ;;  %14706 = vmatpush3.xpose.msk.msra.mxu0 %vm317_vm2, %v8531_v9 }
 0xc19   :  { %14702 = vmatprep.mubr.msk.f32.mxu1 %vm15353_vm1, %v18565_v26  ;;  %14707 = vmatprep.mubr.msk.f32.mxu0 %vm15353_vm1, %v18565_v26 }
 0xc1a   :  { %14715 = vmatprep.subr.mxu0 %v18565_v26  ;;  %14710 = vmatprep.subr.mxu1 %v18565_v26 }
 0xc1b   :  { %14708 = vmatmul.mubr.msk.f32.vlgmr.msra.gmra.mxu0 %vm317_vm2, %v17199_v14  ;;  %v8697_v62 = vpop.permute.xlu0 %8696  ;;  %14703 = vmatmul.mubr.msk.f32.vlgmr.msra.gmra.mxu1 %vm317_vm2, %v17205_v30  ;;  %v8614_v63 = vpop.permute.xlu1 %8613 }
 0xc1c   :  { %14711 = vmatpush3.xpose.msk.msra.mxu1 %vm317_vm2, %v8614_v63  ;;  %14716 = vmatpush3.xpose.msk.msra.mxu0 %vm317_vm2, %v8697_v62 }
 0xc1d   :  { %14712 = vmatprep.mubr.msk.f32.mxu1 %vm15353_vm1, %v18565_v26  ;;  %14717 = vmatprep.mubr.msk.f32.mxu0 %vm15353_vm1, %v18565_v26 }
 0xc1e   :  { %14725 = vmatprep.subr.mxu0 %v18565_v26  ;;  %14720 = vmatprep.subr.mxu1 %v18565_v26 }
 0xc1f   :  { %14718 = vmatmul.mubr.msk.f32.vlgmr.msra.gmra.mxu0 %vm317_vm2, %v17215_v40  ;;  %v8863_v17 = vpop.permute.xlu0 %8862  ;;  %14713 = vmatmul.mubr.msk.f32.vlgmr.msra.gmra.mxu1 %vm317_vm2, %v17237_v24  ;;  %v8780_v56 = vpop.permute.xlu1 %8779 }
 0xc20   :  { %14721 = vmatpush3.xpose.msk.msra.mxu1 %vm317_vm2, %v8780_v56  ;;  %14726 = vmatpush3.xpose.msk.msra.mxu0 %vm317_vm2, %v8863_v17 }
 0xc21   :  { %14722 = vmatprep.mubr.msk.f32.mxu1 %vm15353_vm1, %v18565_v26  ;;  %14727 = vmatprep.mubr.msk.f32.mxu0 %vm15353_vm1, %v18565_v26 }
 0xc22   :  { %14735 = vmatprep.subr.mxu0 %v18565_v26  ;;  %14730 = vmatprep.subr.mxu1 %v18565_v26 }
 0xc23   :  { %14728 = vmatmul.mubr.msk.f32.vlgmr.msra.gmra.mxu0 %vm317_vm2, %v17231_v53  ;;  %v9029_v35 = vpop.permute.xlu0 %9028  ;;  %14723 = vmatmul.mubr.msk.f32.vlgmr.msra.gmra.mxu1 %vm317_vm2, %v17221_v21  ;;  %v8946_v31 = vpop.permute.xlu1 %8945 }
 0xc24   :  { %14731 = vmatpush3.xpose.msk.msra.mxu1 %vm317_vm2, %v8946_v31  ;;  %14736 = vmatpush3.xpose.msk.msra.mxu0 %vm317_vm2, %v9029_v35 }
 0xc25   :  { %14732 = vmatprep.mubr.msk.f32.mxu1 %vm15353_vm1, %v18565_v26  ;;  %14737 = vmatprep.mubr.msk.f32.mxu0 %vm15353_vm1, %v18565_v26 }
 0xc26   :  { %14745 = vmatprep.subr.mxu0 %v18565_v26  ;;  %14740 = vmatprep.subr.mxu1 %v18565_v26 }
 0xc27   :  { %14738 = vmatmul.mubr.msk.f32.vlgmr.msra.gmra.mxu0 %vm317_vm2, %v17247_v25  ;;  %v9195_v27 = vpop.permute.xlu0 %9194  ;;  %14733 = vmatmul.mubr.msk.f32.vlgmr.msra.gmra.mxu1 %vm317_vm2, %v17253_v37 }
 0xc28   :  { %v9112_v11 = vpop.permute.xlu1 %9111  ;;  %14746 = vmatpush3.xpose.msk.msra.mxu0 %vm317_vm2, %v9195_v27  ;;  %14742 = vmatprep.mubr.msk.f32.mxu1 %vm15353_vm1, %v18565_v26 }
 0xc29   :  { %14741 = vmatpush3.xpose.msk.msra.mxu1 %vm317_vm2, %v9112_v11  ;;  %14747 = vmatprep.mubr.msk.f32.mxu0 %vm15353_vm1, %v18565_v26 }
 0xc2a   :  { %14755 = vmatprep.subr.mxu0 %v18565_v26  ;;  %14750 = vmatprep.subr.mxu1 %v18565_v26 }
 0xc2b   :  { %14748 = vmatmul.mubr.msk.f32.vlgmr.msra.gmra.mxu0 %vm317_vm2, %v17263_v13  ;;  %v9361_v46 = vpop.permute.xlu0 %9360 }
 0xc2c   :  { %14743 = vmatmul.mubr.msk.f32.vlgmr.msra.gmra.mxu1 %vm317_vm2, %v17269_v1  ;;  %v9278_v29 = vpop.permute.xlu1 %9277  ;;  %14756 = vmatpush3.xpose.msk.msra.mxu0 %vm317_vm2, %v9361_v46 }
 0xc2d   :  { %14751 = vmatpush3.xpose.msk.msra.mxu1 %vm317_vm2, %v9278_v29  ;;  %14752 = vmatprep.mubr.msk.f32.mxu1 %vm15353_vm1, %v18565_v26 }
 0xc2e   :  { %14757 = vmatprep.mubr.msk.f32.mxu0 %vm15353_vm1, %v18565_v26  ;;  %14765 = vmatprep.subr.mxu0 %v18565_v26 }
 0xc2f   :  { %14758 = vmatmul.mubr.msk.f32.vlgmr.msra.gmra.mxu0 %vm317_vm2, %v17279_v7  ;;  %v9527_v38 = vpop.permute.xlu0 %9526  ;;  %14760 = vmatprep.subr.mxu1 %v18565_v26 }
 0xc30   :  { %14753 = vmatmul.mubr.msk.f32.vlgmr.msra.gmra.mxu1 %vm317_vm2, %v18592_v58  ;;  %v9444_v60 = vpop.permute.xlu1 %9443  ;;  %14766 = vmatpush3.xpose.msk.msra.mxu0 %vm317_vm2, %v9527_v38 }
 0xc31   :  { %14761 = vmatpush3.xpose.msk.msra.mxu1 %vm317_vm2, %v9444_v60  ;;  %14762 = vmatprep.mubr.msk.f32.mxu1 %vm15353_vm1, %v18565_v26 }
 0xc32   :  { %14767 = vmatprep.mubr.msk.f32.mxu0 %vm15353_vm1, %v18565_v26  ;;  %14770 = vmatprep.subr.mxu1 %v18565_v26 }
 0xc33   :  { %14768 = vmatmul.mubr.msk.f32.vlgmr.msra.gmra.mxu0 %vm317_vm2, %v18593_v20  ;;  %14775 = vmatprep.subr.mxu0 %v18565_v26  ;;  %v10147_v34 = vpop.permute.xlu0 %10146 }
 0xc34   :  { %14763 = vmatmul.mubr.msk.f32.vlgmr.msra.gmra.mxu1 %vm317_vm2, %v18594_v16  ;;  %v9610_v41 = vpop.permute.xlu1 %9609  ;;  %14777 = vmatprep.mubr.msk.f32.mxu0 %vm15353_vm1, %v18565_v26 }
 0xc35   :  { %14771 = vmatpush3.xpose.msk.msra.mxu1 %vm317_vm2, %v9610_v41  ;;  %14772 = vmatprep.mubr.msk.f32.mxu1 %vm15353_vm1, %v18565_v26 }
 0xc36   :  { %14780 = vmatprep.subr.mxu1 %v18565_v26 }
 0xc38   :  { %14773 = vmatmul.mubr.msk.f32.vlgmr.msra.gmra.mxu1 %vm317_vm2, %v17313_v18  ;;  %v10070_v33 = vpop.permute.xlu1 %10069  ;;  %v17619_v57 = vpop.permute.xlu0 %10300 }
 0xc39   :  { %14776 = vmatpush3.msk.msra.mxu0 %vm3356_vm3, %v10070_v33  ;;  %14781 = vmatpush3.msk.msra.mxu1 %vm3356_vm3, %v10147_v34 }
 0xc3a   :  { %14785 = vmatprep.subr.mxu0 %v18565_v26  ;;  %14782 = vmatprep.mubr.msk.f32.mxu1 %vm15353_vm1, %v18565_v26 }
 0xc3b   :  { %14790 = vmatprep.subr.mxu1 %v18565_v26 }
 0xc3c   :  { %v17621_v48 = vpop.permute.xlu1 %10223  ;;  %v17623_v42 = vpop.permute.xlu0 %10454 }
 0xc40   :  { %v17631_v63 = vpop.permute.xlu1 %10377  ;;  %v17635_v56 = vpop.permute.xlu0 %10608 }
 0xc44   :  { %v17639_v11 = vpop.permute.xlu1 %10531  ;;  %v17643_v58 = vpop.permute.xlu0 %10762 }
 0xc78   :  { %v7108_v5 = vpop.f32.mrf.mxu1 }
 0xc79   :  { %v17587_v55 = vmul.f32 0.35355338, %v7108_v5 }
 0xc7a   :  { %v14619_v12 = vpop.f32.mrf.mxu1 }
 0xc7b   :  { %v9717_v14 = vsel %vm2997_vm4, %v17587_v55, -inf }
 0xc7c   :  { %9718 = vmax.xlane.f32.xlu0 %v9717_v14  ;;  %v17653_v14 = vpop.permute.xlu1 %10685 }
 0xc80   :  { %v7274_v30 = vpop.f32.mrf.mxu0 }
 0xc81   :  { %v17591_v19 = vmul.f32 0.35355338, %v7274_v30 }
 0xc82   :  { %v7191_v47 = vpop.f32.mrf.mxu1  ;;  %v14629_v40 = vpop.f32.mrf.mxu0 }
 0xc83   :  { %v17593_v21 = vmul.f32 0.35355338, %v7191_v47  ;;  %v9723_v32 = vsel %vm2997_vm4, %v17591_v19, -inf }
 0xc84   :  { %v14624_v51 = vpop.f32.mrf.mxu1  ;;  %v7440_v53 = vpop.f32.mrf.mxu0  ;;  %9724 = vmax.xlane.f32.xlu0 %v9723_v32 }
 0xc85   :  { %v17597_v24 = vmul.f32 0.35355338, %v7440_v53  ;;  %v9720_v28 = vsel %vm2997_vm4, %v17593_v21, -inf  ;;  %v17659_v51 = vpop.permute.xlu0 %11070 }
 0xc86   :  { %v14639_v49 = vpop.f32.mrf.mxu0  ;;  %9721 = vmax.xlane.f32.xlu1 %v9720_v28 }
 0xc87   :  { %v7357_v25 = vpop.f32.mrf.mxu1  ;;  %v9729_v13 = vsel %vm2997_vm4, %v17597_v24, -inf }
 0xc88   :  { %v17601_v37 = vmul.f32 0.35355338, %v7357_v25 }
 0xc89   :  { %v14634_v3 = vpop.f32.mrf.mxu1  ;;  %v7606_v36 = vpop.f32.mrf.mxu0 }
 0xc8a   :  { %v17605_v1 = vmul.f32 0.35355338, %v7606_v36  ;;  %9730 = vmax.xlane.f32.xlu1 %v9729_v13  ;;  %v9726_v39 = vsel %vm2997_vm4, %v17601_v37, -inf }
 0xc8b   :  { %v14649_v43 = vpop.f32.mrf.mxu0  ;;  %9727 = vmax.xlane.f32.xlu0 %v9726_v39  ;;  %v7523_v7 = vpop.f32.mrf.mxu1 }
 0xc8c   :  { %v17609_v61 = vmul.f32 0.35355338, %v7523_v7  ;;  %v9735_v6 = vsel %vm2997_vm4, %v17605_v1, -inf  ;;  %v17669_v43 = vpop.permute.xlu1 %10839 }
 0xc8d   :  { %v14644_v18 = vpop.f32.mrf.mxu1 }
 0xc8e   :  { %9736 = vmax.xlane.f32.xlu1 %v9735_v6  ;;  %v9732_v23 = vsel %vm2997_vm4, %v17609_v61, -inf }
 0xc8f   :  { %9733 = vmax.xlane.f32.xlu0 %v9732_v23  ;;  %v7689_v4 = vpop.f32.mrf.mxu1 }
 0xc90   :  { %v17615_v15 = vmul.f32 0.35355338, %v7689_v4  ;;  %v17675_v4 = vpop.permute.xlu0 %11224 }
 0xc91   :  { %v14654_v10 = vpop.f32.mrf.mxu1 }
 0xc92   :  { %v9738_v8 = vsel %vm2997_vm4, %v17615_v15, -inf }
 0xc93   :  { %9739 = vmax.xlane.f32.xlu0 %v9738_v8 }
 0xcc3   :  { %v7772_v2 = vpop.f32.mrf.mxu0 }
 0xcc4   :  { %v17625_v52 = vmul.f32 0.35355338, %v7772_v2 }
 0xcc5   :  { %v14659_v0 = vpop.f32.mrf.mxu0  ;;  %v7855_v44 = vpop.f32.mrf.mxu1 }
 0xcc6   :  { %v17627_v9 = vmul.f32 0.35355338, %v7855_v44  ;;  %v9741_v50 = vsel %vm2997_vm4, %v17625_v52, -inf }
 0xcc7   :  { %9742 = vmax.xlane.f32.xlu1 %v9741_v50  ;;  %v14664_v62 = vpop.f32.mrf.mxu1 }
 0xcc8   :  { %v9744_v17 = vsel %vm2997_vm4, %v17627_v9, -inf }
 0xcc9   :  { %9745 = vmax.xlane.f32.xlu0 %v9744_v17 }
 0xccb   :  { %v7938_v35 = vpop.f32.mrf.mxu0 }
 0xccc   :  { %v17637_v31 = vmul.f32 0.35355338, %v7938_v35  ;;  %v17685_v35 = vpop.permute.xlu1 %10993 }
 0xccd   :  { %v14669_v27 = vpop.f32.mrf.mxu0 }
 0xcce   :  { %v9747_v46 = vsel %vm2997_vm4, %v17637_v31, -inf }
 0xccf   :  { %v8104_v29 = vpop.f32.mrf.mxu0  ;;  %9748 = vmax.xlane.f32.xlu1 %v9747_v46  ;;  %v8021_v38 = vpop.f32.mrf.mxu1 }
 0xcd0   :  { %v17645_v60 = vmul.f32 0.35355338, %v8104_v29  ;;  %v17647_v20 = vmul.f32 0.35355338, %v8021_v38 }
 0xcd1   :  { %v14674_v16 = vpop.f32.mrf.mxu1  ;;  %v14679_v41 = vpop.f32.mrf.mxu0 }
 0xcd2   :  { %v9753_v34 = vsel %vm2997_vm4, %v17645_v60, -inf  ;;  %v9750_v33 = vsel %vm2997_vm4, %v17647_v20, -inf  ;;  %v17691_v16 = vpop.permute.xlu0 %11378 }
 0xcd3   :  { %v8270_v5 = vpop.f32.mrf.mxu0  ;;  %9754 = vmax.xlane.f32.xlu1 %v9753_v34  ;;  %9751 = vmax.xlane.f32.xlu0 %v9750_v33  ;;  %v8187_v12 = vpop.f32.mrf.mxu1  ;;  %18595 = vst [vmem:[#allocation15_spill] sm:$0xff] %v17691_v16 }
 0xcd4   :  { %v17655_v30 = vmul.f32 0.35355338, %v8270_v5  ;;  %v17657_v47 = vmul.f32 0.35355338, %v8187_v12 }
 0xcd5   :  { %v14684_v40 = vpop.f32.mrf.mxu1  ;;  %v14689_v32 = vpop.f32.mrf.mxu0 }
 0xcd6   :  { %v9759_v53 = vsel %vm2997_vm4, %v17655_v30, -inf  ;;  %v9756_v28 = vsel %vm2997_vm4, %v17657_v47, -inf }
 0xcd7   :  { %v8436_v49 = vpop.f32.mrf.mxu0  ;;  %9760 = vmax.xlane.f32.xlu1 %v9759_v53  ;;  %9757 = vmax.xlane.f32.xlu0 %v9756_v28  ;;  %v8353_v25 = vpop.f32.mrf.mxu1 }
 0xcd8   :  { %v17665_v3 = vmul.f32 0.35355338, %v8436_v49  ;;  %v17667_v36 = vmul.f32 0.35355338, %v8353_v25  ;;  %v17701_v28 = vpop.permute.xlu1 %11147 }
 0xcd9   :  { %v14694_v13 = vpop.f32.mrf.mxu1  ;;  %v14699_v39 = vpop.f32.mrf.mxu0 }
 0xcda   :  { %v9765_v7 = vsel %vm2997_vm4, %v17665_v3, -inf  ;;  %v9762_v18 = vsel %vm2997_vm4, %v17667_v36, -inf }
 0xcdb   :  { %v8602_v6 = vpop.f32.mrf.mxu0  ;;  %9766 = vmax.xlane.f32.xlu1 %v9765_v7  ;;  %9763 = vmax.xlane.f32.xlu0 %v9762_v18  ;;  %v8519_v23 = vpop.f32.mrf.mxu1 }
 0xcdc   :  { %v17677_v10 = vmul.f32 0.35355338, %v8602_v6  ;;  %v17679_v8 = vmul.f32 0.35355338, %v8519_v23  ;;  %v17707_v7 = vpop.permute.xlu0 %11763 }
 0xcdd   :  { %v14704_v2 = vpop.f32.mrf.mxu1  ;;  %v14709_v0 = vpop.f32.mrf.mxu0  ;;  %18596 = vst [vmem:[#allocation17_spill] sm:$0xff] %v17707_v7 }
 0xcde   :  { %v9771_v44 = vsel %vm2997_vm4, %v17677_v10, -inf  ;;  %v9768_v50 = vsel %vm2997_vm4, %v17679_v8, -inf }
 0xcdf   :  { %v8768_v62 = vpop.f32.mrf.mxu0  ;;  %9772 = vmax.xlane.f32.xlu1 %v9771_v44  ;;  %9769 = vmax.xlane.f32.xlu0 %v9768_v50  ;;  %v8685_v17 = vpop.f32.mrf.mxu1 }
 0xce0   :  { %v17687_v27 = vmul.f32 0.35355338, %v8768_v62  ;;  %v17689_v46 = vmul.f32 0.35355338, %v8685_v17 }
 0xce1   :  { %v14714_v29 = vpop.f32.mrf.mxu1  ;;  %v14719_v38 = vpop.f32.mrf.mxu0 }
 0xce2   :  { %v9777_v41 = vsel %vm2997_vm4, %v17687_v27, -inf  ;;  %v9774_v34 = vsel %vm2997_vm4, %v17689_v46, -inf  ;;  %v17719_v29 = vpop.permute.xlu1 %11301 }
 0xce3   :  { %v8934_v33 = vpop.f32.mrf.mxu0  ;;  %9778 = vmax.xlane.f32.xlu1 %v9777_v41  ;;  %9775 = vmax.xlane.f32.xlu0 %v9774_v34  ;;  %v8851_v5 = vpop.f32.mrf.mxu1 }
 0xce4   :  { %v17697_v12 = vmul.f32 0.35355338, %v8934_v33  ;;  %v17699_v40 = vmul.f32 0.35355338, %v8851_v5  ;;  %v17725_v5 = vpop.permute.xlu0 %11917 }
 0xce5   :  { %v14724_v32 = vpop.f32.mrf.mxu1  ;;  %v14729_v53 = vpop.f32.mrf.mxu0  ;;  %18597 = vst [vmem:[#allocation18_spill] sm:$0xff] %v17725_v5 }
 0xce6   :  { %v9783_v49 = vsel %vm2997_vm4, %v17697_v12, -inf  ;;  %v9780_v25 = vsel %vm2997_vm4, %v17699_v40, -inf }
 0xce7   :  { %v9100_v13 = vpop.f32.mrf.mxu0  ;;  %9784 = vmax.xlane.f32.xlu1 %v9783_v49  ;;  %9781 = vmax.xlane.f32.xlu0 %v9780_v25  ;;  %v9017_v39 = vpop.f32.mrf.mxu1 }
 0xce8   :  { %v17709_v18 = vmul.f32 0.35355338, %v9100_v13  ;;  %v17711_v6 = vmul.f32 0.35355338, %v9017_v39 }
 0xce9   :  { %v14734_v23 = vpop.f32.mrf.mxu1  ;;  %v14739_v2 = vpop.f32.mrf.mxu0 }
 0xcea   :  { %v9789_v0 = vsel %vm2997_vm4, %v17709_v18, -inf  ;;  %v9786_v44 = vsel %vm2997_vm4, %v17711_v6, -inf }
 0xceb   :  { %v9266_v50 = vpop.f32.mrf.mxu0  ;;  %9790 = vmax.xlane.f32.xlu1 %v9789_v0  ;;  %9787 = vmax.xlane.f32.xlu0 %v9786_v44  ;;  %v17735_v0 = vpop.permute.xlu1 %11455 }
 0xcec   :  { %v17717_v62 = vmul.f32 0.35355338, %v9266_v50  ;;  %v9183_v17 = vpop.f32.mrf.mxu1  ;;  %18598 = vst [vmem:[#allocation19_spill] sm:$0xff] %v17735_v0 }
 0xced   :  { %v17721_v38 = vmul.f32 0.35355338, %v9183_v17  ;;  %v14749_v41 = vpop.f32.mrf.mxu0 }
 0xcee   :  { %v14744_v34 = vpop.f32.mrf.mxu1  ;;  %v9795_v33 = vsel %vm2997_vm4, %v17717_v62, -inf  ;;  %v17739_v41 = vpop.permute.xlu0 %12071 }
 0xcef   :  { %v9432_v32 = vpop.f32.mrf.mxu0  ;;  %9796 = vmax.xlane.f32.xlu1 %v9795_v33  ;;  %v9792_v53 = vsel %vm2997_vm4, %v17721_v38, -inf  ;;  %18599 = vst [vmem:[#allocation12_spill] sm:$0xff] %v17739_v41 }
 0xcf0   :  { %v17729_v49 = vmul.f32 0.35355338, %v9432_v32  ;;  %9793 = vmax.xlane.f32.xlu0 %v9792_v53  ;;  %v9349_v25 = vpop.f32.mrf.mxu1 }
 0xcf1   :  { %v17731_v13 = vmul.f32 0.35355338, %v9349_v25  ;;  %v14759_v39 = vpop.f32.mrf.mxu0 }
 0xcf2   :  { %v14754_v23 = vpop.f32.mrf.mxu1  ;;  %v9801_v2 = vsel %vm2997_vm4, %v17729_v49, -inf  ;;  %v17745_v39 = vpop.permute.xlu1 %11609 }
 0xcf3   :  { %v9598_v44 = vpop.f32.mrf.mxu0  ;;  %9802 = vmax.xlane.f32.xlu1 %v9801_v2  ;;  %v9798_v50 = vsel %vm2997_vm4, %v17731_v13, -inf  ;;  %18600 = vst [vmem:[#allocation20_spill] sm:$0xff] %v17745_v39  ;;  %v17749_v54 = vpop.permute.xlu0 %10916 }
 0xcf4   :  { %9799 = vmax.xlane.f32.xlu0 %v9798_v50  ;;  %v9515_v17 = vpop.f32.mrf.mxu1  ;;  %v17769_v16 = vmul.f32 0.35355338, %v9598_v44 }
 0xcf5   :  { %v17741_v34 = vmul.f32 0.35355338, %v9515_v17  ;;  %v14769_v33 = vpop.f32.mrf.mxu0 }
 0xcf6   :  { %v14764_v32 = vpop.f32.mrf.mxu1  ;;  %v17753_v17 = vpop.permute.xlu1 %11686 }
 0xcf7   :  { %v9804_v53 = vsel %vm2997_vm4, %v17741_v34, -inf  ;;  %18601 = vst [vmem:[#allocation21_spill] sm:$0xff] %v17753_v17  ;;  %v17755_v33 = vpop.permute.xlu0 %11532 }
 0xcf8   :  { %9805 = vmax.xlane.f32.xlu0 %v9804_v53  ;;  %v9681_v25 = vpop.f32.mrf.mxu1  ;;  %18602 = vst [vmem:[#allocation22_spill] sm:$0xff] %v17755_v33 }
 0xcf9   :  { %v17747_v23 = vmul.f32 0.35355338, %v9681_v25 }
 0xcfa   :  { %v14774_v2 = vpop.f32.mrf.mxu1  ;;  %v17757_v32 = vpop.permute.xlu1 %11840 }
 0xcfb   :  { %v9810_v50 = vsel %vm2997_vm4, %v17747_v23, -inf  ;;  %18603 = vst [vmem:[#allocation23_spill] sm:$0xff] %v17757_v32 }
 0xcfc   :  { %9811 = vmax.xlane.f32.xlu0 %v9810_v50  ;;  %v18606_v50 = vld [vmem:[#allocation10_spill] sm:$0xff] }
 0xcfe   :  { %v17760_v25 = vpop.permute.xlu1 %11994 }
 0xcff   :  { %18604 = vst [vmem:[#allocation24_spill] sm:$0xff] %v17760_v25 }
 0xd02   :  { %v17763_v0 = vpop.permute.xlu1 %12148 }
 0xd03   :  { %18605 = vst [vmem:[#allocation25_spill] sm:$0xff] %v17763_v0 }
 0xd05   :  { %v9719_v41 = vpop.xlane.xlu0 %9718 }
 0xd06   :  { %v9813_v53 = vsub.f32 %v17587_v55, %v9719_v41 }
 0xd08   :  { %v9845_v5 = vmul.f32 1.442695, %v9813_v53 }
 0xd0a   :  { %15159 = vpow2.f32 %v9845_v5 }
 0xd0d   :  { %v9725_v2 = vpop.xlane.xlu0 %9724 }
 0xd0e   :  { %v9815_v7 = vsub.f32 %v17591_v19, %v9725_v2 }
 0xd0f   :  { %v9722_v17 = vpop.xlane.xlu1 %9721 }
 0xd10   :  { %v9849_v39 = vmul.f32 1.442695, %v9815_v7  ;;  %v9814_v55 = vsub.f32 %v17593_v21, %v9722_v17 }
 0xd12   :  { %15161 = vpow2.f32 %v9849_v39  ;;  %12225 = vrot.lane.b32.xlu0 %v18606_v50, %s15356_s18  ;;  %v9847_v7 = vmul.f32 1.442695, %v9814_v55  ;;  %v9807_v39 = vsel %vm2997_vm4, %v17769_v16, -inf }
 0xd14   :  { %v9728_v33 = vpop.xlane.xlu0 %9727  ;;  %15163 = vpow2.f32 %v9847_v7 }
 0xd15   :  { %v9816_v41 = vsub.f32 %v17601_v37, %v9728_v33 }
 0xd17   :  { %v17767_v32 = vpop.eup %15159  ;;  %v9851_v2 = vmul.f32 1.442695, %v9816_v41 }
 0xd18   :  { %v9909_v5 = vsel %vm2997_vm4, %v17767_v32, 0.0  ;;  %v9734_v19 = vpop.xlane.xlu0 %9733 }
 0xd19   :  { %9910 = vadd.xlane.f32.xlu1 %v9909_v5  ;;  %v9818_v44 = vsub.f32 %v17609_v61, %v9734_v19  ;;  %15165 = vpow2.f32 %v9851_v2 }
 0xd1b   :  { %v9855_v50 = vmul.f32 1.442695, %v9818_v44 }
 0xd1c   :  { %v9740_v17 = vpop.xlane.xlu0 %9739 }
 0xd1d   :  { %9808 = vmax.xlane.f32.xlu1 %v9807_v39  ;;  %v9820_v55 = vsub.f32 %v17615_v15, %v9740_v17  ;;  %15167 = vpow2.f32 %v9855_v50  ;;  %v9731_v15 = vpop.xlane.xlu1 %9730 }
 0xd1e   :  { %v9817_v44 = vsub.f32 %v17597_v24, %v9731_v15 }
 0xd1f   :  { %v17777_v53 = vpop.eup %15161  ;;  %v9859_v37 = vmul.f32 1.442695, %v9820_v55 }
 0xd20   :  { %v9915_v21 = vsel %vm2997_vm4, %v17777_v53, 0.0 }
 0xd21   :  { %9916 = vadd.xlane.f32.xlu1 %v9915_v21  ;;  %15169 = vpow2.f32 %v9859_v37  ;;  %v17783_v33 = vpop.eup %15163  ;;  %v9853_v21 = vmul.f32 1.442695, %v9817_v44 }
 0xd22   :  { %v9912_v5 = vsel %vm2997_vm4, %v17783_v33, 0.0 }
 0xd23   :  { %15171 = vpow2.f32 %v9853_v21 }
 0xd26   :  { %v17787_v7 = vpop.eup %15165 }
 0xd27   :  { %v9918_v61 = vsel %vm2997_vm4, %v17787_v7, 0.0 }
 0xd2a   :  { %v17793_v19 = vpop.eup %15167 }
 0xd2b   :  { %v9924_v41 = vsel %vm2997_vm4, %v17793_v19, 0.0 }
 0xd2e   :  { %v17797_v39 = vpop.eup %15169 }
 0xd2f   :  { %v9930_v2 = vsel %vm2997_vm4, %v17797_v39, 0.0 }
 0xd31   :  { %9913 = vadd.xlane.f32.xlu0 %v9912_v5  ;;  %v17804_v5 = vpop.eup %15171 }
 0xd32   :  { %12302 = vrot.lane.b32.xlu1 %v17329_v59, %s15356_s18  ;;  %v9737_v59 = vpop.xlane.xlu1 %9736  ;;  %v9921_v24 = vsel %vm2997_vm4, %v17804_v5, 0.0 }
 0xd33   :  { %v9819_v17 = vsub.f32 %v17605_v1, %v9737_v59 }
 0xd35   :  { %9919 = vadd.xlane.f32.xlu0 %v9918_v61  ;;  %v9857_v50 = vmul.f32 1.442695, %v9819_v17 }
 0xd37   :  { %15173 = vpow2.f32 %v9857_v50 }
 0xd39   :  { %9925 = vadd.xlane.f32.xlu0 %v9924_v41 }
 0xd3d   :  { %9931 = vadd.xlane.f32.xlu0 %v9930_v2 }
 0xd44   :  { %v17809_v15 = vpop.eup %15173 }
 0xd50   :  { %v9743_v55 = vpop.xlane.xlu1 %9742 }
 0xd51   :  { %v9821_v37 = vsub.f32 %v17625_v52, %v9743_v55  ;;  %v9927_v52 = vsel %vm2997_vm4, %v17809_v15, 0.0 }
 0xd52   :  { %v9746_v61 = vpop.xlane.xlu0 %9745 }
 0xd53   :  { %v9861_v41 = vmul.f32 1.442695, %v9821_v37  ;;  %v9822_v0 = vsub.f32 %v17627_v9, %v9746_v61 }
 0xd55   :  { %15175 = vpow2.f32 %v9861_v41  ;;  %v9863_v25 = vmul.f32 1.442695, %v9822_v0 }
 0xd56   :  { %9922 = vadd.xlane.f32.xlu1 %v9921_v24 }
 0xd57   :  { %15177 = vpow2.f32 %v9863_v25 }
 0xd58   :  { %v9749_v1 = vpop.xlane.xlu1 %9748 }
 0xd59   :  { %v9823_v2 = vsub.f32 %v17637_v31, %v9749_v1 }
 0xd5a   :  { %9928 = vadd.xlane.f32.xlu1 %v9927_v52 }
 0xd5b   :  { %v9865_v44 = vmul.f32 1.442695, %v9823_v2 }
 0xd5c   :  { %v9752_v59 = vpop.xlane.xlu0 %9751  ;;  %v9755_v21 = vpop.xlane.xlu1 %9754 }
 0xd5d   :  { %15179 = vpow2.f32 %v9865_v44  ;;  %v9824_v9 = vsub.f32 %v17647_v20, %v9752_v59  ;;  %v9825_v0 = vsub.f32 %v17645_v60, %v9755_v21 }
 0xd5f   :  { %v9867_v17 = vmul.f32 1.442695, %v9824_v9  ;;  %v9869_v50 = vmul.f32 1.442695, %v9825_v0 }
 0xd60   :  { %v9758_v55 = vpop.xlane.xlu0 %9757  ;;  %v9761_v37 = vpop.xlane.xlu1 %9760 }
 0xd61   :  { %15181 = vpow2.f32 %v9867_v17  ;;  %v9826_v25 = vsub.f32 %v17657_v47, %v9758_v55  ;;  %v9827_v31 = vsub.f32 %v17655_v30, %v9761_v37 }
 0xd62   :  { %v17818_v61 = vpop.eup %15175  ;;  %15183 = vpow2.f32 %v9869_v50 }
 0xd63   :  { %v9871_v41 = vmul.f32 1.442695, %v9826_v25  ;;  %v9873_v24 = vmul.f32 1.442695, %v9827_v31  ;;  %v9933_v1 = vsel %vm2997_vm4, %v17818_v61, 0.0 }
 0xd64   :  { %v17822_v20 = vpop.eup %15177  ;;  %v9764_v60 = vpop.xlane.xlu0 %9763  ;;  %9934 = vadd.xlane.f32.xlu1 %v9933_v1 }
 0xd65   :  { %v9767_v2 = vpop.xlane.xlu1 %9766  ;;  %15185 = vpow2.f32 %v9871_v41  ;;  %v9828_v52 = vsub.f32 %v17667_v36, %v9764_v60  ;;  %v9936_v30 = vsel %vm2997_vm4, %v17822_v20, 0.0 }
 0xd66   :  { %v9829_v47 = vsub.f32 %v17665_v3, %v9767_v2  ;;  %15187 = vpow2.f32 %v9873_v24  ;;  %9937 = vadd.xlane.f32.xlu0 %v9936_v30 }
 0xd67   :  { %v9875_v44 = vmul.f32 1.442695, %v9828_v52 }
 0xd68   :  { %v9877_v59 = vmul.f32 1.442695, %v9829_v47  ;;  %v9770_v21 = vpop.xlane.xlu0 %9769 }
 0xd69   :  { %v9773_v9 = vpop.xlane.xlu1 %9772  ;;  %15189 = vpow2.f32 %v9875_v44  ;;  %v9830_v0 = vsub.f32 %v17679_v8, %v9770_v21 }
 0xd6a   :  { %v9831_v17 = vsub.f32 %v17677_v10, %v9773_v9  ;;  %v17830_v50 = vpop.eup %15179  ;;  %15191 = vpow2.f32 %v9877_v59 }
 0xd6b   :  { %v9879_v36 = vmul.f32 1.442695, %v9830_v0  ;;  %v9939_v3 = vsel %vm2997_vm4, %v17830_v50, 0.0 }
 0xd6c   :  { %v9881_v55 = vmul.f32 1.442695, %v9831_v17  ;;  %v9776_v37 = vpop.xlane.xlu0 %9775  ;;  %9940 = vadd.xlane.f32.xlu1 %v9939_v3 }
 0xd6d   :  { %v9779_v25 = vpop.xlane.xlu1 %9778  ;;  %15193 = vpow2.f32 %v9879_v36  ;;  %v9832_v31 = vsub.f32 %v17689_v46, %v9776_v37 }
 0xd6e   :  { %v9833_v41 = vsub.f32 %v17687_v27, %v9779_v25  ;;  %v17836_v24 = vpop.eup %15181  ;;  %15195 = vpow2.f32 %v9881_v55 }
 0xd6f   :  { %v17838_v10 = vpop.eup %15183  ;;  %v9883_v8 = vmul.f32 1.442695, %v9832_v31  ;;  %v9942_v60 = vsel %vm2997_vm4, %v17836_v24, 0.0 }
 0xd70   :  { %v9885_v1 = vmul.f32 1.442695, %v9833_v41  ;;  %v9782_v2 = vpop.xlane.xlu0 %9781  ;;  %9943 = vadd.xlane.f32.xlu0 %v9942_v60  ;;  %v9945_v52 = vsel %vm2997_vm4, %v17838_v10, 0.0 }
 0xd71   :  { %v9785_v47 = vpop.xlane.xlu1 %9784  ;;  %15197 = vpow2.f32 %v9883_v8  ;;  %v9834_v46 = vsub.f32 %v17699_v40, %v9782_v2  ;;  %9946 = vadd.xlane.f32.xlu1 %v9945_v52 }
 0xd72   :  { %v9835_v27 = vsub.f32 %v17697_v12, %v9785_v47  ;;  %v17846_v30 = vpop.eup %15185  ;;  %15199 = vpow2.f32 %v9885_v1 }
 0xd73   :  { %v17848_v44 = vpop.eup %15187  ;;  %v9887_v59 = vmul.f32 1.442695, %v9834_v46  ;;  %v9948_v9 = vsel %vm2997_vm4, %v17846_v30, 0.0 }
 0xd74   :  { %v9889_v21 = vmul.f32 1.442695, %v9835_v27  ;;  %v9788_v0 = vpop.xlane.xlu0 %9787  ;;  %9949 = vadd.xlane.f32.xlu0 %v9948_v9  ;;  %v9951_v17 = vsel %vm2997_vm4, %v17848_v44, 0.0 }
 0xd75   :  { %v9791_v36 = vpop.xlane.xlu1 %9790  ;;  %15201 = vpow2.f32 %v9887_v59  ;;  %v9836_v40 = vsub.f32 %v17711_v6, %v9788_v0  ;;  %9952 = vadd.xlane.f32.xlu1 %v9951_v17 }
 0xd76   :  { %v9837_v12 = vsub.f32 %v17709_v18, %v9791_v36  ;;  %v17856_v55 = vpop.eup %15189  ;;  %15203 = vpow2.f32 %v9889_v21 }
 0xd77   :  { %v17858_v3 = vpop.eup %15191  ;;  %v9891_v37 = vmul.f32 1.442695, %v9836_v40  ;;  %v9954_v31 = vsel %vm2997_vm4, %v17856_v55, 0.0 }
 0xd78   :  { %v9893_v25 = vmul.f32 1.442695, %v9837_v12  ;;  %9955 = vadd.xlane.f32.xlu0 %v9954_v31  ;;  %v9957_v41 = vsel %vm2997_vm4, %v17858_v3, 0.0 }
 0xd79   :  { %v9797_v8 = vpop.xlane.xlu1 %9796  ;;  %15205 = vpow2.f32 %v9891_v37  ;;  %v9794_v6 = vpop.xlane.xlu0 %9793  ;;  %9958 = vadd.xlane.f32.xlu1 %v9957_v41 }
 0xd7a   :  { %v9839_v18 = vsub.f32 %v17717_v62, %v9797_v8  ;;  %v17865_v1 = vpop.eup %15193  ;;  %15207 = vpow2.f32 %v9893_v25  ;;  %v9838_v60 = vsub.f32 %v17721_v38, %v9794_v6 }
 0xd7b   :  { %v17868_v2 = vpop.eup %15195  ;;  %v9960_v47 = vsel %vm2997_vm4, %v17865_v1, 0.0 }
 0xd7c   :  { %v9897_v52 = vmul.f32 1.442695, %v9839_v18  ;;  %v9895_v46 = vmul.f32 1.442695, %v9838_v60  ;;  %9961 = vadd.xlane.f32.xlu0 %v9960_v47  ;;  %v9963_v27 = vsel %vm2997_vm4, %v17868_v2, 0.0 }
 0xd7d   :  { %v9803_v59 = vpop.xlane.xlu1 %9802  ;;  %v9800_v21 = vpop.xlane.xlu0 %9799  ;;  %9964 = vadd.xlane.f32.xlu1 %v9963_v27 }
 0xd7e   :  { %15209 = vpow2.f32 %v9897_v52  ;;  %v9841_v62 = vsub.f32 %v17729_v49, %v9803_v59  ;;  %v17875_v9 = vpop.eup %15197  ;;  %v9840_v38 = vsub.f32 %v17731_v13, %v9800_v21 }
 0xd7f   :  { %15211 = vpow2.f32 %v9895_v46  ;;  %v17878_v0 = vpop.eup %15199  ;;  %v9966_v36 = vsel %vm2997_vm4, %v17875_v9, 0.0 }
 0xd80   :  { %v9901_v17 = vmul.f32 1.442695, %v9841_v62  ;;  %v9899_v40 = vmul.f32 1.442695, %v9840_v38  ;;  %9967 = vadd.xlane.f32.xlu0 %v9966_v36  ;;  %v9969_v12 = vsel %vm2997_vm4, %v17878_v0, 0.0 }
 0xd81   :  { %v9806_v37 = vpop.xlane.xlu0 %9805  ;;  %9970 = vadd.xlane.f32.xlu1 %v9969_v12 }
 0xd82   :  { %15213 = vpow2.f32 %v9901_v17  ;;  %v17884_v49 = vpop.eup %15201  ;;  %v9842_v25 = vsub.f32 %v17741_v34, %v9806_v37 }
 0xd83   :  { %15215 = vpow2.f32 %v9899_v40  ;;  %v17887_v13 = vpop.eup %15203  ;;  %v9972_v31 = vsel %vm2997_vm4, %v17884_v49, 0.0 }
 0xd84   :  { %v9903_v41 = vmul.f32 1.442695, %v9842_v25  ;;  %9973 = vadd.xlane.f32.xlu0 %v9972_v31  ;;  %v9975_v8 = vsel %vm2997_vm4, %v17887_v13, 0.0 }
 0xd85   :  { %v9812_v6 = vpop.xlane.xlu0 %9811  ;;  %9976 = vadd.xlane.f32.xlu1 %v9975_v8 }
 0xd86   :  { %v17893_v18 = vpop.eup %15205  ;;  %15217 = vpow2.f32 %v9903_v41  ;;  %v9844_v60 = vsub.f32 %v17747_v23, %v9812_v6 }
 0xd87   :  { %v17896_v52 = vpop.eup %15207  ;;  %v9978_v34 = vsel %vm2997_vm4, %v17893_v18, 0.0 }
 0xd88   :  { %v9907_v47 = vmul.f32 1.442695, %v9844_v60  ;;  %9979 = vadd.xlane.f32.xlu0 %v9978_v34  ;;  %v9981_v46 = vsel %vm2997_vm4, %v17896_v52, 0.0 }
 0xd89   :  { %9982 = vadd.xlane.f32.xlu1 %v9981_v46 }
 0xd8a   :  { %15219 = vpow2.f32 %v9907_v47 }
 0xd8b   :  { %v17902_v27 = vpop.eup %15209 }
 0xd8c   :  { %v17904_v59 = vpop.eup %15211  ;;  %v9987_v21 = vsel %vm2997_vm4, %v17902_v27, 0.0 }
 0xd8d   :  { %v9984_v23 = vsel %vm2997_vm4, %v17904_v59, 0.0  ;;  %9988 = vadd.xlane.f32.xlu1 %v9987_v21 }
 0xd8e   :  { %9985 = vadd.xlane.f32.xlu0 %v9984_v23 }
 0xd8f   :  { %v17910_v62 = vpop.eup %15213 }
 0xd90   :  { %v17912_v38 = vpop.eup %15215  ;;  %v9993_v17 = vsel %vm2997_vm4, %v17910_v62, 0.0 }
 0xd91   :  { %v9990_v36 = vsel %vm2997_vm4, %v17912_v38, 0.0  ;;  %9994 = vadd.xlane.f32.xlu1 %v9993_v17 }
 0xd92   :  { %9991 = vadd.xlane.f32.xlu0 %v9990_v36 }
 0xd93   :  { %v17918_v40 = vpop.eup %15217 }
 0xd94   :  { %v9996_v12 = vsel %vm2997_vm4, %v17918_v40, 0.0 }
 0xd96   :  { %9997 = vadd.xlane.f32.xlu0 %v9996_v12 }
 0xd97   :  { %v17922_v37 = vpop.eup %15219 }
 0xd98   :  { %v10002_v25 = vsel %vm2997_vm4, %v17922_v37, 0.0 }
 0xd9a   :  { %10003 = vadd.xlane.f32.xlu0 %v10002_v25 }
 0xda2   :  { %v9911_v31 = vpop.xlane.xlu1 %9910 }
 0xda3   :  { %15221 = vrcp.f32 %v9911_v31 }
 0xda6   :  { %v9809_v41 = vpop.xlane.xlu1 %9808 }
 0xda7   :  { %v9843_v8 = vsub.f32 %v17769_v16, %v9809_v41  ;;  %v17936_v16 = vpop.permute.xlu0 %12225 }
 0xda9   :  { %v9905_v6 = vmul.f32 1.442695, %v9843_v8 }
 0xdaa   :  { %v9917_v60 = vpop.xlane.xlu1 %9916 }
 0xdab   :  { %15223 = vpow2.f32 %v9905_v6 }
 0xdac   :  { %15225 = vrcp.f32 %v9917_v60 }
 0xdb0   :  { %12379 = vrot.lane.b32.xlu0 %v17325_v45, %s15356_s18  ;;  %v15222_v34 = vpop.eup %15221 }
 0xdb1   :  { %v10037_v47 = vmul.f32 %v15222_v34, %v17767_v32 }
 0xdb3   :  { %14778 = vmatmul.mubr.msk.f32.vlgmr.msra.gmra.mxu0 %vm3352_vm5, %v10037_v47 }
 0xdb4   :  { %14786 = vmatpush3.msk.msra.mxu0 %vm3356_vm3, %v17621_v48  ;;  %14787 = vmatprep.mubr.msk.f32.mxu0 %vm15353_vm1, %v18565_v26 }
 0xdb5   :  { %14795 = vmatprep.subr.mxu0 %v18565_v26 }
 0xdb8   :  { %v17938_v46 = vpop.eup %15223 }
 0xdb9   :  { %v15226_v21 = vpop.eup %15225  ;;  %v9999_v45 = vsel %vm2997_vm4, %v17938_v46, 0.0 }
 0xdba   :  { %v9914_v23 = vpop.xlane.xlu0 %9913  ;;  %10000 = vadd.xlane.f32.xlu1 %v9999_v45  ;;  %v10039_v32 = vmul.f32 %v15226_v21, %v17777_v53 }
 0xdbb   :  { %15227 = vrcp.f32 %v9914_v23 }
 0xdbc   :  { %14788 = vmatmul.mubr.msk.f32.vlgmr.msra.gmra.mxu0 %vm3352_vm5, %v10039_v32 }
 0xdbd   :  { %14796 = vmatpush3.msk.msra.mxu0 %vm3356_vm3, %v17631_v63  ;;  %14797 = vmatprep.mubr.msk.f32.mxu0 %vm15353_vm1, %v18565_v26 }
 0xdbe   :  { %v9920_v48 = vpop.xlane.xlu0 %9919  ;;  %14805 = vmatprep.subr.mxu0 %v18565_v26 }
 0xdbf   :  { %15229 = vrcp.f32 %v9920_v48 }
 0xdc2   :  { %v9926_v17 = vpop.xlane.xlu0 %9925 }
 0xdc3   :  { %15231 = vrcp.f32 %v9926_v17 }
 0xdc6   :  { %v9932_v36 = vpop.xlane.xlu0 %9931 }
 0xdc7   :  { %15233 = vrcp.f32 %v9932_v36 }
 0xdc8   :  { %v15228_v12 = vpop.eup %15227 }
 0xdc9   :  { %v10038_v53 = vmul.f32 %v15228_v12, %v17783_v33 }
 0xdcb   :  { %14783 = vmatmul.mubr.msk.f32.vlgmr.msra.gmra.mxu1 %vm3352_vm5, %v10038_v53  ;;  %12456 = vrot.lane.b32.xlu1 %v17340_v22, %s15356_s18  ;;  %s13589_s18 = sshll.u32 %s15360_s17, 4  ;;  %s13590_s18 = int_to_ptr.vmem [resolvable:$true] %s13589_s18 }
 0xdcc   :  { %v15230_v63 = vpop.eup %15229  ;;  %14791 = vmatpush3.msk.msra.mxu1 %vm3356_vm3, %v17619_v57  ;;  %14792 = vmatprep.mubr.msk.f32.mxu1 %vm15353_vm1, %v18565_v26  ;;  %p15332_p1 = scmp.lt.s32.totalorder %s13590_s18, %s13590_s18 }
 0xdcd   :  { %14800 = vmatprep.subr.mxu1 %v18565_v26  ;;  %v10040_v25 = vmul.f32 %v15230_v63, %v17787_v7 }
 0xdcf   :  { %14793 = vmatmul.mubr.msk.f32.vlgmr.msra.gmra.mxu1 %vm3352_vm5, %v10040_v25 }
 0xdd0   :  { %v15232_v31 = vpop.eup %15231  ;;  %14801 = vmatpush3.msk.msra.mxu1 %vm3356_vm3, %v17623_v42  ;;  %14802 = vmatprep.mubr.msk.f32.mxu1 %vm15353_vm1, %v18565_v26  ;;  %v17979_v42 = vpop.permute.xlu1 %12302 }
 0xdd1   :  { %14810 = vmatprep.subr.mxu1 %v18565_v26  ;;  %v10042_v22 = vmul.f32 %v15232_v31, %v17793_v19 }
 0xdd3   :  { %14803 = vmatmul.mubr.msk.f32.vlgmr.msra.gmra.mxu1 %vm3352_vm5, %v10042_v22 }
 0xdd4   :  { %v15234_v57 = vpop.eup %15233  ;;  %14811 = vmatpush3.msk.msra.mxu1 %vm3356_vm3, %v17635_v56  ;;  %14812 = vmatprep.mubr.msk.f32.mxu1 %vm15353_vm1, %v18565_v26 }
 0xdd5   :  { %v10044_v33 = vmul.f32 %v15234_v57, %v17797_v39  ;;  %14820 = vmatprep.subr.mxu1 %v18565_v26 }
 0xdd7   :  { %14813 = vmatmul.mubr.msk.f32.vlgmr.msra.gmra.mxu1 %vm3352_vm5, %v10044_v33  ;;  %v18608_v33 = vld [vmem:[#allocation19_spill] sm:$0xff] }
 0xdd8   :  { %14821 = vmatpush3.msk.msra.mxu1 %vm3356_vm3, %v17643_v58  ;;  %14822 = vmatprep.mubr.msk.f32.mxu1 %vm15353_vm1, %v18565_v26 }
 0xdd9   :  { %14830 = vmatprep.subr.mxu1 %v18565_v26 }
 0xddf   :  { %v9923_v56 = vpop.xlane.xlu1 %9922 }
 0xde0   :  { %15235 = vrcp.f32 %v9923_v56 }
 0xde3   :  { %v9929_v7 = vpop.xlane.xlu1 %9928 }
 0xde4   :  { %15237 = vrcp.f32 %v9929_v7 }
 0xded   :  { %v15236_v19 = vpop.eup %15235  ;;  %v9935_v39 = vpop.xlane.xlu1 %9934 }
 0xdee   :  { %15239 = vrcp.f32 %v9935_v39  ;;  %v10041_v41 = vmul.f32 %v15236_v19, %v17804_v5  ;;  %v18609_v39 = vld [vmem:[#allocation22_spill] sm:$0xff] }
 0xdef   :  { %v9938_v8 = vpop.xlane.xlu0 %9937 }
 0xdf0   :  { %15241 = vrcp.f32 %v9938_v8  ;;  %14798 = vmatmul.mubr.msk.f32.vlgmr.msra.gmra.mxu0 %vm3352_vm5, %v10041_v41  ;;  %v18610_v8 = vld [vmem:[#allocation20_spill] sm:$0xff] }
 0xdf1   :  { %v15238_v58 = vpop.eup %15237  ;;  %14806 = vmatpush3.msk.msra.mxu0 %vm3356_vm3, %v17639_v11  ;;  %14807 = vmatprep.mubr.msk.f32.mxu0 %vm15353_vm1, %v18565_v26 }
 0xdf2   :  { %14815 = vmatprep.subr.mxu0 %v18565_v26  ;;  %v10043_v6 = vmul.f32 %v15238_v58, %v17809_v15 }
 0xdf4   :  { %14808 = vmatmul.mubr.msk.f32.vlgmr.msra.gmra.mxu0 %vm3352_vm5, %v10043_v6 }
 0xdf5   :  { %14816 = vmatpush3.msk.msra.mxu0 %vm3356_vm3, %v17653_v14  ;;  %v9941_v5 = vpop.xlane.xlu1 %9940  ;;  %14817 = vmatprep.mubr.msk.f32.mxu0 %vm15353_vm1, %v18565_v26 }
 0xdf6   :  { %15243 = vrcp.f32 %v9941_v5  ;;  %14825 = vmatprep.subr.mxu0 %v18565_v26 }
 0xdf9   :  { %v9944_v11 = vpop.xlane.xlu0 %9943 }
 0xdfa   :  { %15245 = vrcp.f32 %v9944_v11  ;;  %v9947_v60 = vpop.xlane.xlu1 %9946  ;;  %v18611_v11 = vld [vmem:[#allocation21_spill] sm:$0xff] }
 0xdfb   :  { %v15240_v34 = vpop.eup %15239  ;;  %15247 = vrcp.f32 %v9947_v60 }
 0xdfc   :  { %v10045_v47 = vmul.f32 %v15240_v34, %v17818_v61  ;;  %v18612_v34 = vld [vmem:[#allocation17_spill] sm:$0xff] }
 0xdfd   :  { %v15242_v15 = vpop.eup %15241  ;;  %v9950_v21 = vpop.xlane.xlu0 %9949 }
 0xdfe   :  { %v10046_v45 = vmul.f32 %v15242_v15, %v17822_v20  ;;  %15249 = vrcp.f32 %v9950_v21  ;;  %v9953_v14 = vpop.xlane.xlu1 %9952  ;;  %14818 = vmatmul.mubr.msk.f32.vlgmr.msra.gmra.mxu0 %vm3352_vm5, %v10045_v47  ;;  %v18613_v21 = vld [vmem:[#allocation23_spill] sm:$0xff] }
 0xdff   :  { %15251 = vrcp.f32 %v9953_v14  ;;  %14826 = vmatpush3.msk.msra.mxu0 %vm3356_vm3, %v17669_v43  ;;  %14827 = vmatprep.mubr.msk.f32.mxu0 %vm15353_vm1, %v18565_v26  ;;  %v18614_v14 = vld [vmem:[#allocation18_spill] sm:$0xff] }
 0xe00   :  { %14823 = vmatmul.mubr.msk.f32.vlgmr.msra.gmra.mxu1 %vm3352_vm5, %v10046_v45  ;;  %14835 = vmatprep.subr.mxu0 %v18565_v26 }
 0xe01   :  { %14831 = vmatpush3.msk.msra.mxu1 %vm3356_vm3, %v17749_v54  ;;  %v9956_v61 = vpop.xlane.xlu0 %9955  ;;  %14832 = vmatprep.mubr.msk.f32.mxu1 %vm15353_vm1, %v18565_v26 }
 0xe02   :  { %15253 = vrcp.f32 %v9956_v61  ;;  %v9959_v20 = vpop.xlane.xlu1 %9958  ;;  %14840 = vmatprep.subr.mxu1 %v18565_v26 }
 0xe03   :  { %v15244_v23 = vpop.eup %15243  ;;  %15255 = vrcp.f32 %v9959_v20 }
 0xe04   :  { %v10047_v43 = vmul.f32 %v15244_v23, %v17830_v50  ;;  %v18616_v23 = vld [vmem:[#allocation12_spill] sm:$0xff] }
 0xe05   :  { %v9962_v32 = vpop.xlane.xlu0 %9961 }
 0xe06   :  { %15257 = vrcp.f32 %v9962_v32  ;;  %v9965_v48 = vpop.xlane.xlu1 %9964  ;;  %14828 = vmatmul.mubr.msk.f32.vlgmr.msra.gmra.mxu0 %vm3352_vm5, %v10047_v43 }
 0xe07   :  { %v15246_v17 = vpop.eup %15245  ;;  %15259 = vrcp.f32 %v9965_v48  ;;  %14836 = vmatpush3.msk.msra.mxu0 %vm3356_vm3, %v17685_v35  ;;  %14837 = vmatprep.mubr.msk.f32.mxu0 %vm15353_vm1, %v18565_v26 }
 0xe08   :  { %v15248_v54 = vpop.eup %15247  ;;  %v10048_v36 = vmul.f32 %v15246_v17, %v17836_v24  ;;  %14845 = vmatprep.subr.mxu0 %v18565_v26 }
 0xe09   :  { %v9968_v12 = vpop.xlane.xlu0 %9967  ;;  %v10049_v50 = vmul.f32 %v15248_v54, %v17838_v10  ;;  %v18617_v54 = vld [vmem:[#allocation25_spill] sm:$0xff] }
 0xe0a   :  { %15261 = vrcp.f32 %v9968_v12  ;;  %v9971_v53 = vpop.xlane.xlu1 %9970  ;;  %14833 = vmatmul.mubr.msk.f32.vlgmr.msra.gmra.mxu1 %vm3352_vm5, %v10048_v36 }
 0xe0b   :  { %v15250_v63 = vpop.eup %15249  ;;  %15263 = vrcp.f32 %v9971_v53  ;;  %14838 = vmatmul.mubr.msk.f32.vlgmr.msra.gmra.mxu0 %vm3352_vm5, %v10049_v50  ;;  %14841 = vmatpush3.msk.msra.mxu1 %vm3356_vm3, %v17659_v51 }
 0xe0c   :  { %v15252_v35 = vpop.eup %15251  ;;  %v10050_v25 = vmul.f32 %v15250_v63, %v17846_v30  ;;  %14846 = vmatpush3.msk.msra.mxu0 %vm3356_vm3, %v17701_v28  ;;  %14842 = vmatprep.mubr.msk.f32.mxu1 %vm15353_vm1, %v18565_v26 }
 0xe0d   :  { %14850 = vmatprep.subr.mxu1 %v18565_v26  ;;  %v9974_v24 = vpop.xlane.xlu0 %9973  ;;  %14847 = vmatprep.mubr.msk.f32.mxu0 %vm15353_vm1, %v18565_v26  ;;  %v10051_v10 = vmul.f32 %v15252_v35, %v17848_v44 }
 0xe0e   :  { %15265 = vrcp.f32 %v9974_v24  ;;  %14855 = vmatprep.subr.mxu0 %v18565_v26  ;;  %v9977_v51 = vpop.xlane.xlu1 %9976  ;;  %14843 = vmatmul.mubr.msk.f32.vlgmr.msra.gmra.mxu1 %vm3352_vm5, %v10050_v25 }
 0xe0f   :  { %v15254_v30 = vpop.eup %15253  ;;  %15267 = vrcp.f32 %v9977_v51  ;;  %14848 = vmatmul.mubr.msk.f32.vlgmr.msra.gmra.mxu0 %vm3352_vm5, %v10051_v10  ;;  %14851 = vmatpush3.msk.msra.mxu1 %vm3356_vm3, %v17675_v4 }
 0xe10   :  { %v15256_v28 = vpop.eup %15255  ;;  %v10052_v31 = vmul.f32 %v15254_v30, %v17856_v55  ;;  %14856 = vmatpush3.msk.msra.mxu0 %vm3356_vm3, %v17719_v29  ;;  %14852 = vmatprep.mubr.msk.f32.mxu1 %vm15353_vm1, %v18565_v26  ;;  %v18607_v29 = vld [vmem:[#allocation15_spill] sm:$0xff] }
 0xe11   :  { %v10053_v44 = vmul.f32 %v15256_v28, %v17858_v3  ;;  %14860 = vmatprep.subr.mxu1 %v18565_v26  ;;  %v9980_v22 = vpop.xlane.xlu0 %9979  ;;  %14857 = vmatprep.mubr.msk.f32.mxu0 %vm15353_vm1, %v18565_v26 }
 0xe12   :  { %15269 = vrcp.f32 %v9980_v22  ;;  %14865 = vmatprep.subr.mxu0 %v18565_v26  ;;  %v9983_v4 = vpop.xlane.xlu1 %9982  ;;  %14853 = vmatmul.mubr.msk.f32.vlgmr.msra.gmra.mxu1 %vm3352_vm5, %v10052_v31 }
 0xe13   :  { %v15258_v55 = vpop.eup %15257  ;;  %15271 = vrcp.f32 %v9983_v4  ;;  %14858 = vmatmul.mubr.msk.f32.vlgmr.msra.gmra.mxu0 %vm3352_vm5, %v10053_v44  ;;  %14861 = vmatpush3.msk.msra.mxu1 %vm3356_vm3, %v18607_v29 }
 0xe14   :  { %v15260_v3 = vpop.eup %15259  ;;  %v10054_v57 = vmul.f32 %v15258_v55, %v17865_v1  ;;  %14866 = vmatpush3.msk.msra.mxu0 %vm3356_vm3, %v18608_v33  ;;  %14862 = vmatprep.mubr.msk.f32.mxu1 %vm15353_vm1, %v18565_v26 }
 0xe15   :  { %v10055_v56 = vmul.f32 %v15260_v3, %v17868_v2  ;;  %14870 = vmatprep.subr.mxu1 %v18565_v26  ;;  %14867 = vmatprep.mubr.msk.f32.mxu0 %vm15353_vm1, %v18565_v26 }
 0xe16   :  { %14875 = vmatprep.subr.mxu0 %v18565_v26  ;;  %v9989_v19 = vpop.xlane.xlu1 %9988  ;;  %14863 = vmatmul.mubr.msk.f32.vlgmr.msra.gmra.mxu1 %vm3352_vm5, %v10054_v57 }
 0xe17   :  { %v9986_v7 = vpop.xlane.xlu0 %9985  ;;  %v15262_v1 = vpop.eup %15261  ;;  %14868 = vmatmul.mubr.msk.f32.vlgmr.msra.gmra.mxu0 %vm3352_vm5, %v10055_v56  ;;  %14871 = vmatpush3.msk.msra.mxu1 %vm3356_vm3, %v18609_v39 }
 0xe18   :  { %15273 = vrcp.f32 %v9986_v7  ;;  %v15264_v41 = vpop.eup %15263  ;;  %v10056_v2 = vmul.f32 %v15262_v1, %v17875_v9  ;;  %14876 = vmatpush3.msk.msra.mxu0 %vm3356_vm3, %v18610_v8  ;;  %14872 = vmatprep.mubr.msk.f32.mxu1 %vm15353_vm1, %v18565_v26 }
 0xe19   :  { %15275 = vrcp.f32 %v9989_v19  ;;  %v10057_v58 = vmul.f32 %v15264_v41, %v17878_v0  ;;  %14880 = vmatprep.subr.mxu1 %v18565_v26  ;;  %14877 = vmatprep.mubr.msk.f32.mxu0 %vm15353_vm1, %v18565_v26 }
 0xe1a   :  { %14885 = vmatprep.subr.mxu0 %v18565_v26  ;;  %v9995_v5 = vpop.xlane.xlu1 %9994  ;;  %14873 = vmatmul.mubr.msk.f32.vlgmr.msra.gmra.mxu1 %vm3352_vm5, %v10056_v2 }
 0xe1b   :  { %v9992_v6 = vpop.xlane.xlu0 %9991  ;;  %v15266_v9 = vpop.eup %15265  ;;  %14878 = vmatmul.mubr.msk.f32.vlgmr.msra.gmra.mxu0 %vm3352_vm5, %v10057_v58  ;;  %14881 = vmatpush3.msk.msra.mxu1 %vm3356_vm3, %v18611_v11 }
 0xe1c   :  { %15277 = vrcp.f32 %v9992_v6  ;;  %v15268_v60 = vpop.eup %15267  ;;  %v10058_v0 = vmul.f32 %v15266_v9, %v17884_v49  ;;  %14886 = vmatpush3.msk.msra.mxu0 %vm3356_vm3, %v18612_v34  ;;  %14882 = vmatprep.mubr.msk.f32.mxu1 %vm15353_vm1, %v18565_v26 }
 0xe1d   :  { %15279 = vrcp.f32 %v9995_v5  ;;  %v10059_v47 = vmul.f32 %v15268_v60, %v17887_v13  ;;  %14890 = vmatprep.subr.mxu1 %v18565_v26  ;;  %14887 = vmatprep.mubr.msk.f32.mxu0 %vm15353_vm1, %v18565_v26 }
 0xe1e   :  { %14895 = vmatprep.subr.mxu0 %v18565_v26  ;;  %14883 = vmatmul.mubr.msk.f32.vlgmr.msra.gmra.mxu1 %vm3352_vm5, %v10058_v0 }
 0xe1f   :  { %v9998_v15 = vpop.xlane.xlu0 %9997  ;;  %v15270_v49 = vpop.eup %15269  ;;  %14888 = vmatmul.mubr.msk.f32.vlgmr.msra.gmra.mxu0 %vm3352_vm5, %v10059_v47  ;;  %14891 = vmatpush3.msk.msra.mxu1 %vm3356_vm3, %v18613_v21 }
 0xe20   :  { %15281 = vrcp.f32 %v9998_v15  ;;  %v15272_v45 = vpop.eup %15271  ;;  %v10060_v13 = vmul.f32 %v15270_v49, %v17893_v18  ;;  %14896 = vmatpush3.msk.msra.mxu0 %vm3356_vm3, %v18614_v14  ;;  %14892 = vmatprep.mubr.msk.f32.mxu1 %vm15353_vm1, %v18565_v26  ;;  %v18615_v18 = vld [vmem:[#allocation24_spill] sm:$0xff] }
 0xe21   :  { %v10061_v61 = vmul.f32 %v15272_v45, %v17896_v52  ;;  %14900 = vmatprep.subr.mxu1 %v18565_v26  ;;  %14897 = vmatprep.mubr.msk.f32.mxu0 %vm15353_vm1, %v18565_v26 }
 0xe22   :  { %14905 = vmatprep.subr.mxu0 %v18565_v26  ;;  %14893 = vmatmul.mubr.msk.f32.vlgmr.msra.gmra.mxu1 %vm3352_vm5, %v10060_v13 }
 0xe23   :  { %14898 = vmatmul.mubr.msk.f32.vlgmr.msra.gmra.mxu0 %vm3352_vm5, %v10061_v61  ;;  %14901 = vmatpush3.msk.msra.mxu1 %vm3356_vm3, %v18615_v18  ;;  %v10004_v48 = vpop.xlane.xlu0 %10003 }
 0xe24   :  { %14906 = vmatpush3.msk.msra.mxu0 %vm3356_vm3, %v18616_v23  ;;  %14902 = vmatprep.mubr.msk.f32.mxu1 %vm15353_vm1, %v18565_v26  ;;  %15283 = vrcp.f32 %v10004_v48 }
 0xe25   :  { %v15274_v20 = vpop.eup %15273  ;;  %14910 = vmatprep.subr.mxu1 %v18565_v26  ;;  %14907 = vmatprep.mubr.msk.f32.mxu0 %vm15353_vm1, %v18565_v26 }
 0xe26   :  { %v15276_v52 = vpop.eup %15275  ;;  %v10062_v43 = vmul.f32 %v15274_v20, %v17904_v59  ;;  %14915 = vmatprep.subr.mxu0 %v18565_v26 }
 0xe27   :  { %v10063_v32 = vmul.f32 %v15276_v52, %v17902_v27  ;;  %v12380_v50 = vpop.permute.xlu0 %12379 }
 0xe28   :  { %14903 = vmatmul.mubr.msk.f32.vlgmr.msra.gmra.mxu1 %vm3352_vm5, %v10062_v43 }
 0xe29   :  { %v15278_v17 = vpop.eup %15277  ;;  %14908 = vmatmul.mubr.msk.f32.vlgmr.msra.gmra.mxu0 %vm3352_vm5, %v10063_v32  ;;  %14911 = vmatpush3.msk.msra.mxu1 %vm3356_vm3, %v18617_v54 }
 0xe2a   :  { %v15280_v36 = vpop.eup %15279  ;;  %v10064_v59 = vmul.f32 %v15278_v17, %v17912_v38  ;;  %14916 = vmatpush3.msk.msra.mxu0 %vm3356_vm3, %v17936_v16  ;;  %14912 = vmatprep.mubr.msk.f32.mxu1 %vm15353_vm1, %v18565_v26 }
 0xe2b   :  { %v10065_v27 = vmul.f32 %v15280_v36, %v17910_v62  ;;  %14917 = vmatprep.mubr.msk.f32.mxu0 %vm15353_vm1, %v18565_v26  ;;  %14920 = vmatprep.subr.mxu1 %v18565_v26 }
 0xe2c   :  { %14925 = vmatprep.subr.mxu0 %v18565_v26  ;;  %14913 = vmatmul.mubr.msk.f32.vlgmr.msra.gmra.mxu1 %vm3352_vm5, %v10064_v59 }
 0xe2d   :  { %v15282_v12 = vpop.eup %15281  ;;  %14918 = vmatmul.mubr.msk.f32.vlgmr.msra.gmra.mxu0 %vm3352_vm5, %v10065_v27  ;;  %14921 = vmatpush3.msk.msra.mxu1 %vm3356_vm3, %v17979_v42 }
 0xe2e   :  { %v10066_v38 = vmul.f32 %v15282_v12, %v17918_v40  ;;  %14926 = vmatpush3.msk.msra.mxu0 %vm3356_vm3, %v12380_v50  ;;  %14922 = vmatprep.mubr.msk.f32.mxu1 %vm15353_vm1, %v18565_v26 }
 0xe2f   :  { %14930 = vmatprep.subr.mxu1 %v18565_v26  ;;  %14927 = vmatprep.mubr.msk.f32.mxu0 %vm15353_vm1, %v18565_v26 }
 0xe30   :  { %14923 = vmatmul.mubr.msk.f32.vlgmr.msra.gmra.mxu1 %vm3352_vm5, %v10066_v38 }
 0xe31   :  { %14932 = vmatprep.mubr.msk.f32.mxu1 %vm15353_vm1, %v18565_v26  ;;  %v15284_v16 = vpop.eup %15283 }
 0xe32   :  { %v10068_v40 = vmul.f32 %v15284_v16, %v17922_v37 }
 0xe43   :  { %v10001_v62 = vpop.xlane.xlu1 %10000 }
 0xe44   :  { %15285 = vrcp.f32 %v10001_v62 }
 0xe47   :  { %v12457_v42 = vpop.permute.xlu1 %12456 }
 0xe48   :  { %14931 = vmatpush3.msk.msra.mxu1 %vm3356_vm3, %v12457_v42  ;;  %v13749_v42 = vld [vmem:[%s18512_s3 + $0x38] sm:$0xff] }
 0xe49   :  { %14933 = vmatmul.mubr.msk.f32.vlgmr.msra.gmra.mxu1 %vm3352_vm5, %v10068_v40  ;;  %14935 = vmatprep.subr.mxu0 %v13749_v42 }
 0xe51   :  { %v15286_v53 = vpop.eup %15285 }
 0xe52   :  { %v10067_v63 = vmul.f32 %v15286_v53, %v17938_v46 }
 0xe54   :  { %14928 = vmatmul.mubr.msk.f32.vlgmr.msra.gmra.mxu0 %vm3352_vm5, %v10067_v63 }
 0xe55   :  { %14936 = vmatpush3.msra.mxu0 %v13749_v42 }
 0xe73   :  { %v18149_v35 = vpop.f32.mrf.mxu0 }
 0xe75   :  { %v14779_v25 = vpop.f32.mrf.mxu0 }
 0xe76   :  { %v13748_v25 = vld [vmem:[%s18512_s3 + $0x30] sm:$0xff] }
 0xe77   :  { %14937 = vmatprep.subr.mxu0 %v13748_v25 }
 0xe78   :  { %14938 = vmatpush3.msra.mxu0 %v13748_v25 }
 0xe7c   :  { %v18151_v24 = vpop.f32.mrf.mxu0 }
 0xe7e   :  { %v14789_v10 = vpop.f32.mrf.mxu0 }
 0xe7f   :  { %v13747_v10 = vld [vmem:[%s18512_s3 + $0x28] sm:$0xff] }
 0xe80   :  { %14939 = vmatprep.subr.mxu0 %v13747_v10 }
 0xe81   :  { %14940 = vmatpush3.msra.mxu0 %v13747_v10 }
 0xe8b   :  { %v18153_v51 = vpop.f32.mrf.mxu1 }
 0xe8d   :  { %v14784_v30 = vpop.f32.mrf.mxu1 }
 0xe8e   :  { %v13746_v30 = vld [vmem:[%s18512_s3 + $0x20] sm:$0xff] }
 0xe8f   :  { %v18155_v37 = vpop.f32.mrf.mxu1  ;;  %14941 = vmatprep.subr.mxu0 %v13746_v30 }
 0xe90   :  { %14942 = vmatpush3.msra.mxu0 %v13746_v30 }
 0xe91   :  { %v14794_v28 = vpop.f32.mrf.mxu1 }
 0xe93   :  { %v18157_v31 = vpop.f32.mrf.mxu1 }
 0xe95   :  { %v14804_v44 = vpop.f32.mrf.mxu1 }
 0xe97   :  { %v18159_v22 = vpop.f32.mrf.mxu1 }
 0xe99   :  { %v14814_v46 = vpop.f32.mrf.mxu1 }
 0xeb0   :  { %v18161_v4 = vpop.f32.mrf.mxu0 }
 0xeb2   :  { %v14799_v55 = vpop.f32.mrf.mxu0 }
 0xeb4   :  { %v18163_v29 = vpop.f32.mrf.mxu0 }
 0xeb6   :  { %v14809_v3 = vpop.f32.mrf.mxu0 }
 0xebe   :  { %v10758_v57 = vpop.f32.mrf.mxu0 }
 0xebf   :  { %12541 = vrot.lane.b32.xlu0 %v10758_v57, %s15357_s19 }
 0xec0   :  { %v14819_v33 = vpop.f32.mrf.mxu0  ;;  %v10835_v56 = vpop.f32.mrf.mxu1 }
 0xec1   :  { %12543 = vrot.lane.b32.xlu1 %v10835_v56, %s15357_s19 }
 0xec2   :  { %v14824_v7 = vpop.f32.mrf.mxu1 }
 0xec6   :  { %v10912_v19 = vpop.f32.mrf.mxu0 }
 0xec7   :  { %12545 = vrot.lane.b32.xlu0 %v10912_v19, %s15357_s19 }
 0xec8   :  { %v14829_v1 = vpop.f32.mrf.mxu0 }
 0xeca   :  { %v10989_v39 = vpop.f32.mrf.mxu1 }
 0xecb   :  { %v11066_v41 = vpop.f32.mrf.mxu0  ;;  %12547 = vrot.lane.b32.xlu1 %v10989_v39, %s15357_s19 }
 0xecc   :  { %12549 = vrot.lane.b32.xlu0 %v11066_v41, %s15357_s19  ;;  %v14834_v2 = vpop.f32.mrf.mxu1 }
 0xecd   :  { %v14839_v8 = vpop.f32.mrf.mxu0 }
 0xece   :  { %v11143_v58 = vpop.f32.mrf.mxu1 }
 0xecf   :  { %v11220_v6 = vpop.f32.mrf.mxu0  ;;  %12551 = vrot.lane.b32.xlu1 %v11143_v58, %s15357_s19 }
 0xed0   :  { %12553 = vrot.lane.b32.xlu0 %v11220_v6, %s15357_s19  ;;  %v14844_v5 = vpop.f32.mrf.mxu1 }
 0xed1   :  { %v14849_v9 = vpop.f32.mrf.mxu0 }
 0xed2   :  { %v11297_v11 = vpop.f32.mrf.mxu1 }
 0xed3   :  { %v11374_v60 = vpop.f32.mrf.mxu0  ;;  %12555 = vrot.lane.b32.xlu1 %v11297_v11, %s15357_s19  ;;  %s15327_s19 = scalar_lea.vmem %s13590_s18, 32 }
 0xed4   :  { %12573 = vrot.lane.b32.xlu0 %v11374_v60, %s15358_s20  ;;  %v14854_v0 = vpop.f32.mrf.mxu1  ;;  %p15328_p0 = scmp.ne.s32.totalorder %s13590_s18, %s15327_s19  ;;  %p15333_p2 = scmp.lt.s32.totalorder %s15327_s19, %s15327_s19 }
 0xed5   :  { %v14859_v34 = vpop.f32.mrf.mxu0 }
 0xed6   :  { %v11451_v47 = vpop.f32.mrf.mxu1  ;;  %p15334_p3 = por %p15333_p2, %p15332_p1 }
 0xed7   :  { %v11528_v15 = vpop.f32.mrf.mxu0  ;;  %12575 = vrot.lane.b32.xlu1 %v11451_v47, %s15358_s20 }
 0xed8   :  { %12577 = vrot.lane.b32.xlu0 %v11528_v15, %s15358_s20  ;;  %v14864_v49 = vpop.f32.mrf.mxu1  ;;  %p15335_p4 = pnand %p15334_p3, %p15328_p0 }
 0xed9   :  { %v14869_v21 = vpop.f32.mrf.mxu0 }
 0xeda   :  { %v11605_v45 = vpop.f32.mrf.mxu1 }
 0xedb   :  { %v11682_v13 = vpop.f32.mrf.mxu0  ;;  %12579 = vrot.lane.b32.xlu1 %v11605_v45, %s15358_s20 }
 0xedc   :  { %12581 = vrot.lane.b32.xlu0 %v11682_v13, %s15358_s20  ;;  %v14874_v14 = vpop.f32.mrf.mxu1 }
 0xedd   :  { %v14879_v61 = vpop.f32.mrf.mxu0 }
 0xede   :  { %v11759_v18 = vpop.f32.mrf.mxu1 }
 0xedf   :  { %v11836_v20 = vpop.f32.mrf.mxu0  ;;  %12583 = vrot.lane.b32.xlu1 %v11759_v18, %s15358_s20 }
 0xee0   :  { %12585 = vrot.lane.b32.xlu0 %v11836_v20, %s15358_s20  ;;  %v14884_v23 = vpop.f32.mrf.mxu1 }
 0xee1   :  { %v14889_v52 = vpop.f32.mrf.mxu0 }
 0xee2   :  { %v11913_v43 = vpop.f32.mrf.mxu1 }
 0xee3   :  { %v11990_v32 = vpop.f32.mrf.mxu0  ;;  %12587 = vrot.lane.b32.xlu1 %v11913_v43, %s15358_s20 }
 0xee4   :  { %12605 = vrot.lane.b32.xlu0 %v11990_v32, %s15359_s21  ;;  %v14894_v48 = vpop.f32.mrf.mxu1 }
 0xee5   :  { %v14899_v17 = vpop.f32.mrf.mxu0  ;;  %v18618_v48 = vld [vmem:[#allocation5_spill] sm:$0xff] }
 0xee8   :  { %v12067_v54 = vpop.f32.mrf.mxu1 }
 0xee9   :  { %v12144_v36 = vpop.f32.mrf.mxu0  ;;  %12607 = vrot.lane.b32.xlu1 %v12067_v54, %s15359_s21 }
 0xeea   :  { %12609 = vrot.lane.b32.xlu0 %v12144_v36, %s15359_s21  ;;  %v14904_v59 = vpop.f32.mrf.mxu1 }
 0xeeb   :  { %v14909_v27 = vpop.f32.mrf.mxu0 }
 0xeec   :  { %v12221_v12 = vpop.f32.mrf.mxu1 }
 0xeed   :  { %v12298_v50 = vpop.f32.mrf.mxu0  ;;  %12611 = vrot.lane.b32.xlu1 %v12221_v12, %s15359_s21 }
 0xeee   :  { %12613 = vrot.lane.b32.xlu0 %v12298_v50, %s15359_s21  ;;  %v14914_v38 = vpop.f32.mrf.mxu1 }
 0xeef   :  { %v14919_v62 = vpop.f32.mrf.mxu0 }
 0xef0   :  { %v12375_v16 = vpop.f32.mrf.mxu1 }
 0xef1   :  { %12615 = vrot.lane.b32.xlu1 %v12375_v16, %s15359_s21 }
 0xef2   :  { %v14924_v40 = vpop.f32.mrf.mxu1 }
 0xf09   :  { %v12529_v53 = vpop.f32.mrf.mxu1 }
 0xf0a   :  { %12619 = vrot.lane.b32.xlu1 %v12529_v53, %s15359_s21 }
 0xf0b   :  { %v14934_v63 = vpop.f32.mrf.mxu1 }
 0xf14   :  { %v12452_v28 = vpop.f32.mrf.mxu0 }
 0xf15   :  { %12617 = vrot.lane.b32.xlu0 %v12452_v28, %s15359_s21 }
 0xf16   :  { %v14929_v44 = vpop.f32.mrf.mxu0 }
 0xf31   :  { %v12542_v46 = vpop.permute.xlu0 %12541 }
 0xf32   :  { %v12629_v34 = vsel %vm317_vm2, %v18149_v35, %v12542_v46 }
 0xf33   :  { %v12544_v55 = vpop.permute.xlu1 %12543 }
 0xf34   :  { %v12630_v11 = vsel %vm317_vm2, %v18153_v51, %v12544_v55 }
 0xf39   :  { %v12546_v3 = vpop.permute.xlu0 %12545 }
 0xf3a   :  { %v12631_v21 = vsel %vm317_vm2, %v18151_v24, %v12546_v3 }
 0xf3d   :  { %v12548_v57 = vpop.permute.xlu1 %12547 }
 0xf3e   :  { %v12550_v33 = vpop.permute.xlu0 %12549  ;;  %v12632_v45 = vsel %vm317_vm2, %v18155_v37, %v12548_v57 }
 0xf3f   :  { %v12633_v24 = vsel %vm317_vm2, %v18161_v4, %v12550_v33 }
 0xf41   :  { %v12552_v56 = vpop.permute.xlu1 %12551 }
 0xf42   :  { %v12554_v7 = vpop.permute.xlu0 %12553  ;;  %v12634_v37 = vsel %vm317_vm2, %v18157_v31, %v12552_v56 }
 0xf43   :  { %v12635_v31 = vsel %vm317_vm2, %v18163_v29, %v12554_v7 }
 0xf45   :  { %v12556_v19 = vpop.permute.xlu1 %12555 }
 0xf46   :  { %v12574_v1 = vpop.permute.xlu0 %12573  ;;  %v12636_v38 = vsel %vm317_vm2, %v18159_v22, %v12556_v19  ;;  %v13900_v22 = vld [vmem:[%s18513_s4 + $0x1] ss:$0 sm:$0xff] }
 0xf47   :  { %v12637_v49 = vsel %vm5920_vm6, %v12629_v34, %v12574_v1  ;;  %v12700_v29 = vcombine.low %v13900_v22, %v13900_v22  ;;  %v18622_v34 = vld [vmem:[#allocation8_spill] sm:$0xff] }
 0xf49   :  { %v12576_v39 = vpop.permute.xlu1 %12575  ;;  %v12707_v28 = vrot.slane %v12700_v29, %v18618_v48 }
 0xf4a   :  { %v12578_v41 = vpop.permute.xlu0 %12577  ;;  %v12638_v60 = vsel %vm5920_vm6, %v12630_v11, %v12576_v39  ;;  %v18619_v39 = vld [vmem:[#allocation14_spill] sm:$0xff] }
 0xf4b   :  { %v12639_v51 = vsel %vm5920_vm6, %v12631_v21, %v12578_v41  ;;  %v12708_v44 = vcombine.low %v12707_v28, %v12707_v28 }
 0xf4d   :  { %v12580_v2 = vpop.permute.xlu1 %12579 }
 0xf4e   :  { %v12582_v8 = vpop.permute.xlu0 %12581  ;;  %v12640_v14 = vsel %vm5920_vm6, %v12632_v45, %v12580_v2 }
 0xf4f   :  { %v12641_v43 = vsel %vm5920_vm6, %v12633_v24, %v12582_v8  ;;  %v18620_v8 = vld [vmem:[#allocation6_spill] sm:$0xff]  ;;  %v18626_v24 = vld [vmem:[#allocation16_spill] sm:$0xff] }
 0xf51   :  { %v12584_v58 = vpop.permute.xlu1 %12583 }
 0xf52   :  { %v12586_v6 = vpop.permute.xlu0 %12585  ;;  %v12642_v32 = vsel %vm5920_vm6, %v12634_v37, %v12584_v58 }
 0xf53   :  { %v12643_v62 = vsel %vm5920_vm6, %v12635_v31, %v12586_v6 }
 0xf55   :  { %v12588_v5 = vpop.permute.xlu1 %12587 }
 0xf56   :  { %v12606_v9 = vpop.permute.xlu0 %12605  ;;  %v12644_v16 = vsel %vm5920_vm6, %v12636_v38, %v12588_v5 }
 0xf57   :  { %v12645_v13 = vsel %vm5929_vm7, %v12637_v49, %v12606_v9  ;;  %v18623_v49 = vld [vmem:[#allocation11_spill] sm:$0xff] }
 0xf5b   :  { %v12608_v0 = vpop.permute.xlu1 %12607 }
 0xf5c   :  { %v12610_v47 = vpop.permute.xlu0 %12609  ;;  %v12646_v15 = vsel %vm5929_vm7, %v12638_v60, %v12608_v0  ;;  %v18621_v60 = vld [vmem:[#allocation7_spill] sm:$0xff] }
 0xf5d   :  { %v12666_v61 = vcombine.low %v12645_v13, %v12646_v15  ;;  %v12647_v35 = vsel %vm5929_vm7, %v12639_v51, %v12610_v47  ;;  %v18624_v13 = vld [vmem:[#allocation13_spill] sm:$0xff] }
 0xf5f   :  { %v12612_v18 = vpop.permute.xlu1 %12611  ;;  %v12674_v17 = vrot.slane %v12666_v61, %v18618_v48 }
 0xf60   :  { %v12648_v20 = vsel %vm5929_vm7, %v12640_v14, %v12612_v18  ;;  %v12614_v23 = vpop.permute.xlu0 %12613 }
 0xf61   :  { %v12667_v52 = vcombine.low %v12647_v35, %v12648_v20  ;;  %v12649_v59 = vsel %vm5929_vm7, %v12641_v43, %v12614_v23  ;;  %v18625_v35 = vld [vmem:[#allocation9_spill] sm:$0xff] }
 0xf63   :  { %v12681_v54 = vrot.slane %v12667_v52, %v18618_v48  ;;  %v12616_v36 = vpop.permute.xlu1 %12615 }
 0xf64   :  { %v12650_v27 = vsel %vm5929_vm7, %v12642_v32, %v12616_v36 }
 0xf65   :  { %v12682_v12 = vcombine.low %v12674_v17, %v12681_v54  ;;  %v12683_v50 = vcombine.low %v12649_v59, %v12650_v27 }
 0xf67   :  { %14943 = vmatprep.mubr.msk.f32.mxu0 %vm144_vm0, %v12682_v12  ;;  %v12691_v25 = vrot.slane %v12683_v50, %v18618_v48 }
 0xf7c   :  { %v12620_v4 = vpop.permute.xlu1 %12619 }
 0xf7d   :  { %v12652_v42 = vsel %vm5929_vm7, %v12644_v16, %v12620_v4 }
 0xf87   :  { %v12618_v40 = vpop.permute.xlu0 %12617 }
 0xf88   :  { %v12651_v53 = vsel %vm5929_vm7, %v12643_v62, %v12618_v40 }
 0xf89   :  { %v12684_v63 = vcombine.low %v12651_v53, %v12652_v42 }
 0xf8b   :  { %v12698_v10 = vrot.slane %v12684_v63, %v18618_v48 }
 0xf8d   :  { %v12699_v30 = vcombine.low %v12691_v25, %v12698_v10 }
 0xf8f   :  { %14944 = vmatmul.mubr.msk.f32.vlgmr.msra.gmra.mxu0 %vm144_vm0, %v12699_v30 }
0x104f   :  { %v14945_v46 = vpop.f32.mrf.mxu0 }
0x1050   :  { %v12786_v55 = vadd.f32 %v14945_v46, %v12708_v44 }
0x1051   :  { %v12780_v3 = vpop.f32.mrf.mxu0 }
0x1052   :  { %v12815_v57 = vrot.slane %v12786_v55, %v18618_v48  ;;  %v12781_v33 = vadd.f32 %v12780_v3, %v12708_v44  ;;  %v12808_v56 = vcombine.high %v12786_v55, %v12786_v55 }
0x1054   :  { %v12823_v7 = vcombine.high %v12815_v57, %v12815_v57  ;;  %v12791_v19 = vcombine.high %v12781_v33, %v12781_v33  ;;  %v12798_v1 = vrot.slane %v12781_v33, %v18618_v48  ;;  %v12837_v41 = vadd.f32 %v12815_v57, %v18619_v39 }
0x1055   :  { %v12822_v6 = vrot.slane %v12808_v56, %v18618_v48 }
0x1056   :  { %v12806_v2 = vcombine.high %v12798_v1, %v12798_v1  ;;  %v12833_v58 = vadd.f32 %v12798_v1, %v18620_v8  ;;  %v12853_v5 = vsel %vm6126_vm8, %v12837_v41, 0.0  ;;  %v12805_v9 = vrot.slane %v12791_v19, %v18618_v48 }
0x1057   :  { %12854 = vadd.xlane.f32.xlu1 %v12853_v5  ;;  %v12838_v47 = vadd.f32 %v12823_v7, %v18622_v34  ;;  %v12839_v21 = vadd.f32 %v12822_v6, %v18623_v49  ;;  %v12824_v23 = vcombine.high %v12822_v6, %v12822_v6 }
0x1058   :  { %v12841_v11 = vsel %vm6126_vm8, %v12833_v58, 0.0  ;;  %v12834_v0 = vadd.f32 %v12806_v2, %v18621_v60  ;;  %v12835_v51 = vadd.f32 %v12805_v9, %v18624_v13  ;;  %v12807_v14 = vcombine.high %v12805_v9, %v12805_v9  ;;  %v13754_v9 = vld [vmem:[%s18514_s5 + $0x38] sm:$0xff]  ;;  %v13752_v60 = vld [vmem:[%s18514_s5 + $0x28] sm:$0xff] }
0x1059   :  { %12842 = vadd.xlane.f32.xlu0 %v12841_v11  ;;  %v12856_v45 = vsel %vm6126_vm8, %v12838_v47, 0.0  ;;  %v12859_v61 = vsel %vm6126_vm8, %v12839_v21, 0.0  ;;  %v12840_v37 = vadd.f32 %v12824_v23, %v18626_v24  ;;  %v13753_v11 = vld [vmem:[%s18514_s5 + $0x30] sm:$0xff]  ;;  %14946 = vmatprep.subr.mxu1 %v13754_v9 }
0x105a   :  { %v12844_v15 = vsel %vm6126_vm8, %v12834_v0, 0.0  ;;  %v12847_v18 = vsel %vm6126_vm8, %v12835_v51, 0.0  ;;  %v12836_v20 = vadd.f32 %v12807_v14, %v18625_v35  ;;  %14947 = vmatpush3.msra.mxu1 %v13754_v9 }
0x105b   :  { %12845 = vadd.xlane.f32.xlu1 %v12844_v15  ;;  %v12862_v43 = vsel %vm6126_vm8, %v12840_v37, 0.0  ;;  %14948 = vmatprep.subr.mxu1 %v13753_v11 }
0x105c   :  { %v12850_v52 = vsel %vm6126_vm8, %v12836_v20, 0.0  ;;  %14949 = vmatpush3.msra.mxu1 %v13753_v11 }
0x105d   :  { %12857 = vadd.xlane.f32.xlu0 %v12856_v45  ;;  %14950 = vmatprep.subr.mxu1 %v13752_v60 }
0x105e   :  { %14951 = vmatpush3.msra.mxu1 %v13752_v60 }
0x105f   :  { %12860 = vadd.xlane.f32.xlu1 %v12859_v61 }
0x1061   :  { %12848 = vadd.xlane.f32.xlu0 %v12847_v18 }
0x1065   :  { %12851 = vadd.xlane.f32.xlu0 %v12850_v52 }
0x1069   :  { %12863 = vadd.xlane.f32.xlu0 %v12862_v43 }
0x10e0   :  { %v12855_v32 = vpop.xlane.xlu1 %12854 }
0x10e1   :  { %v12869_v17 = vmul.f32 0.03125, %v12855_v32 }
0x10e2   :  { %v12843_v54 = vpop.xlane.xlu0 %12842 }
0x10e3   :  { %v12865_v36 = vmul.f32 0.03125, %v12843_v54  ;;  %v18263_v59 = vsub.f32 %v12837_v41, %v12869_v17 }
0x10e4   :  { %v12846_v12 = vpop.xlane.xlu1 %12845 }
0x10e5   :  { %v18265_v27 = vsub.f32 %v12833_v58, %v12865_v36  ;;  %v12866_v50 = vmul.f32 0.03125, %v12846_v12  ;;  %v12885_v31 = vmul.f32 %v18263_v59, %v18263_v59 }
0x10e6   :  { %v12858_v4 = vpop.xlane.xlu0 %12857 }
0x10e7   :  { %v12870_v38 = vmul.f32 0.03125, %v12858_v4  ;;  %v12901_v62 = vsel %vm6126_vm8, %v12885_v31, 0.0  ;;  %v12881_v16 = vmul.f32 %v18265_v27, %v18265_v27  ;;  %v18272_v40 = vsub.f32 %v12834_v0, %v12866_v50  ;;  %v13751_v0 = vld [vmem:[%s18514_s5 + $0x20] sm:$0xff] }
0x10e8   :  { %12902 = vadd.xlane.f32.xlu1 %v12901_v62  ;;  %v12861_v53 = vpop.xlane.xlu1 %12860  ;;  %14952 = vmatprep.subr.mxu1 %v13751_v0 }
0x10e9   :  { %v18274_v42 = vsub.f32 %v12838_v47, %v12870_v38  ;;  %v12871_v63 = vmul.f32 0.03125, %v12861_v53  ;;  %v12889_v22 = vsel %vm6126_vm8, %v12881_v16, 0.0  ;;  %v12882_v46 = vmul.f32 %v18272_v40, %v18272_v40  ;;  %14953 = vmatpush3.msra.mxu1 %v13751_v0 }
0x10ea   :  { %v12849_v25 = vpop.xlane.xlu0 %12848  ;;  %14976 = vmatprep.subr.mxu1 %v18565_v26 }
0x10eb   :  { %v12867_v10 = vmul.f32 0.03125, %v12849_v25  ;;  %v12886_v30 = vmul.f32 %v18274_v42, %v18274_v42  ;;  %v18279_v29 = vsub.f32 %v12839_v21, %v12871_v63  ;;  %v12892_v7 = vsel %vm6126_vm8, %v12882_v46, 0.0 }
0x10ec   :  { %12890 = vadd.xlane.f32.xlu1 %v12889_v22 }
0x10ed   :  { %v18281_v28 = vsub.f32 %v12835_v51, %v12867_v10  ;;  %v12904_v44 = vsel %vm6126_vm8, %v12886_v30, 0.0  ;;  %v12887_v19 = vmul.f32 %v18279_v29, %v18279_v29  ;;  %v13903_v30 = vld [vmem:[%s18518_s9 + $0x1] ss:$0 sm:$0xff] }
0x10ee   :  { %12905 = vadd.xlane.f32.xlu0 %v12904_v44  ;;  %v12852_v55 = vpop.xlane.xlu0 %12851 }
0x10ef   :  { %v12868_v3 = vmul.f32 0.03125, %v12852_v55  ;;  %v12883_v57 = vmul.f32 %v18281_v28, %v18281_v28  ;;  %v12907_v8 = vsel %vm6126_vm8, %v12887_v19, 0.0 }
0x10f1   :  { %v18288_v33 = vsub.f32 %v12836_v20, %v12868_v3  ;;  %v12895_v56 = vsel %vm6126_vm8, %v12883_v57, 0.0 }
0x10f2   :  { %12896 = vadd.xlane.f32.xlu1 %v12895_v56  ;;  %12893 = vadd.xlane.f32.xlu0 %v12892_v7  ;;  %v12864_v1 = vpop.xlane.xlu0 %12863 }
0x10f3   :  { %v12872_v39 = vmul.f32 0.03125, %v12864_v1  ;;  %v12884_v41 = vmul.f32 %v18288_v33, %v18288_v33 }
0x10f5   :  { %v18296_v2 = vsub.f32 %v12840_v37, %v12872_v39  ;;  %v12898_v58 = vsel %vm6126_vm8, %v12884_v41, 0.0 }
0x10f6   :  { %12908 = vadd.xlane.f32.xlu1 %v12907_v8  ;;  %12899 = vadd.xlane.f32.xlu0 %v12898_v58 }
0x10f7   :  { %v12888_v6 = vmul.f32 %v18296_v2, %v18296_v2 }
0x10f9   :  { %v12910_v5 = vsel %vm6126_vm8, %v12888_v6, 0.0 }
0x10fa   :  { %12911 = vadd.xlane.f32.xlu0 %v12910_v5 }
0x1171   :  { %v12903_v34 = vpop.xlane.xlu1 %12902 }
0x1172   :  { %v12917_v15 = vmul.f32 0.03125, %v12903_v34 }
0x1174   :  { %v12925_v14 = vadd.f32 1e-05, %v12917_v15 }
0x1175   :  { %v12891_v47 = vpop.xlane.xlu1 %12890 }
0x1176   :  { %v12913_v49 = vmul.f32 0.03125, %v12891_v47 }
0x1177   :  { %v12906_v21 = vpop.xlane.xlu0 %12905 }
0x1178   :  { %v12918_v45 = vmul.f32 0.03125, %v12906_v21  ;;  %v12921_v13 = vadd.f32 1e-05, %v12913_v49 }
0x117a   :  { %v12926_v51 = vadd.f32 1e-05, %v12918_v45  ;;  %15287 = vrsqrt.f32 %v12921_v13  ;;  %v13763_v13 = vld [vmem:[%s18516_s7 + $0x78] sm:$0xff] }
0x117b   :  { %v12897_v61 = vpop.xlane.xlu1 %12896  ;;  %v12894_v18 = vpop.xlane.xlu0 %12893  ;;  %14957 = vmatprep.subr.mxu0 %v13763_v13 }
0x117c   :  { %v12915_v35 = vmul.f32 0.03125, %v12897_v61  ;;  %v12914_v20 = vmul.f32 0.03125, %v12894_v18  ;;  %15289 = vrsqrt.f32 %v12926_v51  ;;  %14958 = vmatpush3.msra.mxu0 %v13763_v13  ;;  %v13762_v51 = vld [vmem:[%s18516_s7 + $0x70] sm:$0xff]  ;;  %v13760_v61 = vld [vmem:[%s18516_s7 + $0x60] sm:$0xff]  ;;  %v13759_v18 = vld [vmem:[%s18516_s7 + $0x58] sm:$0xff] }
0x117d   :  { %15291 = vrsqrt.f32 %v12925_v14  ;;  %14959 = vmatprep.subr.mxu0 %v13762_v51  ;;  %v13761_v14 = vld [vmem:[%s18516_s7 + $0x68] sm:$0xff] }
0x117e   :  { %v12923_v23 = vadd.f32 1e-05, %v12915_v35  ;;  %v12922_v52 = vadd.f32 1e-05, %v12914_v20  ;;  %14960 = vmatpush3.msra.mxu0 %v13762_v51  ;;  %v13758_v35 = vld [vmem:[%s18516_s7 + $0x50] sm:$0xff]  ;;  %v13757_v20 = vld [vmem:[%s18516_s7 + $0x48] sm:$0xff] }
0x117f   :  { %v12909_v24 = vpop.xlane.xlu1 %12908  ;;  %v12900_v37 = vpop.xlane.xlu0 %12899  ;;  %14961 = vmatprep.subr.mxu0 %v13761_v14 }
0x1180   :  { %15293 = vrsqrt.f32 %v12923_v23  ;;  %v12919_v43 = vmul.f32 0.03125, %v12909_v24  ;;  %v12916_v32 = vmul.f32 0.03125, %v12900_v37  ;;  %14962 = vmatpush3.msra.mxu0 %v13761_v14  ;;  %v13756_v23 = vld [vmem:[%s18516_s7 + $0x40] sm:$0xff] }
0x1181   :  { %15295 = vrsqrt.f32 %v12922_v52  ;;  %14963 = vmatprep.subr.mxu0 %v13760_v61  ;;  %v13905_v52 = vld [vmem:[%s18515_s6 + $0x1] ss:$0 sm:$0xff] }
0x1182   :  { %v12927_v17 = vadd.f32 1e-05, %v12919_v43  ;;  %v12924_v54 = vadd.f32 1e-05, %v12916_v32  ;;  %14964 = vmatpush3.msra.mxu0 %v13760_v61  ;;  %v13020_v24 = vcombine.low %v13905_v52, %v13905_v52 }
0x1183   :  { %v12912_v36 = vpop.xlane.xlu0 %12911  ;;  %14965 = vmatprep.subr.mxu0 %v13759_v18 }
0x1184   :  { %15297 = vrsqrt.f32 %v12927_v17  ;;  %v12920_v12 = vmul.f32 0.03125, %v12912_v36  ;;  %14966 = vmatpush3.msra.mxu0 %v13759_v18  ;;  %v13027_v37 = vrot.slane %v13020_v24, %v18618_v48 }
0x1185   :  { %15299 = vrsqrt.f32 %v12924_v54  ;;  %14967 = vmatprep.subr.mxu0 %v13758_v35 }
0x1186   :  { %v12928_v50 = vadd.f32 1e-05, %v12920_v12  ;;  %14968 = vmatpush3.msra.mxu0 %v13758_v35  ;;  %v13028_v43 = vcombine.low %v13027_v37, %v13027_v37 }
0x1187   :  { %v15288_v4 = vpop.eup %15287  ;;  %14969 = vmatprep.subr.mxu0 %v13757_v20 }
0x1188   :  { %15301 = vrsqrt.f32 %v12928_v50  ;;  %v12937_v16 = vmul.f32 %v15288_v4, %v18265_v27  ;;  %v13904_v27 = vld [vmem:[%s18519_s10 + $0x1] ss:$0 sm:$0xff]  ;;  %14970 = vmatpush3.msra.mxu0 %v13757_v20 }
0x1189   :  { %v15290_v31 = vpop.eup %15289  ;;  %14971 = vmatprep.subr.mxu0 %v13756_v23 }
0x118a   :  { %v15292_v38 = vpop.eup %15291  ;;  %v12942_v63 = vmul.f32 %v15290_v31, %v18274_v42  ;;  %v12951_v46 = vmul.f32 %v13903_v30, %v12937_v16  ;;  %14972 = vmatpush3.msra.mxu0 %v13756_v23 }
0x118b   :  { %v12941_v22 = vmul.f32 %v15292_v38, %v18263_v59 }
0x118c   :  { %v12956_v57 = vmul.f32 %v13903_v30, %v12942_v63  ;;  %v18331_v59 = vadd.f32 %v13904_v27, %v12951_v46 }
0x118d   :  { %v15294_v62 = vpop.eup %15293  ;;  %v12955_v7 = vmul.f32 %v13903_v30, %v12941_v22 }
0x118e   :  { %v15296_v53 = vpop.eup %15295  ;;  %v12939_v25 = vmul.f32 %v15294_v62, %v18281_v28  ;;  %v18333_v39 = vadd.f32 %v13904_v27, %v12956_v57 }
0x118f   :  { %v12938_v10 = vmul.f32 %v15296_v53, %v18272_v40 }
0x1190   :  { %v12953_v40 = vmul.f32 %v13903_v30, %v12939_v25 }
0x1191   :  { %v15298_v44 = vpop.eup %15297  ;;  %v12952_v55 = vmul.f32 %v13903_v30, %v12938_v10 }
0x1192   :  { %v15300_v3 = vpop.eup %15299  ;;  %v12943_v42 = vmul.f32 %v15298_v44, %v18279_v29  ;;  %v18336_v58 = vadd.f32 %v13904_v27, %v12953_v40 }
0x1193   :  { %v12940_v28 = vmul.f32 %v15300_v3, %v18288_v33  ;;  %v18329_v56 = vadd.f32 %v13904_v27, %v12952_v55  ;;  %v18342_v33 = vadd.f32 %v13904_v27, %v12955_v7 }
0x1194   :  { %v12957_v41 = vmul.f32 %v13903_v30, %v12943_v42 }
0x1195   :  { %v15302_v19 = vpop.eup %15301  ;;  %v12954_v1 = vmul.f32 %v13903_v30, %v12940_v28  ;;  %v12986_v29 = vcombine.low %v18331_v59, %v18329_v56 }
0x1196   :  { %v12944_v8 = vmul.f32 %v15302_v19, %v18296_v2  ;;  %v18346_v11 = vadd.f32 %v13904_v27, %v12957_v41  ;;  %v13003_v2 = vcombine.low %v18342_v33, %v18333_v39 }
0x1197   :  { %v18338_v6 = vadd.f32 %v13904_v27, %v12954_v1  ;;  %v12994_v0 = vrot.slane %v12986_v29, %v18618_v48 }
0x1198   :  { %v12958_v5 = vmul.f32 %v13903_v30, %v12944_v8  ;;  %v13011_v49 = vrot.slane %v13003_v2, %v18618_v48 }
0x1199   :  { %v12987_v9 = vcombine.low %v18336_v58, %v18338_v6 }
0x119a   :  { %v18348_v60 = vadd.f32 %v13904_v27, %v12958_v5  ;;  %v13908_v5 = vld [vmem:[%s18517_s8 + $0x1] ss:$0 sm:$0xff] }
0x119b   :  { %v13001_v34 = vrot.slane %v12987_v9, %v18618_v48  ;;  %v13208_v9 = vcombine.low %v13908_v5, %v13908_v5 }
0x119c   :  { %v13004_v47 = vcombine.low %v18346_v11, %v18348_v60 }
0x119d   :  { %v13002_v15 = vcombine.low %v12994_v0, %v13001_v34  ;;  %v13215_v2 = vrot.slane %v13208_v9, %v18618_v48 }
0x119e   :  { %v13018_v21 = vrot.slane %v13004_v47, %v18618_v48 }
0x119f   :  { %14954 = vmatprep.mubr.msk.f32.mxu1 %vm144_vm0, %v13002_v15  ;;  %v13216_v0 = vcombine.low %v13215_v2, %v13215_v2 }
0x11a0   :  { %v13019_v45 = vcombine.low %v13011_v49, %v13018_v21 }
0x11a2   :  { %14955 = vmatmul.mubr.msk.f32.vlgmr.msra.gmra.mxu1 %vm144_vm0, %v13019_v45 }
0x11a3   :  { %14984 = vmatprep.mubr.msk.f32.mxu1 %vm15353_vm1, %v18565_v26 }
0x1262   :  { %v14956_v32 = vpop.f32.mrf.mxu1 }
0x1263   :  { %v13106_v17 = vadd.f32 %v14956_v32, %v13028_v43 }
0x1264   :  { %v13100_v54 = vpop.f32.mrf.mxu1 }
0x1265   :  { %v13128_v36 = vcombine.high %v13106_v17, %v13106_v17  ;;  %v13135_v12 = vrot.slane %v13106_v17, %v18618_v48  ;;  %v13101_v50 = vadd.f32 %v13100_v54, %v13028_v43 }
0x1267   :  { %v13142_v4 = vrot.slane %v13128_v36, %v18618_v48  ;;  %v13143_v31 = vcombine.high %v13135_v12, %v13135_v12  ;;  %v13111_v38 = vcombine.high %v13101_v50, %v13101_v50  ;;  %v13118_v62 = vrot.slane %v13101_v50, %v18618_v48 }
0x1268   :  { %v13157_v44 = vmax.f32 %v13135_v12, 0.0 }
0x1269   :  { %v13144_v16 = vcombine.high %v13142_v4, %v13142_v4  ;;  %v13125_v53 = vrot.slane %v13111_v38, %v18618_v48  ;;  %v13158_v63 = vmax.f32 %v13143_v31, 0.0  ;;  %v13126_v25 = vcombine.high %v13118_v62, %v13118_v62 }
0x126a   :  { %v13159_v10 = vmax.f32 %v13142_v4, 0.0  ;;  %v13153_v46 = vmax.f32 %v13118_v62, 0.0 }
0x126b   :  { %v13160_v30 = vmax.f32 %v13144_v16, 0.0  ;;  %v13127_v22 = vcombine.high %v13125_v53, %v13125_v53  ;;  %v13154_v55 = vmax.f32 %v13126_v25, 0.0  ;;  %v13155_v27 = vmax.f32 %v13125_v53, 0.0 }
0x126c   :  { %v13191_v42 = vcombine.low %v13157_v44, %v13158_v63 }
0x126d   :  { %v13192_v3 = vcombine.low %v13159_v10, %v13160_v30  ;;  %v13156_v57 = vmax.f32 %v13127_v22, 0.0  ;;  %v13174_v28 = vcombine.low %v13153_v46, %v13154_v55 }
0x126e   :  { %v13199_v41 = vrot.slane %v13191_v42, %v18618_v48 }
0x126f   :  { %v13175_v40 = vcombine.low %v13155_v27, %v13156_v57  ;;  %v13206_v7 = vrot.slane %v13192_v3, %v18618_v48  ;;  %v13182_v19 = vrot.slane %v13174_v28, %v18618_v48 }
0x1271   :  { %v13189_v1 = vrot.slane %v13175_v40, %v18618_v48  ;;  %v13207_v29 = vcombine.low %v13199_v41, %v13206_v7 }
0x1273   :  { %v13190_v8 = vcombine.low %v13182_v19, %v13189_v1 }
0x1275   :  { %14973 = vmatprep.mubr.msk.f32.mxu0 %vm6505_vm9, %v13190_v8 }
0x1276   :  { %14974 = vmatmul.mubr.msk.f32.vlgmr.msra.gmra.mxu0 %vm6505_vm9, %v13207_v29 }
0x1336   :  { %v14975_v34 = vpop.f32.mrf.mxu0 }
0x1337   :  { %v13294_v47 = vadd.f32 %v14975_v34, %v13216_v0 }
0x1338   :  { %v13288_v15 = vpop.f32.mrf.mxu0 }
0x1339   :  { %v13289_v49 = vadd.f32 %v13288_v15, %v13216_v0  ;;  %v13316_v13 = vcombine.high %v13294_v47, %v13294_v47  ;;  %v13323_v51 = vrot.slane %v13294_v47, %v18618_v48 }
0x133b   :  { %v13299_v21 = vcombine.high %v13289_v49, %v13289_v49  ;;  %v13306_v45 = vrot.slane %v13289_v49, %v18618_v48  ;;  %v13330_v24 = vrot.slane %v13316_v13, %v18618_v48  ;;  %v13331_v37 = vcombine.high %v13323_v51, %v13323_v51 }
0x133d   :  { %v13313_v14 = vrot.slane %v13299_v21, %v18618_v48  ;;  %v13314_v61 = vcombine.high %v13306_v45, %v13306_v45  ;;  %v13341_v18 = vadd.f32 %v13306_v45, %v18331_v59  ;;  %v13345_v59 = vadd.f32 %v13323_v51, %v18342_v33  ;;  %v13501_v51 = vld [vmem:[%s18522_s13 + $0x18] sm:$0xff] }
0x133e   :  { %v13347_v48 = vadd.f32 %v13330_v24, %v18346_v11  ;;  %14977 = vmatpush3.msra.mxu1 %v13501_v51 }
0x133f   :  { %v13349_v35 = vsel %vm6126_vm8, %v13341_v18, 0.0  ;;  %v13342_v20 = vadd.f32 %v13314_v61, %v18329_v56  ;;  %v13343_v23 = vadd.f32 %v13313_v14, %v18336_v58  ;;  %v13315_v52 = vcombine.high %v13313_v14, %v13313_v14  ;;  %v13500_v14 = vld [vmem:[%s18522_s13 + $0x10] sm:$0xff]  ;;  %14978 = vmatprep.subr.mxu1 %v18565_v26  ;;  %v13499_v61 = vld [vmem:[%s18522_s13 + $0x8] sm:$0xff] }
0x1340   :  { %13350 = vadd.xlane.f32.xlu1 %v13349_v35  ;;  %v13346_v56 = vadd.f32 %v13331_v37, %v18333_v39  ;;  %v13332_v58 = vcombine.high %v13330_v24, %v13330_v24  ;;  %v13361_v36 = vsel %vm6126_vm8, %v13345_v59, 0.0  ;;  %v13367_v50 = vsel %vm6126_vm8, %v13347_v48, 0.0  ;;  %14979 = vmatpush3.msra.mxu1 %v13500_v14 }
0x1341   :  { %v13352_v43 = vsel %vm6126_vm8, %v13342_v20, 0.0  ;;  %v13344_v32 = vadd.f32 %v13315_v52, %v18338_v6  ;;  %v13355_v17 = vsel %vm6126_vm8, %v13343_v23, 0.0  ;;  %14980 = vmatprep.subr.mxu1 %v18565_v26 }
0x1342   :  { %13353 = vadd.xlane.f32.xlu0 %v13352_v43  ;;  %v13364_v12 = vsel %vm6126_vm8, %v13346_v56, 0.0  ;;  %v13348_v6 = vadd.f32 %v13332_v58, %v18348_v60  ;;  %14981 = vmatpush3.msra.mxu1 %v13499_v61 }
0x1343   :  { %v13358_v54 = vsel %vm6126_vm8, %v13344_v32, 0.0  ;;  %14982 = vmatprep.subr.mxu1 %v18565_v26 }
0x1344   :  { %13356 = vadd.xlane.f32.xlu1 %v13355_v17  ;;  %v13370_v33 = vsel %vm6126_vm8, %v13348_v6, 0.0 }
0x1346   :  { %13359 = vadd.xlane.f32.xlu0 %v13358_v54 }
0x1348   :  { %13362 = vadd.xlane.f32.xlu1 %v13361_v36 }
0x134a   :  { %13365 = vadd.xlane.f32.xlu0 %v13364_v12 }
0x134c   :  { %13368 = vadd.xlane.f32.xlu1 %v13367_v50 }
0x134e   :  { %13371 = vadd.xlane.f32.xlu0 %v13370_v33 }
0x13c9   :  { %v13351_v4 = vpop.xlane.xlu1 %13350 }
0x13ca   :  { %v13373_v39 = vmul.f32 0.03125, %v13351_v4 }
0x13cb   :  { %v13354_v31 = vpop.xlane.xlu0 %13353 }
0x13cc   :  { %v18424_v38 = vsub.f32 %v13341_v18, %v13373_v39  ;;  %v13374_v62 = vmul.f32 0.03125, %v13354_v31  ;;  %v13498_v18 = vld [vmem:[%s18522_s13] sm:$0xff] }
0x13cd   :  { %v13357_v16 = vpop.xlane.xlu1 %13356  ;;  %14983 = vmatpush3.msra.mxu1 %v13498_v18 }
0x13ce   :  { %v18426_v11 = vsub.f32 %v13342_v20, %v13374_v62  ;;  %v13375_v53 = vmul.f32 0.03125, %v13357_v16  ;;  %v13389_v60 = vmul.f32 %v18424_v38, %v18424_v38 }
0x13cf   :  { %v13360_v63 = vpop.xlane.xlu0 %13359 }
0x13d0   :  { %v18430_v25 = vsub.f32 %v13343_v23, %v13375_v53  ;;  %v13376_v10 = vmul.f32 0.03125, %v13360_v63  ;;  %v13397_v30 = vsel %vm6126_vm8, %v13389_v60, 0.0  ;;  %v13390_v22 = vmul.f32 %v18426_v11, %v18426_v11  ;;  %v13911_v53 = vld [vmem:[%s18520_s11 + $0x1] ss:$0 sm:$0xff] }
0x13d1   :  { %13398 = vadd.xlane.f32.xlu1 %v13397_v30  ;;  %v13363_v44 = vpop.xlane.xlu1 %13362 }
0x13d2   :  { %v18435_v46 = vsub.f32 %v13344_v32, %v13376_v10  ;;  %v13377_v55 = vmul.f32 0.03125, %v13363_v44  ;;  %v13400_v3 = vsel %vm6126_vm8, %v13390_v22, 0.0  ;;  %v13391_v27 = vmul.f32 %v18430_v25, %v18430_v25  ;;  %v13912_v10 = vld [vmem:[%s18521_s12 + $0x1] ss:$0 sm:$0xff] }
0x13d3   :  { %13401 = vadd.xlane.f32.xlu0 %v13400_v3  ;;  %v13366_v57 = vpop.xlane.xlu0 %13365 }
0x13d4   :  { %v18440_v42 = vsub.f32 %v13345_v59, %v13377_v55  ;;  %v13378_v28 = vmul.f32 0.03125, %v13366_v57  ;;  %v13403_v40 = vsel %vm6126_vm8, %v13391_v27, 0.0  ;;  %v13392_v7 = vmul.f32 %v18435_v46, %v18435_v46 }
0x13d5   :  { %13404 = vadd.xlane.f32.xlu1 %v13403_v40  ;;  %v13369_v19 = vpop.xlane.xlu1 %13368 }
0x13d6   :  { %v18445_v1 = vsub.f32 %v13346_v56, %v13378_v28  ;;  %v13379_v41 = vmul.f32 0.03125, %v13369_v19  ;;  %v13406_v8 = vsel %vm6126_vm8, %v13392_v7, 0.0  ;;  %v13393_v29 = vmul.f32 %v18440_v42, %v18440_v42 }
0x13d7   :  { %13407 = vadd.xlane.f32.xlu0 %v13406_v8  ;;  %v13372_v5 = vpop.xlane.xlu0 %13371 }
0x13d8   :  { %v18450_v9 = vsub.f32 %v13347_v48, %v13379_v41  ;;  %v13380_v2 = vmul.f32 0.03125, %v13372_v5  ;;  %v13409_v0 = vsel %vm6126_vm8, %v13393_v29, 0.0  ;;  %v13394_v34 = vmul.f32 %v18445_v1, %v18445_v1 }
0x13d9   :  { %13410 = vadd.xlane.f32.xlu1 %v13409_v0 }
0x13da   :  { %v18455_v47 = vsub.f32 %v13348_v6, %v13380_v2  ;;  %v13412_v15 = vsel %vm6126_vm8, %v13394_v34, 0.0  ;;  %v13395_v49 = vmul.f32 %v18450_v9, %v18450_v9 }
0x13db   :  { %13413 = vadd.xlane.f32.xlu0 %v13412_v15 }
0x13dc   :  { %v13415_v21 = vsel %vm6126_vm8, %v13395_v49, 0.0  ;;  %v13396_v45 = vmul.f32 %v18455_v47, %v18455_v47 }
0x13dd   :  { %13416 = vadd.xlane.f32.xlu1 %v13415_v21 }
0x13de   :  { %v13418_v13 = vsel %vm6126_vm8, %v13396_v45, 0.0 }
0x13df   :  { %13419 = vadd.xlane.f32.xlu0 %v13418_v13 }
0x145a   :  { %v13399_v35 = vpop.xlane.xlu1 %13398 }
0x145b   :  { %v13421_v20 = vmul.f32 0.03125, %v13399_v35 }
0x145c   :  { %v13402_v23 = vpop.xlane.xlu0 %13401 }
0x145d   :  { %v13429_v52 = vadd.f32 1e-05, %v13421_v20  ;;  %v13422_v24 = vmul.f32 0.03125, %v13402_v23 }
0x145e   :  { %v13405_v37 = vpop.xlane.xlu1 %13404 }
0x145f   :  { %15303 = vrsqrt.f32 %v13429_v52  ;;  %v13430_v43 = vadd.f32 1e-05, %v13422_v24  ;;  %v13423_v32 = vmul.f32 0.03125, %v13405_v37 }
0x1460   :  { %v13408_v17 = vpop.xlane.xlu0 %13407 }
0x1461   :  { %15305 = vrsqrt.f32 %v13430_v43  ;;  %v13431_v59 = vadd.f32 1e-05, %v13423_v32  ;;  %v13424_v54 = vmul.f32 0.03125, %v13408_v17 }
0x1462   :  { %v13411_v56 = vpop.xlane.xlu1 %13410 }
0x1463   :  { %15307 = vrsqrt.f32 %v13431_v59  ;;  %v13432_v58 = vadd.f32 1e-05, %v13424_v54  ;;  %v13425_v36 = vmul.f32 0.03125, %v13411_v56 }
0x1464   :  { %v13414_v48 = vpop.xlane.xlu0 %13413 }
0x1465   :  { %15309 = vrsqrt.f32 %v13432_v58  ;;  %v13433_v26 = vadd.f32 1e-05, %v13425_v36  ;;  %v13426_v12 = vmul.f32 0.03125, %v13414_v48 }
0x1466   :  { %v13417_v6 = vpop.xlane.xlu1 %13416 }
0x1467   :  { %15311 = vrsqrt.f32 %v13433_v26  ;;  %v13434_v50 = vadd.f32 1e-05, %v13426_v12  ;;  %v13427_v33 = vmul.f32 0.03125, %v13417_v6 }
0x1468   :  { %v13420_v4 = vpop.xlane.xlu0 %13419 }
0x1469   :  { %15313 = vrsqrt.f32 %v13434_v50  ;;  %v13435_v39 = vadd.f32 1e-05, %v13427_v33  ;;  %v13428_v31 = vmul.f32 0.03125, %v13420_v4 }
0x146b   :  { %15315 = vrsqrt.f32 %v13435_v39  ;;  %v13436_v62 = vadd.f32 1e-05, %v13428_v31 }
0x146c   :  { %v15304_v16 = vpop.eup %15303 }
0x146d   :  { %v13445_v60 = vmul.f32 %v15304_v16, %v18424_v38  ;;  %15317 = vrsqrt.f32 %v13436_v62 }
0x146e   :  { %v15306_v63 = vpop.eup %15305 }
0x146f   :  { %v13459_v30 = vmul.f32 %v13911_v53, %v13445_v60  ;;  %v13446_v22 = vmul.f32 %v15306_v63, %v18426_v11 }
0x1470   :  { %v15308_v44 = vpop.eup %15307 }
0x1471   :  { %v13473_v55 = vadd.f32 %v13912_v10, %v13459_v30  ;;  %v13460_v3 = vmul.f32 %v13911_v53, %v13446_v22  ;;  %v13447_v27 = vmul.f32 %v15308_v44, %v18430_v25 }
0x1472   :  { %v15310_v57 = vpop.eup %15309 }
0x1473   :  { %v13474_v28 = vadd.f32 %v13912_v10, %v13460_v3  ;;  %v13461_v40 = vmul.f32 %v13911_v53, %v13447_v27  ;;  %v13448_v7 = vmul.f32 %v15310_v57, %v18435_v46  ;;  %v13481_v19 = vsel %vm6126_vm8, %v13473_v55, 0.0 }
0x1474   :  { %v15312_v38 = vpop.eup %15311 }
0x1475   :  { %v13482_v41 = vsel %vm6126_vm8, %v13474_v28, 0.0  ;;  %v13475_v8 = vadd.f32 %v13912_v10, %v13461_v40  ;;  %v13462_v29 = vmul.f32 %v13911_v53, %v13448_v7  ;;  %v13449_v5 = vmul.f32 %v15312_v38, %v18440_v42 }
0x1476   :  { %v15314_v11 = vpop.eup %15313  ;;  %v13483_v2 = vadd.f32 %v13482_v41, %v13481_v19 }
0x1477   :  { %v13484_v0 = vsel %vm6126_vm8, %v13475_v8, 0.0  ;;  %v13476_v34 = vadd.f32 %v13912_v10, %v13462_v29  ;;  %v13463_v25 = vmul.f32 %v13911_v53, %v13449_v5  ;;  %v13450_v15 = vmul.f32 %v15314_v11, %v18445_v1 }
0x1478   :  { %v15316_v49 = vpop.eup %15315  ;;  %v13485_v21 = vadd.f32 %v13484_v0, %v13483_v2 }
0x1479   :  { %v13486_v46 = vsel %vm6126_vm8, %v13476_v34, 0.0  ;;  %v13477_v45 = vadd.f32 %v13912_v10, %v13463_v25  ;;  %v13464_v13 = vmul.f32 %v13911_v53, %v13450_v15  ;;  %v13451_v51 = vmul.f32 %v15316_v49, %v18450_v9 }
0x147a   :  { %v15318_v14 = vpop.eup %15317  ;;  %v13487_v61 = vadd.f32 %v13486_v46, %v13485_v21 }
0x147b   :  { %v13488_v42 = vsel %vm6126_vm8, %v13477_v45, 0.0  ;;  %v13478_v18 = vadd.f32 %v13912_v10, %v13464_v13  ;;  %v13465_v35 = vmul.f32 %v13911_v53, %v13451_v51  ;;  %v13452_v20 = vmul.f32 %v15318_v14, %v18455_v47  ;;  %v13913_v47 = vld [vmem:[%s18523_s14] ss:$0 sm:$0xff] }
0x147c   :  { %v13489_v23 = vadd.f32 %v13488_v42, %v13487_v61 }
0x147d   :  { %v13490_v52 = vsel %vm6126_vm8, %v13478_v18, 0.0  ;;  %v13479_v1 = vadd.f32 %v13912_v10, %v13465_v35  ;;  %v13466_v24 = vmul.f32 %v13911_v53, %v13452_v20 }
0x147e   :  { %v13491_v37 = vadd.f32 %v13490_v52, %v13489_v23 }
0x147f   :  { %v13492_v43 = vsel %vm6126_vm8, %v13479_v1, 0.0  ;;  %v13480_v32 = vadd.f32 %v13912_v10, %v13466_v24 }
0x1480   :  { %v13493_v17 = vadd.f32 %v13492_v43, %v13491_v37 }
0x1481   :  { %v13494_v9 = vsel %vm6126_vm8, %v13480_v32, 0.0 }
0x1482   :  { %v13495_v59 = vadd.f32 %v13494_v9, %v13493_v17 }
0x1484   :  { %v13497_v54 = vmul.f32 0.125, %v13495_v59 }
0x1486   :  { %14985 = vmatmul.mubr.msk.f32.vlgmr.msra.gmra.mxu1 %vm144_vm0, %v13497_v54 }
0x1546   :  { %v13578_v56 = vpop.f32.mrf.mxu1 }
0x1547   :  { %v13579_v58 = vadd.f32 %v13913_v47, %v13578_v56 }
0x1548   :  { %v14986_v36 = vpop.f32.mrf.mxu1 }
0x1549   :  { %13582 = vst.msk [vmem:[#allocation2] sm:$0x3] %vm2997_vm4, %v13579_v58 }
0x154a   :  { %15338 = shalt.err (!%p15335_p4)
}
0x154b   :  { %13592 = dma.vmem_to_hbm [thread:$0]  %s13590_s18, 32, %s18524_s15, [#allocation3]  }
0x154c   :  { %15347 = dma.done.wait [#allocation3], 32  }
0x154d   :  { %15348 = vsyncadd [#allocation3], 4294967264 }
0x154e   :  { %13596 = vsyncpa [#allocation3], 1 }

</bundles_post_ra>
